<compile_context>
chip_gen: v5e
topology: v5e:2x2
jax: 0.10.0
libtpu: 0.0.40
codegen_flags: <defaults>
</compile_context>

<pallas_src>
import functools

import jax
import jax.numpy as jnp
from jax import lax
from jax.experimental import pallas as pl
from jax.experimental.pallas import tpu as pltpu


def _newton_recip(x):
    """1/x via EUP approx reciprocal + one Newton step (~f32 accurate, no VALU divide)."""
    r = pl.reciprocal(x, approx=True)
    return r * (2.0 - x * r)


def _poincare_edge_kernel(x_ref, y_ref, cx2_ref, cy2_ref, probs_ref, dists_ref, *, c):
    i = pl.program_id(0)
    j = pl.program_id(1)
    tm, tn = probs_ref.shape

    x = x_ref[...]            # (tm, d)  row block of embeddings
    y = y_ref[...]            # (tn, d)  col block of embeddings
    cx2 = cx2_ref[...]        # (tm, 1)  c * ||x||^2  (pre-scaled in wrapper)
    cy2 = cy2_ref[...]        # (1, tn)  c * ||y||^2  (pre-scaled in wrapper)

    # <x_i, y_j> on the MXU with f32-equivalent precision (the cancellation in
    # the mobius norm is not accurate enough at the bf16-default pass).
    xy = lax.dot_general(
        x, y,
        dimension_numbers=(((1,), (1,)), ((), ())),
        preferred_element_type=jnp.float32,
        precision=lax.Precision.HIGHEST,
    )                          # (tm, tn)

    # mobius_add(-x, y) with curvature k = -c (geoopt convention):
    #   A         = 1 - 2c<x,y> + c||y||^2       = u + cy2
    #   B         = 1 - c||x||^2                  ((tm,1) only -> negligible VALU)
    #   denom     = 1 - 2c<x,y> + (c||x||^2)(c||y||^2) = u + cx2*cy2   (clamp 1e-15)
    #   c||num||^2 = A^2*cx2 - A*B*(2c<x,y>) + B^2*cy2
    cxy2 = jnp.float32(2.0 * c) * xy          # 2c<x,y>
    u = 1.0 - cxy2                            # hoisted common subexpression
    B = 1.0 - cx2                             # (tm, 1)
    A = u + cy2
    denom = jnp.maximum(u + cx2 * cy2, 1e-15)
    c_num_sq = (A * A) * cx2 - (A * B) * cxy2 + (B * B) * cy2
    s = jnp.sqrt(jnp.maximum(c_num_sq, 0.0))  # s = sqrt(c) * ||num||, z = s/denom

    # z clamp at (1 - 1e-7) expressed on s, so no divide is ever needed.
    s = jnp.minimum(s, denom * (1.0 - 1e-7))
    d_minus = denom - s

    # dist = (2/sqrt c)*artanh(z) = (1/sqrt c)*(log(denom+s) - log(denom-s))
    dlog = jnp.log(denom + s) - jnp.log(d_minus)
    if c == 1.0:
        dists = dlog
        # sigmoid(-2*artanh(z)) == (1 - z)/2 == 0.5*(denom - s)/denom -> no exp
        probs = (0.5 * d_minus) * _newton_recip(denom)
    else:
        dists = jnp.float32(1.0 / (float(c) ** 0.5)) * dlog
        probs = jax.nn.sigmoid(-dists)

    dists_ref[...] = dists.astype(dists_ref.dtype)

    probs = probs.astype(probs_ref.dtype)
    on_diag = jnp.logical_and(i * tm < (j + 1) * tn, j * tn < (i + 1) * tm)

    # Single probs store per tile; the iota/compare/select runs only on tiles
    # that actually intersect the diagonal.
    @pl.when(on_diag)
    def _():
        row = i * tm + lax.broadcasted_iota(jnp.int32, (tm, tn), 0)
        col = j * tn + lax.broadcasted_iota(jnp.int32, (tm, tn), 1)
        probs_ref[...] = jnp.where(row == col, 0.0, probs).astype(probs_ref.dtype)

    @pl.when(jnp.logical_not(on_diag))
    def _():
        probs_ref[...] = probs


def _round_up(x, m):
    return ((x + m - 1) // m) * m


def poincare_edge_generator(embeddings, c=1.0, tm=256, tn=512,
                            out_dtype=jnp.float32):
    """embeddings: (n, d) float32 on the Poincare ball. Returns (probs, dists).

    out_dtype=jnp.bfloat16 halves HBM writeback (the binding resource on v5e);
    in-kernel math always stays f32. For v7x, larger tiles (e.g. tn=1024) can
    amortize per-step overhead further and still fit default scoped VMEM.
    """
    n, d = embeddings.shape
    emb = embeddings.astype(jnp.float32)

    # Keep the target (lane-dense) tile sizes; clamp only when n is small.
    tm = max(8, min(tm, _round_up(n, 8)))
    tn = max(128, min(tn, _round_up(n, 128)))
    # v7x has 2 TensorCores: keep the leading "parallel" axis >= 2 programs.
    if _round_up(n, tm) // tm < 2 and n > 8:
        tm = max(8, _round_up(-(-n // 2), 8))
    # Rows/cols padded *independently* to multiples of tm/tn (no divisor
    # requirement -> no collapse to narrow stores for awkward n), sliced back.
    n_rows = _round_up(n, tm)
    n_cols = _round_up(n, tn)

    emb_rows = jnp.pad(emb, ((0, n_rows - n), (0, 0))) if n_rows != n else emb
    emb_cols = jnp.pad(emb, ((0, n_cols - n), (0, 0))) if n_cols != n else emb

    # Hoisted, pre-scaled squared norms (no per-tile re-reduction and no
    # in-kernel c / c^2 multiplies).
    csq = jnp.float32(c) * jnp.sum(emb * emb, axis=-1)
    cx2 = jnp.pad(csq, (0, n_rows - n)).reshape(n_rows, 1)
    cy2 = jnp.pad(csq, (0, n_cols - n)).reshape(1, n_cols)

    kernel = functools.partial(_poincare_edge_kernel, c=float(c))
    grid = (n_rows // tm, n_cols // tn)

    probs, dists = pl.pallas_call(
        kernel,
        out_shape=(
            jax.ShapeDtypeStruct((n_rows, n_cols), out_dtype),
            jax.ShapeDtypeStruct((n_rows, n_cols), out_dtype),
        ),
        grid_spec=pltpu.PrefetchScalarGridSpec(
            num_scalar_prefetch=0,
            grid=grid,
            in_specs=[
                pl.BlockSpec((tm, d), lambda i, j: (i, 0)),   # row block
                pl.BlockSpec((tn, d), lambda i, j: (j, 0)),   # col block
                pl.BlockSpec((tm, 1), lambda i, j: (i, 0)),   # c*||x||^2
                pl.BlockSpec((1, tn), lambda i, j: (0, j)),   # c*||y||^2
            ],
            out_specs=[
                pl.BlockSpec((tm, tn), lambda i, j: (i, j)),
                pl.BlockSpec((tm, tn), lambda i, j: (i, j)),
            ],
        ),
        compiler_params=pltpu.CompilerParams(
            dimension_semantics=("parallel", "parallel"),
        ),
    )(emb_rows, emb_cols, cx2, cy2)

    if (n_rows, n_cols) != (n, n):
        probs = probs[:n, :n]
        dists = dists[:n, :n]
    return probs, dists


def _reference(embeddings, c=1.0):
    """Pure-JAX reference of geoopt PoincareBall.dist + sigmoid + diag mask."""
    x = embeddings[:, None, :]
    y = embeddings[None, :, :]
    x2 = jnp.sum(x * x, -1)
    y2 = jnp.sum(y * y, -1)
    xy = jnp.sum(x * y, -1)
    A = 1.0 - 2.0 * c * xy + c * y2
    B = 1.0 - c * x2
    denom = jnp.maximum(1.0 - 2.0 * c * xy + c * c * x2 * y2, 1e-15)
    num_sq = A * A * x2 - 2.0 * A * B * xy + B * B * y2
    mob_norm = jnp.sqrt(jnp.maximum(num_sq, 0.0)) / denom
    sc = jnp.sqrt(c)
    dists = (2.0 / sc) * jnp.arctanh(jnp.clip(sc * mob_norm, 0.0, 1.0 - 1e-7))
    probs = jax.nn.sigmoid(-dists) * (1.0 - jnp.eye(embeddings.shape[0]))
    return probs, dists


if __name__ == "__main__":
    # Deterministic parameter init mirroring: torch.randn(n, d) * 0.01
    n, d, c = 256, 32, 1.0
    key = jax.random.PRNGKey(0)
    embeddings = (0.01 * jax.random.normal(key, (n, d))).astype(jnp.float32)

    probs, dists = poincare_edge_generator(embeddings, c=c)
    jax.block_until_ready((probs, dists))

    probs_ref, dists_ref = _reference(embeddings, c=c)
    assert probs.shape == (n, n) and dists.shape == (n, n)

    offdiag = 1.0 - jnp.eye(n, dtype=jnp.float32)
    # Off-diagonal distances must match closely; the diagonal is exactly 0 in
    # the reference but only ~0 (cancellation residual) in any tiled matmul
    # formulation, so check it with a looser absolute bound.
    assert jnp.max(jnp.abs((dists - dists_ref) * offdiag)) < 1e-4
    assert jnp.max(jnp.abs(jnp.diagonal(dists))) < 1e-3
    assert jnp.max(jnp.abs(probs - probs_ref)) < 1e-4
    assert jnp.max(jnp.abs(jnp.diagonal(probs))) == 0.0

    # Exercise the padded / non-divisible path too (n not a multiple of 128).
    n2 = 200
    emb2 = (0.01 * jax.random.normal(jax.random.PRNGKey(1), (n2, d))).astype(jnp.float32)
    probs2, dists2 = poincare_edge_generator(emb2, c=c)
    jax.block_until_ready((probs2, dists2))
    probs2_ref, dists2_ref = _reference(emb2, c=c)
    assert probs2.shape == (n2, n2) and dists2.shape == (n2, n2)
    offdiag2 = 1.0 - jnp.eye(n2, dtype=jnp.float32)
    assert jnp.max(jnp.abs((dists2 - dists2_ref) * offdiag2)) < 1e-4
    assert jnp.max(jnp.abs(probs2 - probs2_ref)) < 1e-4
    assert jnp.max(jnp.abs(jnp.diagonal(probs2))) == 0.0

    print("KERNEL_OK")
</pallas_src>

<mosaic_0001>
module attributes {stable_mosaic.version = 11 : i64} {
  func.func @_poincare_edge_kernel(%arg0: i32, %arg1: i32, %arg2: memref<128x32xf32, #tpu.memory_space<vmem>>, %arg3: memref<256x32xf32, #tpu.memory_space<vmem>>, %arg4: memref<128x1xf32, #tpu.memory_space<vmem>>, %arg5: memref<1x256xf32, #tpu.memory_space<vmem>>, %arg6: memref<128x256xf32, #tpu.memory_space<vmem>>, %arg7: memref<128x256xf32, #tpu.memory_space<vmem>>) attributes {dimension_semantics = [#tpu.dimension_semantics<parallel>, #tpu.dimension_semantics<parallel>], iteration_bounds = array<i64: 2, 1>, scalar_prefetch = 0 : i64, scratch_operands = 0 : i64, tpu.core_type = #tpu.core_type<tc>, window_params = [{transform_indices = @transform_0, window_bounds = array<i64: 128, 32>}, {transform_indices = @transform_1, window_bounds = array<i64: 256, 32>}, {transform_indices = @transform_2, window_bounds = array<i64: 128, 1>}, {transform_indices = @transform_3, window_bounds = array<i64: 1, 256>}, {transform_indices = @transform_4, window_bounds = array<i64: 128, 256>}, {transform_indices = @transform_5, window_bounds = array<i64: 128, 256>}]} {
    %c0 = arith.constant 0 : index
    %c0_0 = arith.constant 0 : index
    %0 = vector.load %arg2[%c0, %c0_0] : memref<128x32xf32, #tpu.memory_space<vmem>>, vector<128x32xf32>
    %c0_1 = arith.constant 0 : index
    %c0_2 = arith.constant 0 : index
    %1 = vector.load %arg3[%c0_1, %c0_2] : memref<256x32xf32, #tpu.memory_space<vmem>>, vector<256x32xf32>
    %c0_3 = arith.constant 0 : index
    %c0_4 = arith.constant 0 : index
    %2 = vector.load %arg4[%c0_3, %c0_4] : memref<128x1xf32, #tpu.memory_space<vmem>>, vector<128x1xf32>
    %c0_5 = arith.constant 0 : index
    %c0_6 = arith.constant 0 : index
    %3 = vector.load %arg5[%c0_5, %c0_6] : memref<1x256xf32, #tpu.memory_space<vmem>>, vector<1x256xf32>
    %cst = arith.constant dense<0.000000e+00> : vector<128x256xf32>
    %4 = tpu.matmul %0, %1, %cst {dimension_numbers = #tpu.dot_dimension_numbers<[1], [1], [0], [0], [0, 0, 1, 0], [], []>, precision = #tpu.contract_precision<fp32>} : vector<128x32xf32>, vector<256x32xf32>, vector<128x256xf32> -> vector<128x256xf32>
    %cst_7 = arith.constant 2.000000e+00 : f32
    %5 = vector.broadcast %cst_7 : f32 to vector<128x256xf32>
    %6 = arith.mulf %5, %4 : vector<128x256xf32>
    %cst_8 = arith.constant 1.000000e+00 : f32
    %7 = vector.broadcast %cst_8 : f32 to vector<128x256xf32>
    %8 = arith.subf %7, %6 : vector<128x256xf32>
    %cst_9 = arith.constant 1.000000e+00 : f32
    %9 = vector.broadcast %cst_9 : f32 to vector<128x1xf32>
    %10 = arith.subf %9, %2 : vector<128x1xf32>
    %11 = vector.broadcast %3 : vector<1x256xf32> to vector<128x256xf32>
    %12 = arith.addf %8, %11 : vector<128x256xf32>
    %13 = vector.broadcast %2 : vector<128x1xf32> to vector<128x256xf32>
    %14 = vector.broadcast %3 : vector<1x256xf32> to vector<128x256xf32>
    %15 = arith.mulf %13, %14 : vector<128x256xf32>
    %16 = arith.addf %8, %15 : vector<128x256xf32>
    %cst_10 = arith.constant 1.000000e-15 : f32
    %17 = vector.broadcast %cst_10 : f32 to vector<128x256xf32>
    %18 = arith.maximumf %16, %17 : vector<128x256xf32>
    %19 = arith.mulf %12, %12 : vector<128x256xf32>
    %20 = vector.broadcast %2 : vector<128x1xf32> to vector<128x256xf32>
    %21 = arith.mulf %19, %20 : vector<128x256xf32>
    %22 = vector.broadcast %10 : vector<128x1xf32> to vector<128x256xf32>
    %23 = arith.mulf %12, %22 : vector<128x256xf32>
    %24 = arith.mulf %23, %6 : vector<128x256xf32>
    %25 = arith.subf %21, %24 : vector<128x256xf32>
    %26 = arith.mulf %10, %10 : vector<128x1xf32>
    %27 = vector.broadcast %26 : vector<128x1xf32> to vector<128x256xf32>
    %28 = vector.broadcast %3 : vector<1x256xf32> to vector<128x256xf32>
    %29 = arith.mulf %27, %28 : vector<128x256xf32>
    %30 = arith.addf %25, %29 : vector<128x256xf32>
    %cst_11 = arith.constant 0.000000e+00 : f32
    %31 = vector.broadcast %cst_11 : f32 to vector<128x256xf32>
    %32 = arith.maximumf %30, %31 : vector<128x256xf32>
    %33 = math.sqrt %32 : vector<128x256xf32>
    %cst_12 = arith.constant 0.99999988 : f32
    %34 = vector.broadcast %cst_12 : f32 to vector<128x256xf32>
    %35 = arith.mulf %18, %34 : vector<128x256xf32>
    %36 = arith.minimumf %33, %35 : vector<128x256xf32>
    %37 = arith.subf %18, %36 : vector<128x256xf32>
    %38 = arith.addf %18, %36 : vector<128x256xf32>
    %39 = math.log %38 : vector<128x256xf32>
    %40 = math.log %37 : vector<128x256xf32>
    %41 = arith.subf %39, %40 : vector<128x256xf32>
    %cst_13 = arith.constant 5.000000e-01 : f32
    %42 = vector.broadcast %cst_13 : f32 to vector<128x256xf32>
    %43 = arith.mulf %42, %37 : vector<128x256xf32>
    %44 = tpu.reciprocal %18 {approx = true} : vector<128x256xf32> -> vector<128x256xf32>
    %45 = arith.mulf %18, %44 : vector<128x256xf32>
    %cst_14 = arith.constant 2.000000e+00 : f32
    %46 = vector.broadcast %cst_14 : f32 to vector<128x256xf32>
    %47 = arith.subf %46, %45 : vector<128x256xf32>
    %48 = arith.mulf %44, %47 : vector<128x256xf32>
    %49 = arith.mulf %43, %48 : vector<128x256xf32>
    %c0_15 = arith.constant 0 : index
    %c0_16 = arith.constant 0 : index
    %50 = vector.load %arg7[%c0_15, %c0_16] : memref<128x256xf32, #tpu.memory_space<vmem>>, vector<128x256xf32>
    tpu.vector_store %arg7[%c0_15, %c0_16], %41 {strides = array<i32>} : memref<128x256xf32, #tpu.memory_space<vmem>>, vector<128x256xf32>,
    %c128_i32 = arith.constant 128 : i32
    %51 = arith.muli %arg0, %c128_i32 : i32
    %c1_i32 = arith.constant 1 : i32
    %52 = arith.addi %arg1, %c1_i32 : i32
    %c256_i32 = arith.constant 256 : i32
    %53 = arith.muli %52, %c256_i32 : i32
    %54 = arith.cmpi slt, %51, %53 : i32
    %c256_i32_17 = arith.constant 256 : i32
    %55 = arith.muli %arg1, %c256_i32_17 : i32
    %c1_i32_18 = arith.constant 1 : i32
    %56 = arith.addi %arg0, %c1_i32_18 : i32
    %c128_i32_19 = arith.constant 128 : i32
    %57 = arith.muli %56, %c128_i32_19 : i32
    %58 = arith.cmpi slt, %55, %57 : i32
    %59 = arith.andi %54, %58 : i1
    %60 = arith.extui %59 : i1 to i32
    %c0_i32 = arith.constant 0 : i32
    %61 = arith.cmpi ne, %60, %c0_i32 : i32
    scf.if %61 {
      %c128_i32_21 = arith.constant 128 : i32
      %65 = arith.muli %arg0, %c128_i32_21 : i32
      %66 = tpu.iota {dimensions = array<i32: 0>} : vector<128x256xi32>
      %67 = vector.broadcast %65 : i32 to vector<128x256xi32>
      %68 = arith.addi %67, %66 : vector<128x256xi32>
      %c256_i32_22 = arith.constant 256 : i32
      %69 = arith.muli %arg1, %c256_i32_22 : i32
      %70 = tpu.iota {dimensions = array<i32: 1>} : vector<128x256xi32>
      %71 = vector.broadcast %69 : i32 to vector<128x256xi32>
      %72 = arith.addi %71, %70 : vector<128x256xi32>
      %73 = arith.cmpi eq, %68, %72 : vector<128x256xi32>
      %cst_23 = arith.constant 0.000000e+00 : f32
      %74 = vector.broadcast %cst_23 : f32 to vector<128x256xf32>
      %75 = arith.select %73, %74, %49 : vector<128x256xi1>, vector<128x256xf32>
      %c0_24 = arith.constant 0 : index
      %c0_25 = arith.constant 0 : index
      %76 = vector.load %arg6[%c0_24, %c0_25] : memref<128x256xf32, #tpu.memory_space<vmem>>, vector<128x256xf32>
      tpu.vector_store %arg6[%c0_24, %c0_25], %75 {strides = array<i32>} : memref<128x256xf32, #tpu.memory_space<vmem>>, vector<128x256xf32>,
    } else {
    }
    %true = arith.constant true
    %62 = arith.xori %59, %true : i1
    %63 = arith.extui %62 : i1 to i32
    %c0_i32_20 = arith.constant 0 : i32
    %64 = arith.cmpi ne, %63, %c0_i32_20 : i32
    scf.if %64 {
      %c0_21 = arith.constant 0 : index
      %c0_22 = arith.constant 0 : index
      %65 = vector.load %arg6[%c0_21, %c0_22] : memref<128x256xf32, #tpu.memory_space<vmem>>, vector<128x256xf32>
      tpu.vector_store %arg6[%c0_21, %c0_22], %49 {strides = array<i32>} : memref<128x256xf32, #tpu.memory_space<vmem>>, vector<128x256xf32>,
    } else {
    }
    return
  }
  func.func @transform_0(%arg0: i32, %arg1: i32) -> (i32, i32) {
    %c0_i32 = arith.constant 0 : i32
    %c0_i32_0 = arith.constant 0 : i32
    return %arg0, %c0_i32 : i32, i32
  }
  func.func @transform_1(%arg0: i32, %arg1: i32) -> (i32, i32) {
    %c0_i32 = arith.constant 0 : i32
    %c0_i32_0 = arith.constant 0 : i32
    return %arg1, %c0_i32 : i32, i32
  }
  func.func @transform_2(%arg0: i32, %arg1: i32) -> (i32, i32) {
    %c0_i32 = arith.constant 0 : i32
    %c0_i32_0 = arith.constant 0 : i32
    return %arg0, %c0_i32 : i32, i32
  }
  func.func @transform_3(%arg0: i32, %arg1: i32) -> (i32, i32) {
    %c0_i32 = arith.constant 0 : i32
    %c0_i32_0 = arith.constant 0 : i32
    return %c0_i32, %arg1 : i32, i32
  }
  func.func @transform_4(%arg0: i32, %arg1: i32) -> (i32, i32) {
    %c0_i32 = arith.constant 0 : i32
    return %arg0, %arg1 : i32, i32
  }
  func.func @transform_5(%arg0: i32, %arg1: i32) -> (i32, i32) {
    %c0_i32 = arith.constant 0 : i32
    return %arg0, %arg1 : i32, i32
  }
}

</mosaic_0001>

<bundles_post_ra>
// kernel: tpu_custom_call.1
= control target key start
LH: loop header
LB: loop body
LE: loop exit
PB: predicated region body
PF: predicated region fallthrough
CT: control target
= control target key end

     0   :  { %s7641_s0 = inlined_call_operand.vmem [shape: f32[256,32], index: 0, kind: input, shape index: {}]   ;;  %s7642_s1 = inlined_call_operand.vmem [shape: f32[256,32], index: 1, kind: input, shape index: {}]   ;;  %s7643_s2 = inlined_call_operand.vmem [shape: f32[256,1], index: 2, kind: input, shape index: {}]   ;;  %s7644_s3 = inlined_call_operand.vmem [shape: f32[1,256], index: 3, kind: input, shape index: {}]   ;;  %s7645_s4 = inlined_call_operand.hbm [shape: f32[256,256], index: 4, kind: output, shape index: {0}]   ;;  %s7646_s5 = inlined_call_operand.hbm [shape: f32[256,256], index: 5, kind: output, shape index: {1}]  }
   0x1   :  { %7788 = sst [smem:[#allocation91_spill]] %s7641_s0 }
   0x2   :  { %7789 = sst [smem:[#allocation92_spill]] %s7642_s1 }
   0x3   :  { %11 = vsyncpa [#allocation3], 0 }
   0x4   :  { %13 = vsyncpa [#allocation3 + $0x1], 0 }
   0x5   :  { %14 = vsyncpa [#allocation5], 0 }
   0x6   :  { %16 = vsyncpa [#allocation5 + $0x1], 0  ;;  %s4636_s18 = smov 0   ;;  %s4638_s19 = smov 0  }
   0x7   :  { %s4640_s20 = smov 0   ;;  %s4642_s21 = smov 0  }
   0x8   :  { %s4644_s22 = smov 0   ;;  %s4646_s23 = smov 0  }
   0x9 LB: > { %s4137_s24 = sadd.s32 4294967295, %s4601_s23   ;;  %s4138_s25 = sadd.s32 4294967294, %s4601_s23   ;;  %s4601_s23 = sphi %s4646_s23, %s22_s23   ;;  %s4597_s22 = sphi %s4644_s22, %s8133_s22   ;;  %s4593_s21 = sphi %s4642_s21, %s8132_s21   ;;  %s4589_s20 = sphi %s4640_s20, %s8131_s20   ;;  %s4585_s19 = sphi %s4638_s19, %s8130_s19   ;;  %s4581_s18 = sphi %s4636_s18, %s8129_s18  }
   0xa   : > { %s34_s26 = sadd.s32 1, %s4597_s22  ;;  %s147_s27 = sadd.s32 1, %s4589_s20 }
   0xb   : > { %p36_p0 = scmp.ge.s32.totalorder %s34_s26, 2  ;;  %p157_p1 = scmp.ne.s32.totalorder %s4589_s20, %s4585_s19 }
   0xc   : > { %p158_p2 = scmp.eq.s32.totalorder %s4137_s24, 1  ;;  %p163_p3 = scmp.ne.s32.totalorder %s4585_s19, %s4581_s18 }
   0xd   : > { %s8135_s26 = smov (%p36_p0, %s34_s26), 0  ;;  %p164_p5 = scmp.eq.s32.totalorder %s4138_s25, 1 }
   0xe   : > { %p4676_p4 = por %p158_p2, %p157_p1  ;;  %s142_s29 = ssub.s32 %s4597_s22, %s8135_s26 }
   0xf   : > { %p4143_p6 = scmp.ge.s32.totalorder %s4601_s23, 1  ;;  %p145_p7 = scmp.eq.s32.totalorder %s142_s29, 0 }
  0x10   : > { %p4683_p8 = por %p164_p5, %p163_p3  ;;  %p245_p9 = scmp.lt.s32.totalorder %s4601_s23, 3 }
  0x11   : > { %s4689_s6 = scalar_select %p145_p7, %s4589_s20, %s147_s27  }
  0x12   : > { %p246_p10 = pnand %p4143_p6, %p245_p9 }
  0x14   : > { %249 = sbr.rel (%p246_p10) target bundleno = 854 (0x356), region = 36 }
  0x19   : > { %s7792_s1 = sld [smem:[#allocation92_spill]]  ;;  %vm384_vm0 = vcmask 261120   ;;  %s4146_s14 = sshll.u32 %s4593_s21, 4 }
  0x1a   : > { %p293_p11 = scmp.lt.s32.totalorder %s4146_s14, 31  ;;  %s7793_s0 = sld [smem:[#allocation91_spill]] }
  0x1b   : > { %s7046_s13 = sshll.u32 %s4593_s21, 7 }
  0x1c   : > { %s8137_s14 = smov (!%p293_p11, %s4146_s14), 31  ;;  %s4164_s15 = sadd.s32 128, %s7046_s13 }
  0x1d   : > { %s4147_s25 = sshll.u32 %s8137_s14, 3  ;;  %p3765_p12 = scmp.lt.s32.totalorder %s7046_s13, 256 }
  0x1e   : > { %s5235_s10 = scalar_lea.vmem %s7643_s2, %s4147_s25  ;;  %p4152_p13 = scmp.gt.s32.totalorder %s4164_s15, 0 }
  0x1f   : > { %v350_v0 = vld [vmem:[%s7792_s1 + $0x78] sm:$0xff]  ;;  %v349_v1 = vld [vmem:[%s7792_s1 + $0x70] sm:$0xff]  ;;  %v348_v2 = vld [vmem:[%s7792_s1 + $0x68] sm:$0xff] }
  0x20   : > { %v479_v3 = vsel %vm384_vm0, %v350_v0, 0  ;;  %v476_v4 = vsel %vm384_vm0, %v349_v1, 0  ;;  %v473_v5 = vsel %vm384_vm0, %v348_v2, 0  ;;  %v347_v6 = vld [vmem:[%s7792_s1 + $0x60] sm:$0xff]  ;;  %v346_v7 = vld [vmem:[%s7792_s1 + $0x58] sm:$0xff]  ;;  %v345_v17 = vld [vmem:[%s7792_s1 + $0x50] sm:$0xff]  ;;  %s4876_s9 = scalar_lea.vmem %s7793_s0, %s4147_s25  ;;  %p7067_p0 = pnand %p4152_p13, %p3765_p12 }
  0x21   : > { %v4709_v8 = vand.u32 4294901760, %v479_v3  ;;  %v4711_v9 = vand.u32 4294901760, %v476_v4  ;;  %v4713_v10 = vand.u32 4294901760, %v473_v5  ;;  %v470_v11 = vsel %vm384_vm0, %v347_v6, 0  ;;  %v344_v26 = vld [vmem:[%s7792_s1 + $0x48] sm:$0xff]  ;;  %v343_v34 = vld [vmem:[%s7792_s1 + $0x40] sm:$0xff] }
  0x22   : > { %v4716_v12 = vand.u32 4294901760, %v470_v11  ;;  %v467_v16 = vsel %vm384_vm0, %v346_v7, 0  ;;  %v464_v21 = vsel %vm384_vm0, %v345_v17, 0  ;;  %v461_v29 = vsel %vm384_vm0, %v344_v26, 0  ;;  %v342_v41 = vld [vmem:[%s7792_s1 + $0x38] sm:$0xff]  ;;  %v341_v48 = vld [vmem:[%s7792_s1 + $0x30] sm:$0xff] }
  0x23   : > { %530 = vmatpush.xpose.msra.mxu0 %v4709_v8  ;;  %v4720_v13 = vsub.f32 %v479_v3, %v4709_v8  ;;  %981 = vmatpush.xpose.msra.mxu3 %v4709_v8  ;;  %v4724_v14 = vsub.f32 %v476_v4, %v4711_v9  ;;  %v4727_v15 = vsub.f32 %v473_v5, %v4713_v10  ;;  %v4736_v20 = vand.u32 4294901760, %v467_v16  ;;  %v340_v54 = vld [vmem:[%s7792_s1 + $0x28] sm:$0xff]  ;;  %v339_v62 = vld [vmem:[%s7792_s1 + $0x20] sm:$0xff]  ;;  %v338_v5 = vld [vmem:[%s7792_s1 + $0x18] sm:$0xff] }
  0x24   : > { %v4749_v25 = vsub.f32 %v470_v11, %v4716_v12  ;;  %v4755_v28 = vand.u32 4294901760, %v464_v21  ;;  %v4771_v35 = vand.u32 4294901760, %v461_v29  ;;  %v458_v40 = vsel %vm384_vm0, %v343_v34, 0 }
  0x25   : > { %853 = vmatpush.xpose.msra.mxu2 %v4720_v13  ;;  %v692_v18 = vand.u32 4294901760, %v4720_v13  ;;  %v698_v19 = vand.u32 4294901760, %v4724_v14  ;;  %v704_v24 = vand.u32 4294901760, %v4727_v15  ;;  %v4764_v33 = vsub.f32 %v467_v16, %v4736_v20 }
  0x26   : > { %v710_v32 = vand.u32 4294901760, %v4749_v25  ;;  %v4779_v39 = vsub.f32 %v464_v21, %v4755_v28  ;;  %v4788_v42 = vsub.f32 %v461_v29, %v4771_v35  ;;  %v4794_v45 = vand.u32 4294901760, %v458_v40 }
  0x27   : > { %532 = vmatpush.xpose.msra.mxu0 %v4711_v9  ;;  %v693_v22 = vsub.f32 %v4720_v13, %v692_v18  ;;  %983 = vmatpush.xpose.msra.mxu3 %v4711_v9  ;;  %v699_v23 = vsub.f32 %v4724_v14, %v698_v19  ;;  %v705_v31 = vsub.f32 %v4727_v15, %v704_v24  ;;  %v7659_v38 = vand.u32 4294901760, %v4764_v33 }
  0x28   : > { %v711_v37 = vsub.f32 %v4749_v25, %v710_v32  ;;  %v7657_v46 = vand.u32 4294901760, %v4779_v39  ;;  %v455_v47 = vsel %vm384_vm0, %v342_v41, 0  ;;  %v7656_v49 = vand.u32 4294901760, %v4788_v42 }
  0x29   : > { %v694_v27 = vand.u32 4294901760, %v693_v22  ;;  %856 = vmatpush.xpose.msra.mxu2 %v4724_v14  ;;  %v700_v30 = vand.u32 4294901760, %v699_v23  ;;  %v706_v36 = vand.u32 4294901760, %v705_v31  ;;  %v717_v44 = vsub.f32 %v4764_v33, %v7659_v38  ;;  %v337_v22 = vld [vmem:[%s7792_s1 + $0x10] sm:$0xff]  ;;  %v366_v31 = vld [vmem:[%s7792_s1 + $0xf8] sm:$0xff] }
  0x2a   : > { %v712_v43 = vand.u32 4294901760, %v711_v37  ;;  %v723_v51 = vsub.f32 %v4779_v39, %v7657_v46  ;;  %v4808_v52 = vand.u32 4294901760, %v455_v47  ;;  %v4811_v53 = vsub.f32 %v458_v40, %v4794_v45  ;;  %v336_v37 = vld [vmem:[%s7792_s1 + $0x8] sm:$0xff] }
  0x2b   : > { %534 = vmatpush.xpose.msra.mxu0 %v4713_v10  ;;  %695 = vmatpush.xpose.msra.mxu1 %v694_v27  ;;  %v718_v50 = vand.u32 4294901760, %v717_v44  ;;  %v452_v55 = vsel %vm384_vm0, %v341_v48, 0  ;;  %v729_v56 = vsub.f32 %v4788_v42, %v7656_v49  ;;  %v449_v57 = vsel %vm384_vm0, %v340_v54, 0  ;;  %v365_v54 = vld [vmem:[%s7792_s1 + $0xf0] sm:$0xff] }
  0x2c   : > { %985 = vmatpush.xpose.msra.mxu3 %v4713_v10  ;;  %v724_v58 = vand.u32 4294901760, %v723_v51  ;;  %v4825_v59 = vand.u32 4294901760, %v452_v55  ;;  %v7655_v60 = vand.u32 4294901760, %v4811_v53  ;;  %v4829_v61 = vsub.f32 %v455_v47, %v4808_v52 }
  0x2d   : > { %859 = vmatpush.xpose.msra.mxu2 %v4727_v15  ;;  %v730_v63 = vand.u32 4294901760, %v729_v56  ;;  %v4836_v0 = vand.u32 4294901760, %v449_v57  ;;  %v446_v4 = vsel %vm384_vm0, %v339_v62, 0  ;;  %v443_v21 = vsel %vm384_vm0, %v338_v5, 0 }
  0x2e   : > { %v735_v1 = vsub.f32 %v4811_v53, %v7655_v60  ;;  %v7653_v2 = vand.u32 4294901760, %v4829_v61  ;;  %v4846_v3 = vsub.f32 %v452_v55, %v4825_v59  ;;  %v4854_v6 = vand.u32 4294901760, %v446_v4  ;;  %v335_v55 = vld [vmem:[%s7792_s1] sm:$0xff] }
  0x2f   : > { %536 = vmatpush.xpose.msra.mxu0 %v4716_v12  ;;  %701 = vmatpush.xpose.msra.mxu1 %v700_v30  ;;  %v4857_v7 = vsub.f32 %v449_v57, %v4836_v0  ;;  %v4878_v23 = vand.u32 4294901760, %v443_v21  ;;  %v440_v34 = vsel %vm384_vm0, %v337_v22, 0  ;;  %v437_v51 = vsel %vm384_vm0, %v336_v37, 0 }
  0x30   : > { %987 = vmatpush.xpose.msra.mxu3 %v4716_v12  ;;  %v736_v11 = vand.u32 4294901760, %v735_v1  ;;  %v741_v16 = vsub.f32 %v4829_v61, %v7653_v2  ;;  %v7651_v17 = vand.u32 4294901760, %v4846_v3  ;;  %v4881_v26 = vsub.f32 %v446_v4, %v4854_v6 }
  0x31   : > { %862 = vmatpush.xpose.msra.mxu2 %v4749_v25  ;;  %v7650_v30 = vand.u32 4294901760, %v4857_v7  ;;  %v4900_v41 = vsub.f32 %v443_v21, %v4878_v23  ;;  %v4907_v48 = vand.u32 4294901760, %v440_v34  ;;  %v4929_v4 = vand.u32 4294901760, %v437_v51 }
  0x32   : > { %v742_v27 = vand.u32 4294901760, %v741_v16  ;;  %v747_v29 = vsub.f32 %v4846_v3, %v7651_v17  ;;  %v7648_v40 = vand.u32 4294901760, %v4881_v26  ;;  %v320_v16 = vld [vmem:[%s4876_s9 + $0x8] sm:$0xff] }
  0x33   : > { %538 = vmatpush.xpose.msra.mxu0 %v4736_v20  ;;  %707 = vmatpush.xpose.msra.mxu1 %v706_v36  ;;  %v319_v36 = vld [vmem:[%s4876_s9] sm:$0xff]  ;;  %v753_v47 = vsub.f32 %v4857_v7, %v7650_v30  ;;  %v4932_v5 = vsub.f32 %v440_v34, %v4907_v48  ;;  %v4954_v37 = vsub.f32 %v437_v51, %v4929_v4 }
  0x34   : > { %989 = vmatpush.xpose.msra.mxu3 %v4736_v20  ;;  %v748_v44 = vand.u32 4294901760, %v747_v29  ;;  %v759_v57 = vsub.f32 %v4881_v26, %v7648_v40 }
  0x35   : > { %865 = vmatpush.xpose.msra.mxu2 %v4764_v33  ;;  %v754_v1 = vand.u32 4294901760, %v753_v47 }
  0x37   : > { %540 = vmatpush.xpose.msra.mxu0 %v4755_v28  ;;  %713 = vmatpush.xpose.msra.mxu1 %v712_v43  ;;  %v527_v43 = vsel %vm384_vm0, %v366_v31, 0 }
  0x38   : > { %991 = vmatpush.xpose.msra.mxu3 %v4755_v28  ;;  %v4919_v56 = vand.u32 4294901760, %v527_v43 }
  0x39   : > { %868 = vmatpush.xpose.msra.mxu2 %v4779_v39 }
  0x3a   : > { %v4939_v21 = vsub.f32 %v527_v43, %v4919_v56  ;;  %v389_v43 = vsel %vm384_vm0, %v320_v16, 0 }
  0x3b   : > { %542 = vmatpush.xpose.msra.mxu0 %v4771_v35  ;;  %719 = vmatpush.xpose.msra.mxu1 %v718_v50  ;;  %v386_v50 = vsel %vm384_vm0, %v319_v36, 0  ;;  %v7649_v36 = vand.u32 4294901760, %v4932_v5 }
  0x3c   : > { %993 = vmatpush.xpose.msra.mxu3 %v4771_v35  ;;  %v4925_v62 = vand.u32 4294901760, %v386_v50  ;;  %v7652_v47 = vand.u32 4294901760, %v4939_v21 }
  0x3d   : > { %871 = vmatpush.xpose.msra.mxu2 %v4788_v42  ;;  %v771_v16 = vsub.f32 %v4932_v5, %v7649_v36 }
  0x3e   : > { %v4947_v31 = vsub.f32 %v386_v50, %v4925_v62  ;;  %v1499_v40 = vsub.f32 %v4939_v21, %v7652_v47 }
  0x3f   : > { %544 = vmatpush.xpose.msra.mxu0 %v4794_v45  ;;  %725 = vmatpush.xpose.msra.mxu1 %v724_v58  ;;  %v7647_v58 = vand.u32 4294901760, %v4900_v41  ;;  %v772_v30 = vand.u32 4294901760, %v771_v16 }
  0x40   : > { %995 = vmatpush.xpose.msra.mxu3 %v4794_v45  ;;  %7794 = vst [vmem:[#allocation8_spill] sm:$0xff] %v4947_v31  ;;  %v4968_v51 = vand.u32 4294901760, %v4947_v31 }
  0x41   : > { %874 = vmatpush.xpose.msra.mxu2 %v4811_v53  ;;  %v765_v29 = vsub.f32 %v4900_v41, %v7647_v58 }
  0x42   : > { %7795 = vst [vmem:[#allocation9_spill] sm:$0xff] %v4968_v51  ;;  %v564_v36 = vsub.f32 %v4947_v31, %v4968_v51 }
  0x43   : > { %546 = vmatpush.xpose.msra.mxu0 %v4808_v52  ;;  %731 = vmatpush.xpose.msra.mxu1 %v730_v63  ;;  %v524_v63 = vsel %vm384_vm0, %v365_v54, 0 }
  0x44   : > { %997 = vmatpush.xpose.msra.mxu3 %v4808_v52  ;;  %v4941_v22 = vand.u32 4294901760, %v524_v63  ;;  %v5013_v60 = vand.u32 4294901760, %v564_v36  ;;  %v322_v36 = vld [vmem:[%s4876_s9 + $0x18] sm:$0xff] }
  0x45   : > { %877 = vmatpush.xpose.msra.mxu2 %v4829_v61 }
  0x46   : > { %v4964_v50 = vsub.f32 %v524_v63, %v4941_v22  ;;  %v7654_v63 = vand.u32 4294901760, %v4954_v37 }
  0x47   : > { %548 = vmatpush.xpose.msra.mxu0 %v4825_v59  ;;  %737 = vmatpush.xpose.msra.mxu1 %v736_v11  ;;  %v434_v11 = vsel %vm384_vm0, %v335_v55, 0  ;;  %v4970_v55 = vand.u32 4294901760, %v389_v43 }
  0x48   : > { %999 = vmatpush.xpose.msra.mxu3 %v4825_v59  ;;  %v4950_v34 = vand.u32 4294901760, %v434_v11  ;;  %v777_v17 = vsub.f32 %v4954_v37, %v7654_v63 }
  0x49   : > { %880 = vmatpush.xpose.msra.mxu2 %v4846_v3 }
  0x4a   : > { %v4980_v58 = vsub.f32 %v434_v11, %v4950_v34  ;;  %v4995_v11 = vsub.f32 %v389_v43, %v4970_v55  ;;  %v1500_v43 = vand.u32 4294901760, %v1499_v40  ;;  %v778_v40 = vand.u32 4294901760, %v777_v17 }
  0x4b   : > { %550 = vmatpush.xpose.msra.mxu0 %v4836_v0  ;;  %743 = vmatpush.xpose.msra.mxu1 %v742_v27  ;;  %v760_v27 = vand.u32 4294901760, %v759_v57 }
  0x4c   : > { %1001 = vmatpush.xpose.msra.mxu3 %v4836_v0  ;;  %7796 = vst [vmem:[#allocation10_spill] sm:$0xff] %v4995_v11  ;;  %v7663_v47 = vand.u32 4294901760, %v4980_v58 }
  0x4d   : > { %883 = vmatpush.xpose.msra.mxu2 %v4857_v7 }
  0x4f   : > { %552 = vmatpush.xpose.msra.mxu0 %v4854_v6  ;;  %749 = vmatpush.xpose.msra.mxu1 %v748_v44  ;;  %v364_v44 = vld [vmem:[%s7792_s1 + $0xe8] sm:$0xff] }
  0x50   : > { %1003 = vmatpush.xpose.msra.mxu3 %v4854_v6  ;;  %v521_v54 = vsel %vm384_vm0, %v364_v44, 0  ;;  %v321_v44 = vld [vmem:[%s4876_s9 + $0x10] sm:$0xff] }
  0x51   : > { %886 = vmatpush.xpose.msra.mxu2 %v4881_v26  ;;  %v4972_v57 = vand.u32 4294901760, %v521_v54  ;;  %v392_v2 = vsel %vm384_vm0, %v321_v44, 0  ;;  %v5016_v44 = vand.u32 4294901760, %v4995_v11 }
  0x52   : > { %v5018_v49 = vand.u32 4294901760, %v392_v2 }
  0x53   : > { %554 = vmatpush.xpose.msra.mxu0 %v4878_v23  ;;  %755 = vmatpush.xpose.msra.mxu1 %v754_v1  ;;  %v766_v1 = vand.u32 4294901760, %v765_v29  ;;  %v4990_v29 = vsub.f32 %v521_v54, %v4972_v57  ;;  %v363_v54 = vld [vmem:[%s7792_s1 + $0xe0] sm:$0xff]  ;;  %7797 = vst [vmem:[#allocation11_spill] sm:$0xff] %v5016_v44  ;;  %v572_v13 = vsub.f32 %v4995_v11, %v5016_v44 }
  0x54   : > { %1005 = vmatpush.xpose.msra.mxu3 %v4878_v23  ;;  %v518_v63 = vsel %vm384_vm0, %v363_v54, 0  ;;  %7798 = vst [vmem:[#allocation12_spill] sm:$0xff] %v5018_v49 }
  0x55   : > { %889 = vmatpush.xpose.msra.mxu2 %v4900_v41  ;;  %v7660_v16 = vand.u32 4294901760, %v4990_v29  ;;  %v5020_v46 = vand.u32 4294901760, %v518_v63 }
  0x57   : > { %556 = vmatpush.xpose.msra.mxu0 %v4907_v48  ;;  %761 = vmatpush.xpose.msra.mxu1 %v760_v27  ;;  %v7658_v27 = vand.u32 4294901760, %v4964_v50  ;;  %v5031_v54 = vsub.f32 %v518_v63, %v5020_v46  ;;  %v1511_v17 = vsub.f32 %v4990_v29, %v7660_v16 }
  0x58   : > { %1007 = vmatpush.xpose.msra.mxu3 %v4907_v48 }
  0x59   : > { %892 = vmatpush.xpose.msra.mxu2 %v4932_v5 }
  0x5b   : > { %558 = vmatpush.xpose.msra.mxu0 %v4929_v4  ;;  %767 = vmatpush.xpose.msra.mxu1 %v766_v1  ;;  %v1505_v1 = vsub.f32 %v4964_v50, %v7658_v27  ;;  %v783_v27 = vsub.f32 %v4980_v58, %v7663_v47 }
  0x5c   : > { %1009 = vmatpush.xpose.msra.mxu3 %v4929_v4 }
  0x5d   : > { %895 = vmatpush.xpose.msra.mxu2 %v4954_v37  ;;  %v1506_v38 = vand.u32 4294901760, %v1505_v1  ;;  %v784_v63 = vand.u32 4294901760, %v783_v27  ;;  %v362_v1 = vld [vmem:[%s7792_s1 + $0xd8] sm:$0xff]  ;;  %v5057_v27 = vand.u32 4294901760, %v572_v13 }
  0x5e   : > { %v515_v16 = vsel %vm384_vm0, %v362_v1, 0 }
  0x5f   : > { %560 = vmatpush.xpose.msra.mxu0 %v4950_v34  ;;  %773 = vmatpush.xpose.msra.mxu1 %v772_v30  ;;  %v7661_v30 = vand.u32 4294901760, %v5031_v54  ;;  %7800 = vst [vmem:[#allocation14_spill] sm:$0xff] %v5057_v27 }
  0x60   : > { %1011 = vmatpush.xpose.msra.mxu3 %v4950_v34 }
  0x61   : > { %898 = vmatpush.xpose.msra.mxu2 %v4980_v58 }
  0x62   : > { %566 = vmatmul.f32.vlgmr.msra.gmra.mxu0 %v5013_v60 }
  0x63   : > { %1112 = vmatpush.xpose.msrb.mxu0 %v692_v18  ;;  %v5042_v18 = vsub.f32 %v392_v2, %v5018_v49  ;;  %779 = vmatpush.xpose.msra.mxu1 %v778_v40  ;;  %v1512_v2 = vand.u32 4294901760, %v1511_v17  ;;  %v1517_v40 = vsub.f32 %v5031_v54, %v7661_v30 }
  0x64   : > { %1501 = vmatpush.xpose.msrb.mxu3 %v1500_v43  ;;  %v395_v43 = vsel %vm384_vm0, %v322_v36, 0  ;;  %901 = vmatmul.f32.vlgmr.msra.gmra.mxu2 %v4947_v31 }
  0x65   : > { %1336 = vmatpush.xpose.msrb.mxu2 %v4919_v56  ;;  %7799 = vst [vmem:[#allocation13_spill] sm:$0xff] %v5042_v18  ;;  %1015 = vmatmul.f32.vlgmr.msra.gmra.mxu3 %v4968_v51  ;;  %v5061_v36 = vand.u32 4294901760, %v5042_v18  ;;  %v5063_v14 = vand.u32 4294901760, %v395_v43  ;;  %v1518_v13 = vand.u32 4294901760, %v1517_v40 }
  0x67   : > { %1116 = vmatpush.xpose.msrb.mxu0 %v698_v19  ;;  %7801 = vst [vmem:[#allocation15_spill] sm:$0xff] %v5061_v36  ;;  %v5065_v19 = vand.u32 4294901760, %v515_v16  ;;  %785 = vmatpush.xpose.msra.mxu1 %v784_v63  ;;  %v580_v1 = vsub.f32 %v5042_v18, %v5061_v36  ;;  %v5079_v63 = vsub.f32 %v395_v43, %v5063_v14 }
  0x68   : > { %1507 = vmatpush.xpose.msrb.mxu3 %v1506_v38  ;;  %7802 = vst [vmem:[#allocation16_spill] sm:$0xff] %v5063_v14  ;;  %v323_v38 = vld [vmem:[%s4876_s9 + $0x20] sm:$0xff] }
  0x69   : > { %1338 = vmatpush.xpose.msrb.mxu2 %v4941_v22  ;;  %v5072_v17 = vsub.f32 %v515_v16, %v5065_v19  ;;  %7803 = vst [vmem:[#allocation17_spill] sm:$0xff] %v5079_v63  ;;  %v361_v16 = vld [vmem:[%s7792_s1 + $0xd0] sm:$0xff]  ;;  %v5098_v40 = vand.u32 4294901760, %v580_v1 }
  0x6a   : > { %574 = vmatmul.f32.gmra.mxu0 %v5057_v27  ;;  %787 = vmatmul.f32.vlgmr.msra.gmra.mxu1 %v4925_v62 }
  0x6b   : > { %1239 = vmatpush.xpose.msrb.mxu1 %v4709_v8  ;;  %1120 = vmatpush.xpose.msrb.mxu0 %v704_v24  ;;  %v398_v8 = vsel %vm384_vm0, %v323_v38, 0  ;;  %v7662_v15 = vand.u32 4294901760, %v5072_v17  ;;  %7805 = vst [vmem:[#allocation19_spill] sm:$0xff] %v5098_v40 }
  0x6c   : > { %1513 = vmatpush.xpose.msrb.mxu3 %v1512_v2  ;;  %906 = vmatmul.f32.gmra.mxu2 %v4995_v11  ;;  %v5095_v43 = vand.u32 4294901760, %v398_v8  ;;  %v512_v2 = vsel %vm384_vm0, %v361_v16, 0  ;;  %v7842_v11 = vand.u32 4294901760, %v4980_v58 }
  0x6d   : > { %1021 = vmatmul.f32.gmra.mxu3 %v5016_v44  ;;  %1340 = vmatpush.xpose.msrb.mxu2 %v4972_v57  ;;  %v1523_v24 = vsub.f32 %v5072_v17, %v7662_v15  ;;  %v5103_v30 = vand.u32 4294901760, %v512_v2  ;;  %v324_v15 = vld [vmem:[%s4876_s9 + $0x28] sm:$0xff]  ;;  %v7830_v44 = vand.u32 4294901760, %v4881_v26 }
  0x6e   : > { %7804 = vst [vmem:[#allocation18_spill] sm:$0xff] %v5095_v43 }
  0x6f   : > { %1241 = vmatpush.xpose.msrb.mxu1 %v4711_v9  ;;  %1124 = vmatpush.xpose.msrb.mxu0 %v710_v32  ;;  %v5101_v9 = vand.u32 4294901760, %v5079_v63  ;;  %v1524_v38 = vand.u32 4294901760, %v1523_v24  ;;  %v5109_v25 = vsub.f32 %v512_v2, %v5103_v30  ;;  %v5112_v32 = vsub.f32 %v398_v8, %v5095_v43  ;;  %v360_v24 = vld [vmem:[%s7792_s1 + $0xc8] sm:$0xff] }
  0x70   : > { %1519 = vmatpush.xpose.msrb.mxu3 %v1518_v13  ;;  %v7808_v13 = vand.u32 4294901760, %v4764_v33  ;;  %v401_v8 = vsel %vm384_vm0, %v324_v15, 0  ;;  %v7810_v2 = vand.u32 4294901760, %v4779_v39  ;;  %v509_v15 = vsel %vm384_vm0, %v360_v24, 0 }
  0x71   : > { %7806 = vst [vmem:[#allocation20_spill] sm:$0xff] %v5101_v9  ;;  %1342 = vmatpush.xpose.msrb.mxu2 %v5020_v46  ;;  %v588_v1 = vsub.f32 %v5079_v63, %v5101_v9  ;;  %v5133_v16 = vand.u32 4294901760, %v5112_v32  ;;  %v5142_v47 = vand.u32 4294901760, %v509_v15 }
  0x72   : > { %7807 = vst [vmem:[#allocation21_spill] sm:$0xff] %v5112_v32  ;;  %582 = vmatmul.f32.gmra.mxu0 %v5098_v40  ;;  %791 = vmatmul.f32.gmra.mxu1 %v4970_v55  ;;  %v333_v40 = vld [vmem:[%s4876_s9 + $0x70] sm:$0xff] }
  0x73   : > { %1243 = vmatpush.xpose.msrb.mxu1 %v4713_v10  ;;  %1128 = vmatpush.xpose.msrb.mxu0 %v7808_v13  ;;  %v7664_v10 = vand.u32 4294901760, %v5109_v25  ;;  %7809 = vst [vmem:[#allocation22_spill] sm:$0xff] %v5133_v16  ;;  %v5140_v13 = vand.u32 4294901760, %v401_v8  ;;  %v596_v39 = vsub.f32 %v5112_v32, %v5133_v16 }
  0x74   : > { %1525 = vmatpush.xpose.msrb.mxu3 %v1524_v38  ;;  %911 = vmatmul.f32.gmra.mxu2 %v5042_v18  ;;  %v5138_v38 = vand.u32 4294901760, %v588_v1  ;;  %v7813_v1 = vand.u32 4294901760, %v4788_v42  ;;  %v329_v18 = vld [vmem:[%s4876_s9 + $0x50] sm:$0xff] }
  0x75   : > { %1027 = vmatmul.f32.gmra.mxu3 %v5061_v36  ;;  %1344 = vmatpush.xpose.msrb.mxu2 %v5065_v19  ;;  %v1529_v33 = vsub.f32 %v5109_v25, %v7664_v10  ;;  %7812 = vst [vmem:[#allocation24_spill] sm:$0xff] %v5140_v13  ;;  %v325_v10 = vld [vmem:[%s4876_s9 + $0x30] sm:$0xff]  ;;  %v5148_v36 = vsub.f32 %v509_v15, %v5142_v47 }
  0x76   : > { %7811 = vst [vmem:[#allocation23_spill] sm:$0xff] %v5138_v38  ;;  %v404_v24 = vsel %vm384_vm0, %v325_v10, 0  ;;  %v7816_v10 = vand.u32 4294901760, %v4811_v53  ;;  %v7819_v53 = vand.u32 4294901760, %v4829_v61 }
  0x77   : > { %1245 = vmatpush.xpose.msrb.mxu1 %v4716_v12  ;;  %1132 = vmatpush.xpose.msrb.mxu0 %v7810_v2  ;;  %v1530_v12 = vand.u32 4294901760, %v1529_v33  ;;  %v5157_v33 = vsub.f32 %v401_v8, %v5140_v13  ;;  %v359_v8 = vld [vmem:[%s7792_s1 + $0xc0] sm:$0xff]  ;;  %v5171_v2 = vand.u32 4294901760, %v596_v39 }
  0x78   : > { %v506_v15 = vsel %vm384_vm0, %v359_v8, 0 }
  0x79   : > { %1346 = vmatpush.xpose.msrb.mxu2 %v5103_v30  ;;  %1531 = vmatpush.xpose.msrb.mxu3 %v1530_v12  ;;  %7814 = vst [vmem:[#allocation25_spill] sm:$0xff] %v5157_v33  ;;  %v5177_v12 = vand.u32 4294901760, %v5157_v33 }
  0x7a   : > { %590 = vmatmul.f32.gmra.mxu0 %v5138_v38  ;;  %795 = vmatmul.f32.gmra.mxu1 %v5018_v49  ;;  %7815 = vst [vmem:[#allocation26_spill] sm:$0xff] %v5171_v2 }
  0x7b   : > { %1247 = vmatpush.xpose.msrb.mxu1 %v4736_v20  ;;  %1136 = vmatpush.xpose.msrb.mxu0 %v7813_v1  ;;  %v7667_v20 = vand.u32 4294901760, %v5148_v36  ;;  %7817 = vst [vmem:[#allocation27_spill] sm:$0xff] %v5177_v12  ;;  %v5179_v1 = vand.u32 4294901760, %v404_v24 }
  0x7c   : > { %916 = vmatmul.f32.gmra.mxu2 %v5079_v63 }
  0x7d   : > { %1033 = vmatmul.f32.gmra.mxu3 %v5101_v9  ;;  %1348 = vmatpush.xpose.msrb.mxu2 %v5142_v47  ;;  %v1535_v42 = vsub.f32 %v5148_v36, %v7667_v20  ;;  %7818 = vst [vmem:[#allocation28_spill] sm:$0xff] %v5179_v1  ;;  %v5181_v9 = vand.u32 4294901760, %v506_v15  ;;  %v326_v20 = vld [vmem:[%s4876_s9 + $0x38] sm:$0xff]  ;;  %v5196_v8 = vsub.f32 %v404_v24, %v5179_v1 }
  0x7e   : > { %v358_v24 = vld [vmem:[%s7792_s1 + $0xb8] sm:$0xff] }
  0x7f   : > { %1249 = vmatpush.xpose.msrb.mxu1 %v4755_v28  ;;  %1140 = vmatpush.xpose.msrb.mxu0 %v7816_v10  ;;  %v1536_v28 = vand.u32 4294901760, %v1535_v42  ;;  %v5186_v39 = vsub.f32 %v506_v15, %v5181_v9  ;;  %v604_v42 = vsub.f32 %v5157_v33, %v5177_v12  ;;  %7820 = vst [vmem:[#allocation29_spill] sm:$0xff] %v5196_v8 }
  0x81   : > { %1537 = vmatpush.xpose.msrb.mxu3 %v1536_v28  ;;  %1350 = vmatpush.xpose.msrb.mxu2 %v5181_v9  ;;  %v7669_v15 = vand.u32 4294901760, %v5186_v39  ;;  %v7822_v28 = vand.u32 4294901760, %v4846_v3  ;;  %v7826_v3 = vand.u32 4294901760, %v4857_v7 }
  0x82   : > { %598 = vmatmul.f32.gmra.mxu0 %v5171_v2  ;;  %799 = vmatmul.f32.gmra.mxu1 %v5063_v14  ;;  %v352_v2 = vld [vmem:[%s7792_s1 + $0x88] sm:$0xff] }
  0x83   : > { %1251 = vmatpush.xpose.msrb.mxu1 %v4771_v35  ;;  %1144 = vmatpush.xpose.msrb.mxu0 %v7819_v53  ;;  %v407_v35 = vsel %vm384_vm0, %v326_v20, 0  ;;  %v1541_v61 = vsub.f32 %v5186_v39, %v7669_v15  ;;  %v503_v20 = vsel %vm384_vm0, %v358_v24, 0  ;;  %v5214_v53 = vand.u32 4294901760, %v604_v42 }
  0x84   : > { %921 = vmatmul.f32.gmra.mxu2 %v5112_v32  ;;  %v5209_v10 = vand.u32 4294901760, %v407_v35  ;;  %v5219_v32 = vand.u32 4294901760, %v503_v20 }
  0x85   : > { %1039 = vmatmul.f32.gmra.mxu3 %v5133_v16  ;;  %7823 = vst [vmem:[#allocation31_spill] sm:$0xff] %v5214_v53  ;;  %v5217_v16 = vand.u32 4294901760, %v5196_v8  ;;  %v1542_v15 = vand.u32 4294901760, %v1541_v61  ;;  %v5254_v61 = vld [vmem:[%s5235_s10] sm:$0xff] }
  0x86   : > { %7821 = vst [vmem:[#allocation30_spill] sm:$0xff] %v5209_v10  ;;  %1352 = vmatpush.xpose.msrb.mxu2 %v5219_v32  ;;  %v5224_v63 = vsub.f32 %v503_v20, %v5219_v32  ;;  %v5227_v24 = vsub.f32 %v407_v35, %v5209_v10 }
  0x87   : > { %1253 = vmatpush.xpose.msrb.mxu1 %v4794_v45  ;;  %1148 = vmatpush.xpose.msrb.mxu0 %v7822_v28  ;;  %7824 = vst [vmem:[#allocation32_spill] sm:$0xff] %v5217_v16  ;;  %v327_v45 = vld [vmem:[%s4876_s9 + $0x40] sm:$0xff]  ;;  %v612_v42 = vsub.f32 %v5196_v8, %v5217_v16 }
  0x88   : > { %1543 = vmatpush.xpose.msrb.mxu3 %v1542_v15  ;;  %7825 = vst [vmem:[#allocation33_spill] sm:$0xff] %v5227_v24  ;;  %v7673_v35 = vand.u32 4294901760, %v5224_v63  ;;  %v357_v15 = vld [vmem:[%s7792_s1 + $0xb0] sm:$0xff]  ;;  %v5257_v20 = vand.u32 4294901760, %v5227_v24 }
  0x89   : > { %v500_v28 = vsel %vm384_vm0, %v357_v15, 0  ;;  %v328_v15 = vld [vmem:[%s4876_s9 + $0x48] sm:$0xff] }
  0x8a   : > { %606 = vmatmul.f32.gmra.mxu0 %v5214_v53  ;;  %803 = vmatmul.f32.gmra.mxu1 %v5095_v43  ;;  %v1547_v7 = vsub.f32 %v5224_v63, %v7673_v35  ;;  %7827 = vst [vmem:[#allocation34_spill] sm:$0xff] %v5257_v20  ;;  %v5487_v43 = vld [vmem:[%s5235_s10 + $0x68] sm:$0xff] }
  0x8b   : > { %1255 = vmatpush.xpose.msrb.mxu1 %v4808_v52  ;;  %1152 = vmatpush.xpose.msrb.mxu0 %v7826_v3  ;;  %v410_v52 = vsel %vm384_vm0, %v327_v45, 0  ;;  %v4603_v3 = vmov 0   ;;  %v5261_v45 = vand.u32 4294901760, %v612_v42  ;;  %v620_v42 = vsub.f32 %v5227_v24, %v5257_v20  ;;  %7851 = vst [vmem:[#allocation53_spill] sm:$0xff] %v5487_v43 }
  0x8c   : > { %926 = vmatmul.f32.gmra.mxu2 %v5157_v33  ;;  %4232 = vset.pattern.permute.xlu0 %v4603_v3  ;;  %v1548_v35 = vand.u32 4294901760, %v1547_v7  ;;  %v5265_v33 = vand.u32 4294901760, %v500_v28  ;;  %v7832_v7 = vand.u32 4294901760, %v4900_v41 }
  0x8d   : > { %1045 = vmatmul.f32.gmra.mxu3 %v5177_v12  ;;  %7828 = vst [vmem:[#allocation35_spill] sm:$0xff] %v5261_v45  ;;  %v5263_v12 = vand.u32 4294901760, %v410_v52  ;;  %2260 = vperm.xlu0 %4232, %v5254_v61  }
  0x8e   : > { %4233 = vset.pattern.permute.xlu1 %v4603_v3  ;;  %4234 = vset.pattern.permute.xlu2 %v4603_v3  ;;  %v5299_v3 = vld [vmem:[%s5235_s10 + $0x8] sm:$0xff] }
  0x8f   : > { %1257 = vmatpush.xpose.msrb.mxu1 %v4825_v59  ;;  %7829 = vst [vmem:[#allocation36_spill] sm:$0xff] %v5263_v12  ;;  %1156 = vmatpush.xpose.msrb.mxu0 %v7830_v44  ;;  %v5273_v59 = vsub.f32 %v500_v28, %v5265_v33  ;;  %v5281_v26 = vsub.f32 %v410_v52, %v5263_v12  ;;  %v356_v52 = vld [vmem:[%s7792_s1 + $0xa8] sm:$0xff]  ;;  %v5296_v28 = vld [vmem:[%s5235_s10 + $0x10] sm:$0xff] }
  0x90   : > { %1549 = vmatpush.xpose.msrb.mxu3 %v1548_v35  ;;  %1354 = vmatpush.xpose.msrb.mxu2 %v5265_v33  ;;  %v413_v35 = vsel %vm384_vm0, %v328_v15, 0  ;;  %v497_v41 = vsel %vm384_vm0, %v356_v52, 0 }
  0x91   : > { %7831 = vst [vmem:[#allocation37_spill] sm:$0xff] %v5281_v26  ;;  %v7677_v44 = vand.u32 4294901760, %v5273_v59  ;;  %2270 = vperm.xlu1 %4233, %v5296_v28   ;;  %v5307_v15 = vand.u32 4294901760, %v5281_v26 }
  0x92   : > { %614 = vmatmul.f32.gmra.mxu0 %v5261_v45  ;;  %807 = vmatmul.f32.gmra.mxu1 %v5140_v13 }
  0x93   : > { %1259 = vmatpush.xpose.msrb.mxu1 %v4836_v0  ;;  %1160 = vmatpush.xpose.msrb.mxu0 %v7832_v7  ;;  %v1553_v0 = vsub.f32 %v5273_v59, %v7677_v44  ;;  %7834 = vst [vmem:[#allocation39_spill] sm:$0xff] %v5307_v15  ;;  %v5309_v7 = vand.u32 4294901760, %v413_v35 }
  0x94   : > { %931 = vmatmul.f32.gmra.mxu2 %v5196_v8  ;;  %v5311_v8 = vand.u32 4294901760, %v497_v41 }
  0x95   : > { %1051 = vmatmul.f32.gmra.mxu3 %v5217_v16  ;;  %v5301_v16 = vand.u32 4294901760, %v620_v42  ;;  %7835 = vst [vmem:[#allocation40_spill] sm:$0xff] %v5309_v7  ;;  %v1554_v44 = vand.u32 4294901760, %v1553_v0  ;;  %2265 = vperm.xlu0 %4232, %v5299_v3   ;;  %v7836_v42 = vand.u32 4294901760, %v4932_v5  ;;  %v628_v0 = vsub.f32 %v5281_v26, %v5307_v15 }
  0x96   : > { %1356 = vmatpush.xpose.msrb.mxu2 %v5311_v8  ;;  %v5327_v5 = vsub.f32 %v413_v35, %v5309_v7  ;;  %v355_v35 = vld [vmem:[%s7792_s1 + $0xa0] sm:$0xff] }
  0x97   : > { %7833 = vst [vmem:[#allocation38_spill] sm:$0xff] %v5301_v16  ;;  %1261 = vmatpush.xpose.msrb.mxu1 %v4854_v6  ;;  %1164 = vmatpush.xpose.msrb.mxu0 %v7836_v42  ;;  %v5319_v6 = vsub.f32 %v497_v41, %v5311_v8  ;;  %v7838_v41 = vand.u32 4294901760, %v4954_v37  ;;  %v5342_v42 = vld [vmem:[%s5235_s10 + $0x18] sm:$0xff]  ;;  %v494_v37 = vsel %vm384_vm0, %v355_v35, 0 }
  0x98   : > { %1555 = vmatpush.xpose.msrb.mxu3 %v1554_v44  ;;  %7837 = vst [vmem:[#allocation41_spill] sm:$0xff] %v5327_v5  ;;  %v416_v44 = vsel %vm384_vm0, %v329_v18, 0  ;;  %v5345_v18 = vld [vmem:[%s5235_s10 + $0x30] sm:$0xff]  ;;  %v330_v35 = vld [vmem:[%s4876_s9 + $0x58] sm:$0xff] }
  0x99   : > { %v7681_v52 = vand.u32 4294901760, %v5319_v6  ;;  %v5347_v51 = vand.u32 4294901760, %v416_v44  ;;  %2275 = vperm.xlu1 %4233, %v5342_v42  }
  0x9a   : > { %622 = vmatmul.f32.gmra.mxu0 %v5301_v16  ;;  %811 = vmatmul.f32.gmra.mxu1 %v5179_v1 }
  0x9b   : > { %1263 = vmatpush.xpose.msrb.mxu1 %v4878_v23  ;;  %1168 = vmatpush.xpose.msrb.mxu0 %v7838_v41  ;;  %v1559_v23 = vsub.f32 %v5319_v6, %v7681_v52  ;;  %7839 = vst [vmem:[#allocation42_spill] sm:$0xff] %v5347_v51  ;;  %v5352_v41 = vand.u32 4294901760, %v628_v0  ;;  %v5355_v52 = vand.u32 4294901760, %v5327_v5  ;;  %v5368_v0 = vsub.f32 %v416_v44, %v5347_v51  ;;  %v354_v44 = vld [vmem:[%s7792_s1 + $0x98] sm:$0xff] }
  0x9c   : > { %936 = vmatmul.f32.gmra.mxu2 %v5227_v24  ;;  %v5357_v24 = vand.u32 4294901760, %v494_v37 }
  0x9d   : > { %1057 = vmatmul.f32.gmra.mxu3 %v5257_v20  ;;  %7840 = vst [vmem:[#allocation43_spill] sm:$0xff] %v5352_v41  ;;  %v1560_v20 = vand.u32 4294901760, %v1559_v23  ;;  %2290 = vperm.xlu0 %4232, %v5345_v18   ;;  %v636_v58 = vsub.f32 %v5327_v5, %v5355_v52  ;;  %v5387_v23 = vld [vmem:[%s5235_s10 + $0x20] sm:$0xff]  ;;  %v5393_v31 = vand.u32 4294901760, %v5368_v0 }
  0x9e   : > { %7841 = vst [vmem:[#allocation44_spill] sm:$0xff] %v5355_v52  ;;  %1358 = vmatpush.xpose.msrb.mxu2 %v5357_v24  ;;  %2280 = vperm.xlu2 %4234, %v5387_v23  }
  0x9f   : > { %1265 = vmatpush.xpose.msrb.mxu1 %v4907_v48  ;;  %1172 = vmatpush.xpose.msrb.mxu0 %v7842_v11  ;;  %v5365_v48 = vsub.f32 %v494_v37, %v5357_v24  ;;  %7843 = vst [vmem:[#allocation45_spill] sm:$0xff] %v5368_v0  ;;  %v5390_v37 = vld [vmem:[%s5235_s10 + $0x38] sm:$0xff] }
  0xa0   : > { %1561 = vmatpush.xpose.msrb.mxu3 %v1560_v20  ;;  %v419_v20 = vsel %vm384_vm0, %v330_v35, 0  ;;  %7844 = vst [vmem:[#allocation46_spill] sm:$0xff] %v5393_v31  ;;  %v491_v35 = vsel %vm384_vm0, %v354_v44, 0  ;;  %v331_v44 = vld [vmem:[%s4876_s9 + $0x60] sm:$0xff] }
  0xa1   : > { %v7687_v11 = vand.u32 4294901760, %v5365_v48  ;;  %2295 = vperm.xlu1 %4233, %v5390_v37   ;;  %v5405_v16 = vand.u32 4294901760, %v491_v35 }
  0xa2   : > { %630 = vmatmul.f32.gmra.mxu0 %v5352_v41  ;;  %815 = vmatmul.f32.gmra.mxu1 %v5209_v10  ;;  %v422_v10 = vsel %vm384_vm0, %v331_v44, 0 }
  0xa3   : > { %1267 = vmatpush.xpose.msrb.mxu1 %v4929_v4  ;;  %1659 = vmatpush.xpose.msra.mxu0 %v4939_v21  ;;  %v1565_v4 = vsub.f32 %v5365_v48, %v7687_v11  ;;  %v5401_v11 = vand.u32 4294901760, %v636_v58  ;;  %v5414_v58 = vsub.f32 %v491_v35, %v5405_v16  ;;  %v5452_v45 = vand.u32 4294901760, %v422_v10 }
  0xa4   : > { %941 = vmatmul.f32.gmra.mxu2 %v5281_v26  ;;  %v5403_v26 = vand.u32 4294901760, %v419_v20 }
  0xa5   : > { %1063 = vmatmul.f32.gmra.mxu3 %v5307_v15  ;;  %v5399_v15 = vld [vmem:[%s5235_s10 + $0x48] sm:$0xff]  ;;  %7845 = vst [vmem:[#allocation47_spill] sm:$0xff] %v5401_v11  ;;  %v1566_v41 = vand.u32 4294901760, %v1565_v4  ;;  %1360 = vmatpush.xpose.msrb.mxu2 %v5405_v16  ;;  %v644_v4 = vsub.f32 %v5368_v0, %v5393_v31 }
  0xa6   : > { %2305 = vperm.xlu0 %4232, %v5399_v15   ;;  %7849 = vst [vmem:[#allocation51_spill] sm:$0xff] %v5452_v45 }
  0xa7   : > { %1269 = vmatpush.xpose.msrb.mxu1 %v4950_v34  ;;  %1662 = vmatpush.xpose.msra.mxu0 %v4964_v50  ;;  %v5421_v34 = vsub.f32 %v419_v20, %v5403_v26  ;;  %v5435_v20 = vld [vmem:[%s5235_s10 + $0x28] sm:$0xff]  ;;  %v5441_v44 = vand.u32 4294901760, %v644_v4 }
  0xa8   : > { %1567 = vmatpush.xpose.msrb.mxu3 %v1566_v41  ;;  %v7697_v41 = vand.u32 4294901760, %v5414_v58  ;;  %2285 = vperm.xlu2 %4234, %v5435_v20  }
  0xa9   : > { %7846 = vst [vmem:[#allocation48_spill] sm:$0xff] %v5421_v34 }
  0xaa   : > { %638 = vmatmul.f32.gmra.mxu0 %v5401_v11  ;;  %819 = vmatmul.f32.gmra.mxu1 %v5263_v12  ;;  %v1571_v35 = vsub.f32 %v5414_v58, %v7697_v41  ;;  %v353_v11 = vld [vmem:[%s7792_s1 + $0x90] sm:$0xff]  ;;  %7847 = vst [vmem:[#allocation49_spill] sm:$0xff] %v5441_v44  ;;  %v5447_v41 = vld [vmem:[%s5235_s10 + $0x60] sm:$0xff] }
  0xab   : > { %1787 = vmatpush.xpose.msra.mxu1 %v4919_v56  ;;  %v5438_v12 = vld [vmem:[%s5235_s10 + $0x50] sm:$0xff]  ;;  %1665 = vmatpush.xpose.msra.mxu0 %v4990_v29 }
  0xac   : > { %946 = vmatmul.f32.gmra.mxu2 %v5327_v5  ;;  %2310 = vperm.xlu1 %4233, %v5438_v12   ;;  %v5450_v5 = vand.u32 4294901760, %v5421_v34  ;;  %v1572_v1 = vand.u32 4294901760, %v1571_v35 }
  0xad   : > { %1069 = vmatmul.f32.gmra.mxu3 %v5355_v52  ;;  %v488_v52 = vsel %vm384_vm0, %v353_v11, 0  ;;  %v332_v11 = vld [vmem:[%s4876_s9 + $0x68] sm:$0xff] }
  0xae   : > { %7848 = vst [vmem:[#allocation50_spill] sm:$0xff] %v5450_v5  ;;  %v5454_v53 = vand.u32 4294901760, %v488_v52  ;;  %2320 = vperm.xlu0 %4232, %v5447_v41   ;;  %1573 = vmatpush.xpose.msrb.mxu3 %v1572_v1  ;;  %v652_v35 = vsub.f32 %v5421_v34, %v5450_v5  ;;  %v5469_v1 = vsub.f32 %v422_v10, %v5452_v45  ;;  %v485_v10 = vsel %vm384_vm0, %v352_v2, 0 }
  0xaf   : > { %1789 = vmatpush.xpose.msra.mxu1 %v4941_v22  ;;  %1668 = vmatpush.xpose.msra.mxu0 %v5031_v54 }
  0xb0   : > { %1362 = vmatpush.xpose.msrb.mxu2 %v5454_v53  ;;  %v5461_v4 = vsub.f32 %v488_v52, %v5454_v53  ;;  %7850 = vst [vmem:[#allocation52_spill] sm:$0xff] %v5469_v1  ;;  %v425_v52 = vsel %vm384_vm0, %v332_v11, 0  ;;  %v5490_v11 = vld [vmem:[%s5235_s10 + $0x78] sm:$0xff]  ;;  %v5499_v38 = vand.u32 4294901760, %v5469_v1 }
  0xb2   : > { %646 = vmatmul.f32.gmra.mxu0 %v5441_v44  ;;  %823 = vmatmul.f32.gmra.mxu1 %v5309_v7  ;;  %v7714_v13 = vand.u32 4294901760, %v5461_v4  ;;  %v5484_v7 = vld [vmem:[%s5235_s10 + $0x40] sm:$0xff]  ;;  %7854 = vst [vmem:[#allocation56_spill] sm:$0xff] %v5499_v38 }
  0xb3   : > { %1791 = vmatpush.xpose.msra.mxu1 %v4972_v57  ;;  %2300 = vperm.xlu2 %4234, %v5484_v7  }
  0xb4   : > { %951 = vmatmul.f32.gmra.mxu2 %v5368_v0  ;;  %v1577_v44 = vsub.f32 %v5461_v4, %v7714_v13  ;;  %2325 = vperm.xlu1 %4233, %v5487_v43   ;;  %v5496_v0 = vand.u32 4294901760, %v652_v35  ;;  %v5501_v13 = vand.u32 4294901760, %v425_v52  ;;  %v351_v35 = vld [vmem:[%s7792_s1 + $0x80] sm:$0xff] }
  0xb5   : > { %1075 = vmatmul.f32.gmra.mxu3 %v5393_v31  ;;  %v5492_v31 = vand.u32 4294901760, %v485_v10  ;;  %1671 = vmatpush.xpose.msra.mxu0 %v5072_v17  ;;  %v482_v49 = vsel %vm384_vm0, %v351_v35, 0 }
  0xb6   : > { %7853 = vst [vmem:[#allocation55_spill] sm:$0xff] %v5496_v0  ;;  %v1578_v2 = vand.u32 4294901760, %v1577_v44  ;;  %2335 = vperm.xlu0 %4232, %v5490_v11   ;;  %v5516_v44 = vsub.f32 1.0, %v5254_v61  ;;  %v5519_v27 = vand.u32 4294901760, %v482_v49  ;;  %v428_v61 = vsel %vm384_vm0, %v333_v40, 0 }
  0xb7   : > { %1793 = vmatpush.xpose.msra.mxu1 %v5020_v46  ;;  %7852 = vst [vmem:[#allocation54_spill] sm:$0xff] %v5492_v31  ;;  %1364 = vmatpush.xpose.msrb.mxu2 %v5492_v31  ;;  %v5507_v14 = vsub.f32 %v485_v10, %v5492_v31  ;;  %v5522_v10 = vsub.f32 1.0, %v5296_v28  ;;  %v5529_v31 = vsub.f32 %v425_v52, %v5501_v13  ;;  %v7858_v40 = vand.u32 4294901760, %v4939_v21 }
  0xb8   : > { %7855 = vst [vmem:[#allocation57_spill] sm:$0xff] %v5501_v13  ;;  %1579 = vmatpush.xpose.msrb.mxu3 %v1578_v2  ;;  %v660_v2 = vsub.f32 %v5469_v1, %v5499_v38  ;;  %v5538_v28 = vsub.f32 %v482_v49, %v5519_v27  ;;  %v5562_v21 = vsub.f32 1.0, %v5342_v42 }
  0xb9   : > { %v7725_v43 = vand.u32 4294901760, %v5507_v14  ;;  %7856 = vst [vmem:[#allocation58_spill] sm:$0xff] %v5519_v27  ;;  %1674 = vmatpush.xpose.msra.mxu0 %v5109_v25 }
  0xba   : > { %654 = vmatmul.f32.gmra.mxu0 %v5496_v0  ;;  %827 = vmatmul.f32.gmra.mxu1 %v5347_v51  ;;  %7857 = vst [vmem:[#allocation59_spill] sm:$0xff] %v5529_v31  ;;  %v5549_v0 = vand.u32 4294901760, %v5529_v31  ;;  %v5551_v51 = vand.u32 4294901760, %v428_v61 }
  0xbb   : > { %1795 = vmatpush.xpose.msra.mxu1 %v5065_v19  ;;  %v1583_v35 = vsub.f32 %v5507_v14, %v7725_v43  ;;  %1366 = vmatpush.xpose.msrb.mxu2 %v5519_v27  ;;  %v5546_v43 = vand.u32 4294901760, %v660_v2 }
  0xbc   : > { %956 = vmatmul.f32.gmra.mxu2 %v5421_v34  ;;  %2500 = vperm.xlu1 %4233, %v5516_v44   ;;  %7859 = vst [vmem:[#allocation60_spill] sm:$0xff] %v5549_v0  ;;  %v334_v34 = vld [vmem:[%s4876_s9 + $0x78] sm:$0xff]  ;;  %v5574_v27 = vsub.f32 %v428_v61, %v5551_v51  ;;  %s5782_s9 = sand.u32 1, %s4585_s19  }
  0xbd   : > { %1081 = vmatmul.f32.gmra.mxu3 %v5450_v5  ;;  %v1584_v52 = vand.u32 4294901760, %v1583_v35  ;;  %v7730_v5 = vand.u32 4294901760, %v5538_v28  ;;  %7860 = vst [vmem:[#allocation61_spill] sm:$0xff] %v5551_v51  ;;  %v378_v35 = vld [vmem:[%s5235_s10 + $0x58] sm:$0xff]  ;;  %1677 = vmatpush.xpose.msra.mxu0 %v5148_v36  ;;  %v431_v42 = vsel %vm384_vm0, %v334_v34, 0  ;;  %v7865_v34 = vand.u32 4294901760, %v4990_v29 }
  0xbe   : > { %2510 = vperm.xlu0 %4232, %v5522_v10   ;;  %2315 = vperm.xlu2 %4234, %v378_v35   ;;  %7862 = vst [vmem:[#allocation62_spill] sm:$0xff] %v5574_v27  ;;  %v5587_v61 = vand.u32 4294901760, %v431_v42  ;;  %v5604_v29 = vsub.f32 1.0, %v5484_v7 }
  0xbf   : > { %1918 = vmatpush.xpose.msra.mxu2 %v7858_v40  ;;  %1797 = vmatpush.xpose.msra.mxu1 %v5103_v30  ;;  %v1589_v49 = vsub.f32 %v5538_v28, %v7730_v5  ;;  %v7861_v40 = vand.u32 4294901760, %v4964_v50  ;;  %v5571_v5 = vsub.f32 1.0, %v5435_v20  ;;  %v5585_v20 = vand.u32 4294901760, %v5574_v27 }
  0xc0   : > { %1585 = vmatpush.xpose.msrb.mxu3 %v1584_v52  ;;  %v668_v52 = vsub.f32 %v5529_v31, %v5549_v0  ;;  %7864 = vst [vmem:[#allocation64_spill] sm:$0xff] %v5587_v61 }
  0xc1   : > { %v1590_v2 = vand.u32 4294901760, %v1589_v49  ;;  %7863 = vst [vmem:[#allocation63_spill] sm:$0xff] %v5585_v20  ;;  %1680 = vmatpush.xpose.msra.mxu0 %v5186_v39  ;;  %v381_v49 = vld [vmem:[%s5235_s10 + $0x70] sm:$0xff]  ;;  %s4144_s10 = sshll.u32 %s5782_s9, 8 }
  0xc2   : > { %662 = vmatmul.f32.gmra.mxu0 %v5546_v43  ;;  %831 = vmatmul.f32.gmra.mxu1 %v5403_v26  ;;  %v5582_v50 = vand.u32 4294901760, %v668_v52  ;;  %s6185_s12 = scalar_lea.vmem [#allocation4], %s4144_s10  ;;  %s7380_s17 = scalar_lea.vmem [#allocation2], %s4144_s10 }
  0xc3   : > { %1922 = vmatpush.xpose.msra.mxu2 %v7861_v40  ;;  %1799 = vmatpush.xpose.msra.mxu1 %v5142_v47  ;;  %v5607_v40 = vsub.f32 %v431_v42, %v5587_v61  ;;  %v5635_v42 = vsub.f32 1.0, %v378_v35  ;;  %v7871_v35 = vand.u32 4294901760, %v5148_v36  ;;  %v5666_v36 = vsub.f32 1.0, %v5390_v37 }
  0xc4   : > { %961 = vmatmul.f32.gmra.mxu2 %v5469_v1  ;;  %1591 = vmatpush.xpose.msrb.mxu3 %v1590_v2  ;;  %v676_v2 = vsub.f32 %v5574_v27, %v5585_v20 }
  0xc5   : > { %1087 = vmatmul.f32.gmra.mxu3 %v5499_v38  ;;  %2515 = vperm.xlu1 %4233, %v5562_v21   ;;  %7866 = vst [vmem:[#allocation65_spill] sm:$0xff] %v5607_v40  ;;  %v5620_v52 = vand.u32 4294901760, %v5607_v40 }
  0xc6   : > { %2525 = vperm.xlu0 %4232, %v5571_v5   ;;  %2330 = vperm.xlu2 %4234, %v381_v49   ;;  %v5617_v7 = vand.u32 4294901760, %v676_v2 }
  0xc7   : > { %1926 = vmatpush.xpose.msra.mxu2 %v7865_v34  ;;  %1801 = vmatpush.xpose.msra.mxu1 %v5181_v9  ;;  %7868 = vst [vmem:[#allocation66_spill] sm:$0xff] %v5620_v52 }
  0xc8   : > { %2045 = vmatpush.xpose.msra.mxu3 %v4919_v56  ;;  %v5596_v56 = vsub.f32 1.0, %v5345_v18  ;;  %v7867_v18 = vand.u32 4294901760, %v5031_v54  ;;  %1683 = vmatpush.xpose.msra.mxu0 %v5224_v63  ;;  %v7869_v54 = vand.u32 4294901760, %v5072_v17  ;;  %v7870_v17 = vand.u32 4294901760, %v5109_v25 }
  0xc9   : > { %v5653_v25 = vsub.f32 1.0, %v5447_v41  ;;  %v7873_v41 = vand.u32 4294901760, %v5224_v63  ;;  %v5688_v63 = vsub.f32 1.0, %v5438_v12  ;;  %v2676_v12 = vmul.f32 %v5522_v10, %v5522_v10 }
  0xca   : > { %670 = vmatmul.f32.gmra.mxu0 %v5582_v50  ;;  %835 = vmatmul.f32.gmra.mxu1 %v5452_v45 }
  0xcb   : > { %1930 = vmatpush.xpose.msra.mxu2 %v7867_v18  ;;  %1803 = vmatpush.xpose.msra.mxu1 %v5219_v32  ;;  %v7877_v18 = vld [vmem:[#allocation14_spill] sm:$0xff] }
  0xcc   : > { %2047 = vmatpush.xpose.msra.mxu3 %v4941_v22  ;;  %966 = vmatmul.f32.gmra.mxu2 %v5529_v31  ;;  %v2206_v22 = vsub.f32 1.0, %v5299_v3  ;;  %v5628_v3 = vsub.f32 1.0, %v5399_v15 }
  0xcd   : > { %1093 = vmatmul.f32.gmra.mxu3 %v5549_v0  ;;  %2530 = vperm.xlu1 %4233, %v5596_v56  }
  0xce   : > { %2540 = vperm.xlu0 %4232, %v5604_v29   ;;  %1686 = vmatpush.xpose.msra.mxu0 %v5273_v59  ;;  %v2675_v34 = vmul.f32 %v2206_v22, %v2206_v22 }
  0xcf   : > { %1934 = vmatpush.xpose.msra.mxu2 %v7869_v54  ;;  %2505 = vperm.xlu2 %4234, %v2206_v22   ;;  %v7878_v22 = vld [vmem:[#allocation53_spill] sm:$0xff] }
  0xd0   : > { %2049 = vmatpush.xpose.msra.mxu3 %v4972_v57  ;;  %v684_v57 = vsub.f32 %v5607_v40, %v5620_v52  ;;  %1805 = vmatpush.xpose.msra.mxu1 %v5265_v33  ;;  %v5709_v54 = vsub.f32 1.0, %v7878_v22 }
  0xd2   : > { %678 = vmatmul.f32.gmra.mxu0 %v5617_v7  ;;  %839 = vmatmul.f32.gmra.mxu1 %v5501_v13  ;;  %v5645_v15 = vand.u32 4294901760, %v684_v57 }
  0xd3   : > { %1938 = vmatpush.xpose.msra.mxu2 %v7870_v17  ;;  %1689 = vmatpush.xpose.msra.mxu0 %v5319_v6  ;;  %v7879_v17 = vld [vmem:[#allocation54_spill] sm:$0xff] }
  0xd4   : > { %2051 = vmatpush.xpose.msra.mxu3 %v5020_v46  ;;  %971 = vmatmul.f32.gmra.mxu2 %v5574_v27  ;;  %v2209_v46 = vsub.f32 1.0, %v5387_v23  ;;  %v7872_v23 = vand.u32 4294901760, %v5186_v39  ;;  %v5676_v39 = vsub.f32 1.0, %v5490_v11 }
  0xd5   : > { %1099 = vmatmul.f32.gmra.mxu3 %v5585_v20  ;;  %2545 = vperm.xlu1 %4233, %v5628_v3  }
  0xd6   : > { %2555 = vperm.xlu0 %4232, %v5635_v42   ;;  %1807 = vmatpush.xpose.msra.mxu1 %v5311_v8  ;;  %v2678_v10 = vmul.f32 %v2209_v46, %v2209_v46 }
  0xd7   : > { %1942 = vmatpush.xpose.msra.mxu2 %v7871_v35  ;;  %2520 = vperm.xlu2 %4234, %v2209_v46   ;;  %v7881_v46 = vld [vmem:[#allocation12_spill] sm:$0xff] }
  0xd8   : > { %2053 = vmatpush.xpose.msra.mxu3 %v5065_v19  ;;  %v5658_v19 = vsub.f32 1.0, %v381_v49  ;;  %1692 = vmatpush.xpose.msra.mxu0 %v5365_v48 }
  0xda   : > { %686 = vmatmul.f32.gmra.mxu0 %v5645_v15  ;;  %843 = vmatmul.f32.gmra.mxu1 %v5551_v51 }
  0xdb   : > { %1946 = vmatpush.xpose.msra.mxu2 %v7872_v23  ;;  %1809 = vmatpush.xpose.msra.mxu1 %v5357_v24 }
  0xdc   : > { %2055 = vmatpush.xpose.msra.mxu3 %v5103_v30  ;;  %976 = vmatmul.f32.gmra.mxu2 %v5607_v40  ;;  %v7910_v40 = vld [vmem:[#allocation42_spill] sm:$0xff] }
  0xdd   : > { %1105 = vmatmul.f32.gmra.mxu3 %v5620_v52  ;;  %2560 = vperm.xlu1 %4233, %v5653_v25  }
  0xde   : > { %2570 = vperm.xlu0 %4232, %v5658_v19   ;;  %1695 = vmatpush.xpose.msra.mxu0 %v5414_v58 }
  0xdf   : > { %v567_v30 = vpop.f32.mrf.mxu0  ;;  %1950 = vmatpush.xpose.msra.mxu2 %v7873_v41  ;;  %2535 = vperm.xlu2 %4234, %v5666_v36  }
  0xe0   : > { %2057 = vmatpush.xpose.msra.mxu3 %v5142_v47  ;;  %v7874_v47 = vand.u32 4294901760, %v5273_v59  ;;  %1811 = vmatpush.xpose.msra.mxu1 %v5405_v16  ;;  %v7875_v59 = vand.u32 4294901760, %v5319_v6  ;;  %v7876_v6 = vand.u32 4294901760, %v5365_v48  ;;  %v7880_v48 = vand.u32 4294901760, %v5414_v58  ;;  %v7883_v58 = vld [vmem:[#allocation19_spill] sm:$0xff] }
  0xe2   : > { %847 = vmatmul.f32.gmra.mxu1 %v5587_v61  ;;  %1174 = vmatmul.f32.vlgmr.msrb.gmra.mxu0 %v4925_v62 }
  0xe3   : > { %1954 = vmatpush.xpose.msra.mxu2 %v7874_v47  ;;  %1698 = vmatpush.xpose.msra.mxu0 %v5461_v4  ;;  %v7882_v47 = vand.u32 4294901760, %v5461_v4 }
  0xe4   : > { %2059 = vmatpush.xpose.msra.mxu3 %v5181_v9  ;;  %1372 = vmatmul.f32.vlgmr.msrb.gmra.mxu2 %v5013_v60 }
  0xe5   : > { %1593 = vmatmul.f32.vlgmr.msrb.gmra.mxu3 %v4925_v62  ;;  %2575 = vperm.xlu1 %4233, %v5676_v39  }
  0xe6   : > { %1813 = vmatpush.xpose.msra.mxu1 %v5454_v53  ;;  %2697 = vperm.xlu0 %4232, %v2675_v34  }
  0xe7   : > { %v575_v37 = vpop.f32.mrf.mxu0  ;;  %v788_v11 = vpop.f32.mrf.mxu1  ;;  %1958 = vmatpush.xpose.msra.mxu2 %v7875_v59  ;;  %2550 = vperm.xlu2 %4234, %v5688_v63  }
  0xe8   : > { %2061 = vmatpush.xpose.msra.mxu3 %v5219_v32  ;;  %v1016_v9 = vpop.f32.mrf.mxu3  ;;  %v789_v49 = vadd.f32 %v788_v11, %v567_v30  ;;  %v902_v60 = vpop.f32.mrf.mxu2  ;;  %1701 = vmatpush.xpose.msra.mxu0 %v5507_v14 }
  0xea   : > { %v903_v32 = vadd.f32 %v902_v60, %v789_v49  ;;  %1178 = vmatmul.f32.gmra.mxu0 %v4970_v55  ;;  %1271 = vmatmul.f32.vlgmr.msrb.gmra.mxu1 %v4925_v62  ;;  %v7885_v49 = vand.u32 4294901760, %v5507_v14 }
  0xeb   : > { %1962 = vmatpush.xpose.msra.mxu2 %v7876_v6  ;;  %1815 = vmatpush.xpose.msra.mxu1 %v7879_v17  ;;  %v7888_v6 = vld [vmem:[#allocation23_spill] sm:$0xff] }
  0xec   : > { %v5704_v2 = vadd.f32 %v1016_v9, %v903_v32  ;;  %1380 = vmatmul.f32.gmra.mxu2 %v7877_v18  ;;  %2063 = vmatpush.xpose.msra.mxu3 %v5265_v33 }
  0xed   : > { %1597 = vmatmul.f32.gmra.mxu3 %v4970_v55  ;;  %2702 = vperm.xlu1 %4233, %v2676_v12  }
  0xee   : > { %2712 = vperm.xlu0 %4232, %v2678_v10   ;;  %1704 = vmatpush.xpose.msra.mxu0 %v5538_v28 }
  0xef   : > { %v583_v35 = vpop.f32.mrf.mxu0  ;;  %v792_v23 = vpop.f32.mrf.mxu1  ;;  %1966 = vmatpush.xpose.msra.mxu2 %v7880_v48  ;;  %2565 = vperm.xlu2 %4234, %v5709_v54  }
  0xf0   : > { %v1022_v57 = vpop.f32.mrf.mxu3  ;;  %v793_v30 = vadd.f32 %v792_v23, %v575_v37  ;;  %v907_v41 = vpop.f32.mrf.mxu2  ;;  %2065 = vmatpush.xpose.msra.mxu3 %v5311_v8  ;;  %v2674_v8 = vmul.f32 %v5516_v44, %v5516_v44  ;;  %v7884_v37 = vld [vmem:[#allocation58_spill] sm:$0xff]  ;;  %v7887_v44 = vand.u32 4294901760, %v5538_v28 }
  0xf1   : > { %1817 = vmatpush.xpose.msra.mxu1 %v7884_v37  ;;  %v7890_v23 = vld [vmem:[#allocation26_spill] sm:$0xff] }
  0xf2   : > { %v908_v33 = vadd.f32 %v907_v41, %v793_v30  ;;  %1182 = vmatmul.f32.gmra.mxu0 %v7881_v46  ;;  %1275 = vmatmul.f32.gmra.mxu1 %v4970_v55 }
  0xf3   : > { %1970 = vmatpush.xpose.msra.mxu2 %v7882_v47 }
  0xf4   : > { %v5722_v9 = vadd.f32 %v1022_v57, %v908_v33  ;;  %1388 = vmatmul.f32.gmra.mxu2 %v7883_v58  ;;  %2067 = vmatpush.xpose.msra.mxu3 %v5357_v24  ;;  %v7886_v24 = vld [vmem:[#allocation16_spill] sm:$0xff] }
  0xf5   : > { %1601 = vmatmul.f32.gmra.mxu3 %v7881_v46 }
  0xf7   : > { %v591_v34 = vpop.f32.mrf.mxu0  ;;  %v796_v59 = vpop.f32.mrf.mxu1  ;;  %1974 = vmatpush.xpose.msra.mxu2 %v7885_v49  ;;  %2692 = vperm.xlu2 %4234, %v2674_v8   ;;  %v7892_v8 = vld [vmem:[#allocation24_spill] sm:$0xff] }
  0xf8   : > { %v1028_v11 = vpop.f32.mrf.mxu3  ;;  %v797_v4 = vadd.f32 %v796_v59, %v583_v35  ;;  %v912_v60 = vpop.f32.mrf.mxu2  ;;  %2069 = vmatpush.xpose.msra.mxu3 %v5405_v16  ;;  %v7889_v35 = vld [vmem:[#allocation18_spill] sm:$0xff] }
  0xfa   : > { %v913_v12 = vadd.f32 %v912_v60, %v797_v4  ;;  %1186 = vmatmul.f32.gmra.mxu0 %v7886_v24  ;;  %1279 = vmatmul.f32.gmra.mxu1 %v7881_v46 }
  0xfb   : > { %1978 = vmatpush.xpose.msra.mxu2 %v7887_v44 }
  0xfc   : > { %v5738_v32 = vadd.f32 %v1028_v11, %v913_v12  ;;  %1396 = vmatmul.f32.gmra.mxu2 %v7888_v6  ;;  %2071 = vmatpush.xpose.msra.mxu3 %v5454_v53  ;;  %v5756_v11 = vpop.permute.xlu2 %2280  ;;  %v7894_v6 = vld [vmem:[#allocation28_spill] sm:$0xff] }
  0xfd   : > { %1605 = vmatmul.f32.gmra.mxu3 %v7886_v24 }
  0xff   : > { %v599_v18 = vpop.f32.mrf.mxu0  ;;  %v800_v16 = vpop.f32.mrf.mxu1 }
 0x100   : > { %v1034_v14 = vpop.f32.mrf.mxu3  ;;  %v801_v10 = vadd.f32 %v800_v16, %v591_v34  ;;  %v917_v22 = vpop.f32.mrf.mxu2  ;;  %2073 = vmatpush.xpose.msra.mxu3 %v7879_v17  ;;  %v2679_v17 = vmul.f32 %v5571_v5, %v5571_v5  ;;  %v7893_v34 = vld [vmem:[#allocation31_spill] sm:$0xff]  ;;  %v2677_v5 = vmul.f32 %v5562_v21, %v5562_v21 }
 0x101   : > { %v5750_v47 = vpop.permute.xlu0 %2260  ;;  %v7896_v16 = vld [vmem:[#allocation35_spill] sm:$0xff] }
 0x102   : > { %v918_v57 = vadd.f32 %v917_v22, %v801_v10  ;;  %1190 = vmatmul.f32.gmra.mxu0 %v7889_v35  ;;  %1283 = vmatmul.f32.gmra.mxu1 %v7886_v24  ;;  %7891 = vst [vmem:[#allocation14_spill] sm:$0xff] %v5750_v47 }
 0x103   : > { %2717 = vperm.xlu1 %4233, %v2679_v17   ;;  %2707 = vperm.xlu2 %4234, %v2677_v5   ;;  %v5774_v22 = vpop.permute.xlu1 %2270  ;;  %v2682_v5 = vmul.f32 %v5604_v29, %v5604_v29 }
 0x104   : > { %v5746_v28 = vadd.f32 %v1034_v14, %v918_v57  ;;  %1404 = vmatmul.f32.gmra.mxu2 %v7890_v23  ;;  %2075 = vmatpush.xpose.msra.mxu3 %v7884_v37  ;;  %v5772_v10 = vpop.permute.xlu2 %2285  ;;  %7897 = vst [vmem:[#allocation54_spill] sm:$0xff] %v5774_v22 }
 0x105   : > { %1609 = vmatmul.f32.gmra.mxu3 %v7889_v35 }
 0x107   : > { %v607_v48 = vpop.f32.mrf.mxu0  ;;  %v804_v30 = vpop.f32.mrf.mxu1 }
 0x108   : > { %v1040_v53 = vpop.f32.mrf.mxu3  ;;  %v805_v41 = vadd.f32 %v804_v30, %v599_v18  ;;  %v922_v33 = vpop.f32.mrf.mxu2 }
 0x109   : > { %v5766_v14 = vpop.permute.xlu0 %2265 }
 0x10a   : > { %v923_v58 = vadd.f32 %v922_v33, %v805_v41  ;;  %1194 = vmatmul.f32.gmra.mxu0 %v7892_v8  ;;  %1287 = vmatmul.f32.gmra.mxu1 %v7889_v35  ;;  %7895 = vst [vmem:[#allocation53_spill] sm:$0xff] %v5766_v14  ;;  %v7898_v33 = vld [vmem:[#allocation30_spill] sm:$0xff] }
 0x10b   : > { %2732 = vperm.xlu1 %4233, %v2682_v5  }
 0x10c   : > { %v5759_v37 = vadd.f32 %v1040_v53, %v923_v58  ;;  %1412 = vmatmul.f32.gmra.mxu2 %v7893_v34  ;;  %v2681_v53 = vmul.f32 %v5666_v36, %v5666_v36  ;;  %v7899_v58 = vld [vmem:[#allocation38_spill] sm:$0xff] }
 0x10d   : > { %1613 = vmatmul.f32.gmra.mxu3 %v7892_v8 }
 0x10e   : > { %2727 = vperm.xlu0 %4232, %v2681_v53   ;;  %v7903_v53 = vld [vmem:[#allocation43_spill] sm:$0xff] }
 0x10f   : > { %v615_v49 = vpop.f32.mrf.mxu0  ;;  %v808_v4 = vpop.f32.mrf.mxu1 }
 0x110   : > { %v1046_v59 = vpop.f32.mrf.mxu3  ;;  %v809_v60 = vadd.f32 %v808_v4, %v607_v48  ;;  %v927_v12 = vpop.f32.mrf.mxu2 }
 0x111   : > { %v5787_v34 = vpop.permute.xlu0 %2290 }
 0x112   : > { %v928_v44 = vadd.f32 %v927_v12, %v809_v60  ;;  %1198 = vmatmul.f32.gmra.mxu0 %v7894_v6  ;;  %1291 = vmatmul.f32.gmra.mxu1 %v7892_v8  ;;  %7900 = vst [vmem:[#allocation12_spill] sm:$0xff] %v5787_v34 }
 0x114   : > { %v5769_v18 = vadd.f32 %v1046_v59, %v928_v44  ;;  %1420 = vmatmul.f32.gmra.mxu2 %v7896_v16  ;;  %v5789_v59 = vpop.permute.xlu2 %2300  ;;  %v5794_v44 = vpop.permute.xlu1 %2275 }
 0x115   : > { %1617 = vmatmul.f32.gmra.mxu3 %v7894_v6  ;;  %7901 = vst [vmem:[#allocation19_spill] sm:$0xff] %v5789_v59 }
 0x117   : > { %v623_v57 = vpop.f32.mrf.mxu0  ;;  %v812_v23 = vpop.f32.mrf.mxu1 }
 0x118   : > { %v1052_v21 = vpop.f32.mrf.mxu3  ;;  %v813_v48 = vadd.f32 %v812_v23, %v615_v49  ;;  %v932_v30 = vpop.f32.mrf.mxu2 }
 0x11a   : > { %v933_v41 = vadd.f32 %v932_v30, %v813_v48  ;;  %1202 = vmatmul.f32.gmra.mxu0 %v7898_v33  ;;  %1295 = vmatmul.f32.gmra.mxu1 %v7894_v6  ;;  %v5802_v30 = vpop.permute.xlu0 %2305 }
 0x11b   : > { %7904 = vst [vmem:[#allocation58_spill] sm:$0xff] %v5802_v30 }
 0x11c   : > { %v5784_v17 = vadd.f32 %v1052_v21, %v933_v41  ;;  %1428 = vmatmul.f32.gmra.mxu2 %v7899_v58  ;;  %v7902_v21 = vld [vmem:[#allocation36_spill] sm:$0xff]  ;;  %v2680_v41 = vmul.f32 %v5596_v56, %v5596_v56  ;;  %v5806_v5 = vpop.permute.xlu2 %2315 }
 0x11d   : > { %1621 = vmatmul.f32.gmra.mxu3 %v7898_v33  ;;  %7905 = vst [vmem:[#allocation16_spill] sm:$0xff] %v5806_v5 }
 0x11e   : > { %2722 = vperm.xlu2 %4234, %v2680_v41  }
 0x11f   : > { %v631_v49 = vpop.f32.mrf.mxu0  ;;  %v816_v4 = vpop.f32.mrf.mxu1 }
 0x120   : > { %v1058_v36 = vpop.f32.mrf.mxu3  ;;  %v817_v60 = vadd.f32 %v816_v4, %v623_v57  ;;  %v937_v12 = vpop.f32.mrf.mxu2 }
 0x122   : > { %v938_v16 = vadd.f32 %v937_v12, %v817_v60  ;;  %1206 = vmatmul.f32.gmra.mxu0 %v7902_v21  ;;  %1299 = vmatmul.f32.gmra.mxu1 %v7898_v33  ;;  %v7906_v12 = vld [vmem:[#allocation40_spill] sm:$0xff] }
 0x124   : > { %v5799_v23 = vadd.f32 %v1058_v36, %v938_v16  ;;  %1436 = vmatmul.f32.gmra.mxu2 %v7903_v53  ;;  %v5810_v36 = vpop.permute.xlu1 %2295  ;;  %v7908_v53 = vld [vmem:[#allocation47_spill] sm:$0xff] }
 0x125   : > { %1625 = vmatmul.f32.gmra.mxu3 %v7902_v21  ;;  %7907 = vst [vmem:[#allocation23_spill] sm:$0xff] %v5810_v36 }
 0x127   : > { %v639_v29 = vpop.f32.mrf.mxu0  ;;  %v820_v57 = vpop.f32.mrf.mxu1 }
 0x128   : > { %v1064_v48 = vpop.f32.mrf.mxu3  ;;  %v821_v58 = vadd.f32 %v820_v57, %v631_v49  ;;  %v942_v4 = vpop.f32.mrf.mxu2  ;;  %v2684_v57 = vmul.f32 %v5688_v63, %v5688_v63 }
 0x12a   : > { %v943_v60 = vadd.f32 %v942_v4, %v821_v58  ;;  %1210 = vmatmul.f32.gmra.mxu0 %v7906_v12  ;;  %1303 = vmatmul.f32.gmra.mxu1 %v7902_v21  ;;  %v5818_v4 = vpop.permute.xlu0 %2320 }
 0x12b   : > { %7909 = vst [vmem:[#allocation18_spill] sm:$0xff] %v5818_v4  ;;  %2742 = vperm.xlu0 %4232, %v2684_v57   ;;  %v2685_v57 = vmul.f32 %v5635_v42, %v5635_v42 }
 0x12c   : > { %v5813_v16 = vadd.f32 %v1064_v48, %v943_v60  ;;  %1444 = vmatmul.f32.gmra.mxu2 %v7908_v53  ;;  %v5822_v48 = vpop.permute.xlu2 %2330  ;;  %v7912_v53 = vld [vmem:[#allocation49_spill] sm:$0xff]  ;;  %v5828_v0 = vpop.permute.xlu1 %2310 }
 0x12d   : > { %1629 = vmatmul.f32.gmra.mxu3 %v7906_v12  ;;  %7911 = vst [vmem:[#allocation26_spill] sm:$0xff] %v5822_v48  ;;  %2747 = vperm.xlu1 %4233, %v2685_v57   ;;  %v2683_v57 = vmul.f32 %v5628_v3, %v5628_v3 }
 0x12e   : > { %7913 = vst [vmem:[#allocation24_spill] sm:$0xff] %v5828_v0 }
 0x12f   : > { %v647_v56 = vpop.f32.mrf.mxu0  ;;  %v824_v49 = vpop.f32.mrf.mxu1  ;;  %2737 = vperm.xlu2 %4234, %v2683_v57  }
 0x130   : > { %v1070_v52 = vpop.f32.mrf.mxu3  ;;  %v825_v41 = vadd.f32 %v824_v49, %v639_v29  ;;  %v947_v58 = vpop.f32.mrf.mxu2 }
 0x132   : > { %v948_v20 = vadd.f32 %v947_v58, %v825_v41  ;;  %1214 = vmatmul.f32.gmra.mxu0 %v7910_v40  ;;  %1307 = vmatmul.f32.gmra.mxu1 %v7906_v12 }
 0x134   : > { %v5825_v60 = vadd.f32 %v1070_v52, %v948_v20  ;;  %1452 = vmatmul.f32.gmra.mxu2 %v7912_v53  ;;  %v5834_v20 = vpop.permute.xlu0 %2335  ;;  %v7916_v53 = vld [vmem:[#allocation55_spill] sm:$0xff]  ;;  %v5840_v38 = vpop.permute.xlu2 %2505 }
 0x135   : > { %1633 = vmatmul.f32.gmra.mxu3 %v7910_v40  ;;  %7914 = vst [vmem:[#allocation31_spill] sm:$0xff] %v5834_v20  ;;  %v5842_v42 = vpop.permute.xlu1 %2325 }
 0x136   : > { %7917 = vst [vmem:[#allocation35_spill] sm:$0xff] %v5840_v38 }
 0x137   : > { %v655_v29 = vpop.f32.mrf.mxu0  ;;  %v828_v49 = vpop.f32.mrf.mxu1  ;;  %7918 = vst [vmem:[#allocation30_spill] sm:$0xff] %v5842_v42 }
 0x138   : > { %v1076_v63 = vpop.f32.mrf.mxu3  ;;  %v829_v41 = vadd.f32 %v828_v49, %v647_v56  ;;  %v952_v58 = vpop.f32.mrf.mxu2 }
 0x13a   : > { %v953_v27 = vadd.f32 %v952_v58, %v829_v41  ;;  %1218 = vmatmul.f32.gmra.mxu0 %v5403_v26  ;;  %1311 = vmatmul.f32.gmra.mxu1 %v7910_v40 }
 0x13c   : > { %v5837_v52 = vadd.f32 %v1076_v63, %v953_v27  ;;  %1460 = vmatmul.f32.gmra.mxu2 %v7916_v53  ;;  %v5852_v63 = vpop.permute.xlu0 %2510 }
 0x13d   : > { %1637 = vmatmul.f32.gmra.mxu3 %v5403_v26  ;;  %7920 = vst [vmem:[#allocation36_spill] sm:$0xff] %v5852_v63 }
 0x13e   : > { %7915 = vst [vmem:[#allocation28_spill] sm:$0xff] %v5837_v52  ;;  %v5854_v52 = vpop.permute.xlu2 %2520 }
 0x13f   : > { %v663_v56 = vpop.f32.mrf.mxu0  ;;  %v832_v49 = vpop.f32.mrf.mxu1 }
 0x140   : > { %v1082_v31 = vpop.f32.mrf.mxu3  ;;  %v833_v41 = vadd.f32 %v832_v49, %v655_v29  ;;  %v957_v58 = vpop.f32.mrf.mxu2  ;;  %v2687_v49 = vmul.f32 %v5709_v54, %v5709_v54 }
 0x142   : > { %v958_v20 = vadd.f32 %v957_v58, %v833_v41  ;;  %1222 = vmatmul.f32.gmra.mxu0 %v5452_v45  ;;  %1315 = vmatmul.f32.gmra.mxu1 %v5403_v26  ;;  %v5858_v58 = vpop.permute.xlu1 %2500 }
 0x143   : > { %7921 = vst [vmem:[#allocation43_spill] sm:$0xff] %v5858_v58  ;;  %2757 = vperm.xlu0 %4232, %v2687_v49   ;;  %v2688_v49 = vmul.f32 %v5658_v19, %v5658_v19 }
 0x144   : > { %v5849_v27 = vadd.f32 %v1082_v31, %v958_v20  ;;  %1468 = vmatmul.f32.gmra.mxu2 %v5546_v43  ;;  %v5866_v20 = vpop.permute.xlu0 %2525 }
 0x145   : > { %1641 = vmatmul.f32.gmra.mxu3 %v5452_v45  ;;  %2762 = vperm.xlu1 %4233, %v2688_v49  }
 0x146   : > { %7919 = vst [vmem:[#allocation38_spill] sm:$0xff] %v5849_v27  ;;  %v5868_v1 = vpop.permute.xlu2 %2535 }
 0x147   : > { %v671_v3 = vpop.f32.mrf.mxu0  ;;  %v836_v29 = vpop.f32.mrf.mxu1  ;;  %7923 = vst [vmem:[#allocation47_spill] sm:$0xff] %v5868_v1 }
 0x148   : > { %v1088_v53 = vpop.f32.mrf.mxu3  ;;  %v837_v57 = vadd.f32 %v836_v29, %v663_v56  ;;  %v962_v41 = vpop.f32.mrf.mxu2 }
 0x14a   : > { %v963_v42 = vadd.f32 %v962_v41, %v837_v57  ;;  %1226 = vmatmul.f32.gmra.mxu0 %v5501_v13  ;;  %1319 = vmatmul.f32.gmra.mxu1 %v5452_v45 }
 0x14c   : > { %v5863_v31 = vadd.f32 %v1088_v53, %v963_v42  ;;  %1476 = vmatmul.f32.gmra.mxu2 %v5582_v50  ;;  %v5874_v42 = vpop.permute.xlu1 %2515  ;;  %v5880_v19 = vpop.permute.xlu0 %2540 }
 0x14d   : > { %1645 = vmatmul.f32.gmra.mxu3 %v5501_v13  ;;  %7924 = vst [vmem:[#allocation42_spill] sm:$0xff] %v5874_v42 }
 0x14e   : > { %7922 = vst [vmem:[#allocation40_spill] sm:$0xff] %v5863_v31  ;;  %v5886_v49 = vpop.permute.xlu2 %2550 }
 0x14f   : > { %v679_v54 = vpop.f32.mrf.mxu0  ;;  %v840_v56 = vpop.f32.mrf.mxu1  ;;  %7926 = vst [vmem:[#allocation55_spill] sm:$0xff] %v5880_v19 }
 0x150   : > { %v1094_v43 = vpop.f32.mrf.mxu3  ;;  %v841_v29 = vadd.f32 %v840_v56, %v671_v3  ;;  %v967_v27 = vpop.f32.mrf.mxu2  ;;  %7927 = vst [vmem:[#allocation67_spill] sm:$0xff] %v5886_v49 }
 0x152   : > { %v968_v57 = vadd.f32 %v967_v27, %v841_v29  ;;  %1230 = vmatmul.f32.gmra.mxu0 %v5551_v51  ;;  %1323 = vmatmul.f32.gmra.mxu1 %v5501_v13  ;;  %v2686_v27 = vmul.f32 %v5653_v25, %v5653_v25 }
 0x154   : > { %v5877_v50 = vadd.f32 %v1094_v43, %v968_v57  ;;  %1484 = vmatmul.f32.gmra.mxu2 %v5617_v7  ;;  %2752 = vperm.xlu2 %4234, %v2686_v27   ;;  %v5892_v43 = vpop.permute.xlu1 %2530 }
 0x155   : > { %1649 = vmatmul.f32.gmra.mxu3 %v5551_v51 }
 0x156   : > { %7925 = vst [vmem:[#allocation49_spill] sm:$0xff] %v5877_v50  ;;  %v7929_v50 = vld [vmem:[#allocation8_spill] sm:$0xff] }
 0x157   : > { %v687_v3 = vpop.f32.mrf.mxu0  ;;  %v844_v41 = vpop.f32.mrf.mxu1 }
 0x158   : > { %v1100_v53 = vpop.f32.mrf.mxu3  ;;  %v845_v56 = vadd.f32 %v844_v41, %v679_v54  ;;  %v972_v31 = vpop.f32.mrf.mxu2 }
 0x15a   : > { %v973_v29 = vadd.f32 %v972_v31, %v845_v56  ;;  %1234 = vmatmul.f32.gmra.mxu0 %v5587_v61  ;;  %1327 = vmatmul.f32.gmra.mxu1 %v5551_v51  ;;  %v5897_v51 = vpop.permute.xlu0 %2555 }
 0x15b   : > { %7930 = vst [vmem:[#allocation8_spill] sm:$0xff] %v5897_v51 }
 0x15c   : > { %v5889_v7 = vadd.f32 %v1100_v53, %v973_v29  ;;  %1492 = vmatmul.f32.gmra.mxu2 %v5645_v15  ;;  %v5902_v15 = vpop.permute.xlu2 %2565 }
 0x15d   : > { %1653 = vmatmul.f32.gmra.mxu3 %v5587_v61  ;;  %7932 = vst [vmem:[#allocation70_spill] sm:$0xff] %v5902_v15 }
 0x15e   : > { %7928 = vst [vmem:[#allocation68_spill] sm:$0xff] %v5889_v7 }
 0x15f   : > { %v848_v57 = vpop.f32.mrf.mxu1  ;;  %v1175_v41 = vpop.f32.mrf.mxu0 }
 0x160   : > { %v1106_v54 = vpop.f32.mrf.mxu3  ;;  %v849_v25 = vadd.f32 %v848_v57, %v687_v3  ;;  %v977_v31 = vpop.f32.mrf.mxu2  ;;  %v1176_v27 = vadd.f32 %v1175_v41, %v5704_v2 }
 0x161   : > { %v5905_v3 = vpop.permute.xlu1 %2545 }
 0x162   : > { %v978_v56 = vadd.f32 %v977_v31, %v849_v25  ;;  %1331 = vmatmul.f32.gmra.mxu1 %v5587_v61  ;;  %1707 = vmatmul.f32.vlgmr.msra.gmra.mxu0 %v7929_v50  ;;  %7933 = vst [vmem:[#allocation71_spill] sm:$0xff] %v5905_v3  ;;  %v383_v50 = vld [vmem:[%s7644_s3] sm:$0x3]  ;;  %v7942_v3 = vld [vmem:[#allocation11_spill] sm:$0xff] }
 0x163   : > { %v5915_v2 = vperm.slane %v383_v50, 0 }
 0x164   : > { %v5899_v53 = vadd.f32 %v1106_v54, %v978_v56  ;;  %1980 = vmatmul.f32.vlgmr.msra.gmra.mxu2 %v4925_v62  ;;  %v7935_v56 = vld [vmem:[#allocation10_spill] sm:$0xff]  ;;  %v5921_v15 = vpop.permute.xlu2 %2692 }
 0x165   : > { %2077 = vmatmul.f32.vlgmr.msra.gmra.mxu3 %v4925_v62  ;;  %v7936_v62 = vld [vmem:[#allocation9_spill] sm:$0xff] }
 0x166   : > { %7931 = vst [vmem:[#allocation69_spill] sm:$0xff] %v5899_v53 }
 0x167   : > { %v1179_v57 = vpop.f32.mrf.mxu0  ;;  %v1272_v25 = vpop.f32.mrf.mxu1  ;;  %7938 = vst [vmem:[#allocation9_spill] sm:$0xff] %v5921_v15 }
 0x168   : > { %v1594_v29 = vpop.f32.mrf.mxu3  ;;  %v1273_v31 = vadd.f32 %v1272_v25, %v1176_v27  ;;  %v1373_v7 = vpop.f32.mrf.mxu2 }
 0x169   : > { %v5910_v51 = vadd.f32 %v1594_v29, %v1373_v7  ;;  %v5918_v27 = vpop.permute.xlu0 %2570  ;;  %v1180_v7 = vadd.f32 %v1179_v57, %v5722_v9  ;;  %v5925_v61 = vpop.permute.xlu1 %2560  ;;  %v2770_v9 = vmul.f32 %v5921_v15, %v5915_v2  ;;  %v2338_v57 = vmul.f32 %v5750_v47, %v5915_v2  ;;  %v7959_v15 = vld [vmem:[#allocation21_spill] sm:$0xff] }
 0x16a   : > { %v2141_v54 = vmul.f32 2.0, %v1273_v31  ;;  %1712 = vmatmul.f32.gmra.mxu0 %v7935_v56  ;;  %1821 = vmatmul.f32.vlgmr.msra.gmra.mxu1 %v7936_v62  ;;  %7937 = vst [vmem:[#allocation10_spill] sm:$0xff] %v5918_v27  ;;  %v7941_v27 = vld [vmem:[#allocation13_spill] sm:$0xff] }
 0x16b   : > { %7934 = vst [vmem:[#allocation72_spill] sm:$0xff] %v5910_v51 }
 0x16c   : > { %v2173_v41 = vsub.f32 1.0, %v2141_v54  ;;  %1984 = vmatmul.f32.gmra.mxu2 %v4970_v55  ;;  %7939 = vst [vmem:[#allocation73_spill] sm:$0xff] %v5925_v61 }
 0x16d   : > { %2081 = vmatmul.f32.gmra.mxu3 %v4970_v55 }
 0x16e   : > { %v2226_v25 = vadd.f32 %v5915_v2, %v2173_v41 }
 0x16f   : > { %v1183_v29 = vpop.f32.mrf.mxu0  ;;  %v1276_v31 = vpop.f32.mrf.mxu1 }
 0x170   : > { %v1598_v53 = vpop.f32.mrf.mxu3  ;;  %v2434_v56 = vmul.f32 %v2226_v25, %v2226_v25  ;;  %v2578_v62 = vmul.f32 %v5858_v58, %v2226_v25  ;;  %v1381_v51 = vpop.f32.mrf.mxu2  ;;  %v1277_v49 = vadd.f32 %v1276_v31, %v1180_v7  ;;  %v2340_v7 = vmul.f32 %v5766_v14, %v5915_v2 }
 0x171   : > { %v5927_v13 = vadd.f32 %v1598_v53, %v1381_v51  ;;  %v5938_v53 = vperm.slane %v383_v50, 1  ;;  %v2370_v31 = vadd.f32 %v2338_v57, %v2173_v41  ;;  %v5950_v50 = vmul.f32 %v5756_v11, %v5915_v2  ;;  %v7946_v57 = vld [vmem:[#allocation17_spill] sm:$0xff] }
 0x172   : > { %v2610_v55 = vmul.f32 %v2578_v62, %v2141_v54  ;;  %1717 = vmatmul.f32.gmra.mxu0 %v7941_v27  ;;  %1827 = vmatmul.f32.gmra.mxu1 %v7942_v3  ;;  %v2466_v45 = vmul.f32 %v2434_v56, %v5750_v47  ;;  %v2143_v25 = vmul.f32 2.0, %v1277_v49  ;;  %v1184_v54 = vadd.f32 %v1183_v29, %v5738_v32  ;;  %v5944_v49 = vpop.permute.xlu0 %2697 }
 0x173   : > { %7940 = vst [vmem:[#allocation74_spill] sm:$0xff] %v5927_v13  ;;  %v5955_v41 = vmul.f32 %v5756_v11, %v5938_v53  ;;  %v5959_v29 = vmul.f32 %v5750_v47, %v5938_v53 }
 0x174   : > { %v2642_v58 = vsub.f32 %v2466_v45, %v2610_v55  ;;  %1988 = vmatmul.f32.gmra.mxu2 %v7881_v46  ;;  %v2175_v51 = vsub.f32 1.0, %v2143_v25  ;;  %7943 = vst [vmem:[#allocation13_spill] sm:$0xff] %v5944_v49 }
 0x175   : > { %2085 = vmatmul.f32.gmra.mxu3 %v7881_v46  ;;  %7944 = vst [vmem:[#allocation11_spill] sm:$0xff] %v5955_v41 }
 0x176   : > { %v2802_v3 = vadd.f32 %v2770_v9, %v2642_v58  ;;  %v2228_v56 = vadd.f32 %v5915_v2, %v2175_v51  ;;  %7945 = vst [vmem:[#allocation75_spill] sm:$0xff] %v5959_v29  ;;  %v5963_v9 = vmul.f32 %v5772_v10, %v5915_v2 }
 0x177   : > { %v1280_v62 = vpop.f32.mrf.mxu1  ;;  %v1187_v45 = vpop.f32.mrf.mxu0 }
 0x178   : > { %v1602_v27 = vpop.f32.mrf.mxu3  ;;  %v5946_v13 = vmax.f32 %v2802_v3, 0.0  ;;  %v1281_v46 = vadd.f32 %v1280_v62, %v1184_v54  ;;  %v1389_v55 = vpop.f32.mrf.mxu2  ;;  %v2436_v32 = vmul.f32 %v2228_v56, %v2228_v56  ;;  %v2580_v58 = vmul.f32 %v5840_v38, %v2228_v56  ;;  %v7947_v54 = vld [vmem:[#allocation15_spill] sm:$0xff] }
 0x179   : > { %v5968_v3 = vpop.permute.xlu1 %2575  ;;  %v5970_v56 = vmax.f32 %v2370_v31, 1e-15  ;;  %v2372_v62 = vadd.f32 %v2340_v7, %v2175_v51  ;;  %v2772_v38 = vmul.f32 %v5944_v49, %v5915_v2  ;;  %v5975_v29 = vadd.f32 %v1602_v27, %v1389_v55 }
 0x17a   : > { %4235 = vrsqrt.f32 %v5946_v13  ;;  %1722 = vmatmul.f32.gmra.mxu0 %v7946_v57  ;;  %1833 = vmatmul.f32.gmra.mxu1 %v7947_v54  ;;  %7948 = vst [vmem:[#allocation17_spill] sm:$0xff] %v5968_v3  ;;  %v2612_v41 = vmul.f32 %v2580_v58, %v2143_v25  ;;  %v2145_v47 = vmul.f32 2.0, %v1281_v46  ;;  %v2468_v61 = vmul.f32 %v2436_v32, %v5766_v14 }
 0x17b   : > { %7949 = vst [vmem:[#allocation15_spill] sm:$0xff] %v5975_v29  ;;  %v2689_v57 = vmul.f32 %v5676_v39, %v5676_v39  ;;  %v5983_v31 = vmul.f32 %v5772_v10, %v5938_v53  ;;  %v2342_v25 = vmul.f32 %v5774_v22, %v5915_v2  ;;  %v5989_v51 = vmul.f32 %v5774_v22, %v5938_v53 }
 0x17c   : > { %1992 = vmatmul.f32.gmra.mxu2 %v7886_v24  ;;  %v5993_v27 = vmul.f32 %v5766_v14, %v5938_v53  ;;  %v6001_v39 = vmul.f32 %v5789_v59, %v5938_v53  ;;  %v2177_v7 = vsub.f32 1.0, %v2145_v47  ;;  %v2644_v46 = vsub.f32 %v2468_v61, %v2612_v41 }
 0x17d   : > { %2089 = vmatmul.f32.gmra.mxu3 %v7886_v24  ;;  %7950 = vst [vmem:[#allocation76_spill] sm:$0xff] %v5983_v31  ;;  %v5997_v24 = vmul.f32 %v5789_v59, %v5915_v2  ;;  %2767 = vperm.xlu2 %4234, %v2689_v57   ;;  %v6005_v32 = vmul.f32 %v5794_v44, %v5915_v2  ;;  %4237 = vrcp.f32 %v5970_v56  ;;  %v6008_v58 = vmax.f32 %v2372_v62, 1e-15 }
 0x17e   : > { %7951 = vst [vmem:[#allocation77_spill] sm:$0xff] %v5989_v51  ;;  %v1188_v54 = vadd.f32 %v1187_v45, %v5746_v28  ;;  %v6013_v14 = vmul.f32 %v5794_v44, %v5938_v53  ;;  %v6017_v61 = vmul.f32 %v5787_v34, %v5915_v2  ;;  %v2230_v41 = vadd.f32 %v5915_v2, %v2177_v7 }
 0x17f   : > { %7952 = vst [vmem:[#allocation78_spill] sm:$0xff] %v5993_v27  ;;  %v1284_v31 = vpop.f32.mrf.mxu1  ;;  %v2804_v57 = vadd.f32 %v2772_v38, %v2644_v46  ;;  %v6022_v62 = vmul.f32 %v5787_v34, %v5938_v53  ;;  %v1191_v49 = vpop.f32.mrf.mxu0  ;;  %v7960_v38 = vld [vmem:[#allocation20_spill] sm:$0xff]  ;;  %4239 = vrcp.f32 %v6008_v58  ;;  %vm2873_vm1 = vcmp.eq.f32.partialorder %v5946_v13, inf }
 0x180   : > { %7953 = vst [vmem:[#allocation79_spill] sm:$0xff] %v5997_v24  ;;  %v1606_v55 = vpop.f32.mrf.mxu3  ;;  %v4236_v51 = vpop.eup %4235  ;;  %v1285_v45 = vadd.f32 %v1284_v31, %v1188_v54  ;;  %v2438_v29 = vmul.f32 %v2230_v41, %v2230_v41  ;;  %v2582_v3 = vmul.f32 %v5852_v63, %v2230_v41  ;;  %v2374_v54 = vadd.f32 %v2342_v25, %v2177_v7 }
 0x181   : > { %7954 = vst [vmem:[#allocation80_spill] sm:$0xff] %v6001_v39  ;;  %v1397_v39 = vpop.f32.mrf.mxu2  ;;  %v2867_v28 = vmul.f32 %v4236_v51, %v5946_v13  ;;  %v6046_v41 = vpop.permute.xlu1 %2702  ;;  %v6060_v25 = vmul.f32 %v5802_v30, %v5938_v53  ;;  %vm2875_vm2 = vcmp.eq.f32.partialorder %v5946_v13, 0.0 }
 0x182   : > { %7955 = vst [vmem:[#allocation81_spill] sm:$0xff] %v6013_v14  ;;  %v6025_v27 = vadd.f32 %v1606_v55, %v1397_v39  ;;  %v6029_v14 = vmul.f32 %v5806_v5, %v5915_v2  ;;  %1727 = vmatmul.f32.gmra.mxu0 %v7959_v15  ;;  %1839 = vmatmul.f32.gmra.mxu1 %v7960_v38  ;;  %v2147_v31 = vmul.f32 2.0, %v1285_v45 }
 0x183   : > { %7956 = vst [vmem:[#allocation82_spill] sm:$0xff] %v6022_v62  ;;  %v2868_v46 = vmul.f32 %v4236_v51, %v2867_v28  ;;  %v6035_v62 = vmax.f32 %v2804_v57, 0.0  ;;  %v6040_v39 = vmul.f32 %v5806_v5, %v5938_v53  ;;  %v6044_v55 = vmul.f32 %v5810_v36, %v5915_v2  ;;  %v4238_v28 = vpop.eup %4237 }
 0x184   : > { %7957 = vst [vmem:[#allocation83_spill] sm:$0xff] %v6025_v27  ;;  %v2614_v15 = vmul.f32 %v2582_v3, %v2145_v47  ;;  %1996 = vmatmul.f32.gmra.mxu2 %v7889_v35  ;;  %v6051_v57 = vmul.f32 %v5810_v36, %v5938_v53  ;;  %v6055_v45 = vmul.f32 %v5802_v30, %v5915_v2  ;;  %v6075_v5 = vmax.f32 %v2374_v54, 1e-15  ;;  %v7969_v54 = vld [vmem:[#allocation25_spill] sm:$0xff] }
 0x185   : > { %7958 = vst [vmem:[#allocation84_spill] sm:$0xff] %v6029_v14  ;;  %2093 = vmatmul.f32.gmra.mxu3 %v7889_v35  ;;  %v2869_v38 = vmul.f32 0.5, %v2868_v46  ;;  %4241 = vrsqrt.f32 %v6035_v62  ;;  %v6064_v47 = vmul.f32 %v5822_v48, %v5915_v2  ;;  %v2179_v35 = vsub.f32 1.0, %v2147_v31 }
 0x186   : > { %7961 = vst [vmem:[#allocation21_spill] sm:$0xff] %v6040_v39  ;;  %v2470_v3 = vmul.f32 %v2438_v29, %v5774_v22  ;;  %v6069_v39 = vmul.f32 %v5828_v0, %v5915_v2  ;;  %v1192_v46 = vadd.f32 %v1191_v49, %v5759_v37  ;;  %v2774_v63 = vmul.f32 %v6046_v41, %v5915_v2  ;;  %v6078_v22 = vpop.eup %4239 }
 0x187   : > { %7962 = vst [vmem:[#allocation20_spill] sm:$0xff] %v6046_v41  ;;  %v1288_v27 = vpop.f32.mrf.mxu1  ;;  %v2232_v48 = vadd.f32 %v5915_v2, %v2179_v35  ;;  %v3250_v14 = vmul.f32 0.9999999, %v5970_v56  ;;  %v7970_v41 = vld [vmem:[#allocation22_spill] sm:$0xff]  ;;  %v2876_v30 = vand.u32 2147483648, %v5946_v13  ;;  %4243 = vrcp.f32 %v6075_v5 }
 0x188   : > { %7963 = vst [vmem:[#allocation85_spill] sm:$0xff] %v6051_v57  ;;  %v1610_v7 = vpop.f32.mrf.mxu3  ;;  %v2870_v57 = vsub.f32 1.5, %v2869_v38  ;;  %v1289_v38 = vadd.f32 %v1288_v27, %v1192_v46  ;;  %v1195_v46 = vpop.f32.mrf.mxu0  ;;  %vm2897_vm3 = vcmp.eq.f32.partialorder %v6035_v62, inf  ;;  %vm2899_vm4 = vcmp.eq.f32.partialorder %v6035_v62, 0.0 }
 0x189   : > { %7964 = vst [vmem:[#allocation86_spill] sm:$0xff] %v6055_v45  ;;  %v1405_v29 = vpop.f32.mrf.mxu2  ;;  %v2440_v37 = vmul.f32 %v2232_v48, %v2232_v48  ;;  %v2584_v49 = vmul.f32 %v5874_v42, %v2232_v48 }
 0x18a   : > { %7965 = vst [vmem:[#allocation87_spill] sm:$0xff] %v6060_v25  ;;  %v3602_v25 = vmul.f32 %v4238_v28, %v5970_v56  ;;  %v6081_v45 = vadd.f32 %v1610_v7, %v1405_v29  ;;  %1732 = vmatmul.f32.gmra.mxu0 %v7969_v54  ;;  %1845 = vmatmul.f32.gmra.mxu1 %v7970_v41  ;;  %v6090_v27 = vmul.f32 2.0, %v1289_v38  ;;  %v6097_v41 = vpop.permute.xlu2 %2707  ;;  %v6107_v29 = vpop.permute.xlu0 %2712 }
 0x18b   : > { %7966 = vst [vmem:[#allocation88_spill] sm:$0xff] %v6064_v47  ;;  %v2646_v47 = vsub.f32 %v2470_v3, %v2614_v15  ;;  %v4242_v15 = vpop.eup %4241  ;;  %v3604_v7 = vmul.f32 %v6078_v22, %v6008_v58  ;;  %v2616_v42 = vmul.f32 %v2584_v49, %v2147_v31 }
 0x18c   : > { %7967 = vst [vmem:[#allocation89_spill] sm:$0xff] %v6069_v39  ;;  %v2871_v39 = vmul.f32 %v4236_v51, %v2870_v57  ;;  %v3634_v57 = vsub.f32 2.0, %v3602_v25  ;;  %v2891_v48 = vmul.f32 %v4242_v15, %v6035_v62  ;;  %2000 = vmatmul.f32.gmra.mxu2 %v7892_v8  ;;  %v2181_v25 = vsub.f32 1.0, %v6090_v27 }
 0x18d   : > { %7968 = vst [vmem:[#allocation90_spill] sm:$0xff] %v6081_v45  ;;  %v2806_v51 = vadd.f32 %v2774_v63, %v2646_v47  ;;  %2097 = vmatmul.f32.gmra.mxu3 %v7892_v8  ;;  %v2472_v45 = vmul.f32 %v2440_v37, %v5794_v44  ;;  %v3252_v8 = vmul.f32 0.9999999, %v6008_v58  ;;  %v6125_v49 = vpop.eup %4243 }
 0x18e   : > { %v2872_v3 = vmul.f32 %v2871_v39, %v5946_v13  ;;  %v2376_v39 = vadd.f32 %v6005_v32, %v2179_v35  ;;  %7971 = vst [vmem:[#allocation25_spill] sm:$0xff] %v6107_v29  ;;  %v2892_v54 = vmul.f32 %v4242_v15, %v2891_v48  ;;  %v2776_v32 = vmul.f32 %v6097_v41, %v5915_v2 }
 0x18f   : > { %v6104_v47 = vmax.f32 %v2806_v51, 0.0  ;;  %v1292_v35 = vpop.f32.mrf.mxu1  ;;  %v2234_v4 = vadd.f32 %v5915_v2, %v2181_v25  ;;  %v6128_v48 = vmul.f32 0.9999999, %v6075_v5 }
 0x190   : > { %v2874_v63 = vsel %vm2873_vm1, %v5946_v13, %v2872_v3  ;;  %v3666_v3 = vmul.f32 %v4238_v28, %v3634_v57  ;;  %v2893_v51 = vmul.f32 0.5, %v2892_v54  ;;  %v6119_v13 = vmul.f32 %v6107_v29, %v5915_v2  ;;  %v7973_v54 = vld [vmem:[#allocation27_spill] sm:$0xff]  ;;  %v1614_v29 = vpop.f32.mrf.mxu3 }
 0x191   : > { %v2877_v38 = vsel %vm2875_vm2, %v2876_v30, %v2874_v63  ;;  %4245 = vrsqrt.f32 %v6104_v47  ;;  %v3636_v30 = vsub.f32 2.0, %v3604_v7  ;;  %v2586_v57 = vmul.f32 %v5854_v52, %v2234_v4 }
 0x192   : > { %v3282_v24 = vmin.f32 %v2877_v38, %v3250_v14  ;;  %v6123_v14 = vmax.f32 %v2376_v39, 1e-15  ;;  %v2894_v28 = vsub.f32 1.5, %v2893_v51  ;;  %v2648_v63 = vsub.f32 %v2472_v45, %v2616_v42  ;;  %v7972_v38 = vld [vmem:[#allocation29_spill] sm:$0xff]  ;;  %1851 = vmatmul.f32.gmra.mxu1 %v7973_v54  ;;  %v1413_v51 = vpop.f32.mrf.mxu2 }
 0x193   : > { %1737 = vmatmul.f32.gmra.mxu0 %v7972_v38  ;;  %v1196_v39 = vadd.f32 %v1195_v46, %v5769_v18  ;;  %v3668_v45 = vmul.f32 %v6078_v22, %v3636_v30  ;;  %v1199_v38 = vpop.f32.mrf.mxu0  ;;  %v6147_v46 = vmul.f32 %v6125_v49, %v6075_v5  ;;  %v6150_v22 = vadd.f32 %v1614_v29, %v1413_v51 }
 0x194   : > { %v3314_v31 = vsub.f32 %v5970_v56, %v3282_v24  ;;  %v3346_v37 = vadd.f32 %v3282_v24, %v5970_v56  ;;  %v2442_v56 = vmul.f32 %v2234_v4, %v2234_v4  ;;  %v2895_v24 = vmul.f32 %v4242_v15, %v2894_v28  ;;  %2004 = vmatmul.f32.gmra.mxu2 %v7894_v6 }
 0x195   : > { %2101 = vmatmul.f32.gmra.mxu3 %v7894_v6  ;;  %v2618_v4 = vmul.f32 %v2586_v57, %v6090_v27  ;;  %v2808_v28 = vadd.f32 %v2776_v32, %v2648_v63  ;;  %v1293_v18 = vadd.f32 %v1292_v35, %v1196_v39  ;;  %v2900_v6 = vand.u32 2147483648, %v6035_v62  ;;  %v6159_v35 = vpop.permute.xlu1 %2717 }
 0x196   : > { %4247 = vlog2.f32 %v3346_v37  ;;  %v3538_v7 = vmul.f32 0.5, %v3314_v31  ;;  %v2378_v57 = vadd.f32 %v5950_v50, %v2181_v25  ;;  %v1200_v29 = vadd.f32 %v1199_v38, %v5784_v17  ;;  %v7975_v50 = vld [vmem:[#allocation33_spill] sm:$0xff]  ;;  %v7976_v25 = vld [vmem:[#allocation32_spill] sm:$0xff] }
 0x197   : > { %4249 = vlog2.f32 %v3314_v31  ;;  %v4246_v42 = vpop.eup %4245  ;;  %v2896_v31 = vmul.f32 %v2895_v24, %v6035_v62  ;;  %v6157_v32 = vmax.f32 %v2808_v28, 0.0  ;;  %v6173_v17 = vmul.f32 %v6159_v35, %v5915_v2 }
 0x198   : > { %v6139_v37 = vmul.f32 %v3666_v3, %v3538_v7  ;;  %4251 = vrcp.f32 %v6123_v14  ;;  %v2915_v15 = vmul.f32 %v4246_v42, %v6104_v47  ;;  %v2474_v3 = vmul.f32 %v2442_v56, %v5756_v11  ;;  %v1296_v56 = vpop.f32.mrf.mxu1 }
 0x199   : > { %v2898_v27 = vsel %vm2897_vm3, %v6035_v62, %v2896_v31  ;;  %v2151_v7 = vmul.f32 2.0, %v1293_v18  ;;  %4253 = vrsqrt.f32 %v6157_v32  ;;  %v3638_v62 = vsub.f32 2.0, %v6147_v46 }
 0x19a   : > { %7974 = vst [vmem:[#allocation22_spill] sm:$0xff] %v6139_v37  ;;  %v2916_v30 = vmul.f32 %v4246_v42, %v2915_v15  ;;  %v2901_v54 = vsel %vm2899_vm4, %v2900_v6, %v2898_v27  ;;  %v2650_v24 = vsub.f32 %v2474_v3, %v2618_v4  ;;  %1857 = vmatmul.f32.gmra.mxu1 %v7976_v25  ;;  %v6169_v6 = vmul.f32 0.9999999, %v6123_v14  ;;  %v1618_v25 = vpop.f32.mrf.mxu3 }
 0x19b   : > { %v3284_v37 = vmin.f32 %v2901_v54, %v3252_v8  ;;  %1742 = vmatmul.f32.gmra.mxu0 %v7975_v50  ;;  %v1297_v18 = vadd.f32 %v1296_v56, %v1200_v29  ;;  %v6179_v46 = vmax.f32 %v2378_v57, 1e-15  ;;  %v2183_v27 = vsub.f32 1.0, %v2151_v7  ;;  %v1421_v50 = vpop.f32.mrf.mxu2 }
 0x19c   : > { %v4248_v63 = vpop.eup %4247  ;;  %v2917_v31 = vmul.f32 0.5, %v2916_v30  ;;  %2008 = vmatmul.f32.gmra.mxu2 %v7898_v33  ;;  %v2810_v30 = vadd.f32 %v6119_v13, %v2650_v24  ;;  %vm2921_vm5 = vcmp.eq.f32.partialorder %v6104_v47, inf  ;;  %vm2923_vm6 = vcmp.eq.f32.partialorder %v6104_v47, 0.0 }
 0x19d   : > { %v4250_v39 = vpop.eup %4249  ;;  %v3379_v51 = vmul.f32 0.6931472, %v4248_v63  ;;  %2105 = vmatmul.f32.gmra.mxu3 %v7898_v33  ;;  %v3316_v8 = vsub.f32 %v6008_v58, %v3284_v37  ;;  %v3348_v4 = vadd.f32 %v3284_v37, %v6008_v58  ;;  %v2924_v33 = vand.u32 2147483648, %v6104_v47 }
 0x19e   : > { %v4252_v15 = vpop.eup %4251  ;;  %v3443_v28 = vmul.f32 0.6931472, %v4250_v39  ;;  %v2918_v38 = vsub.f32 1.5, %v2917_v31  ;;  %v2236_v58 = vadd.f32 %v5915_v2, %v2183_v27  ;;  %v6196_v29 = vmul.f32 2.0, %v1297_v18  ;;  %v1203_v31 = vpop.f32.mrf.mxu0 }
 0x19f   : > { %4255 = vlog2.f32 %v3348_v4  ;;  %v3540_v63 = vmul.f32 0.5, %v3316_v8  ;;  %v3608_v54 = vmul.f32 %v4252_v15, %v6123_v14  ;;  %v4254_v13 = vpop.eup %4253  ;;  %v7979_v4 = vld [vmem:[#allocation34_spill] sm:$0xff]  ;;  %vm2945_vm7 = vcmp.eq.f32.partialorder %v6157_v32, inf }
 0x1a0   : > { %v3506_v3 = vsub.f32 %v3379_v51, %v3443_v28  ;;  %v2919_v39 = vmul.f32 %v4246_v42, %v2918_v38  ;;  %4257 = vlog2.f32 %v3316_v8  ;;  %v6194_v42 = vmax.f32 %v2810_v30, 0.0 }
 0x1a1   : > { %v6191_v37 = vmul.f32 %v3668_v45, %v3540_v63  ;;  %4259 = vrcp.f32 %v6179_v46  ;;  %v2939_v24 = vmul.f32 %v4254_v13, %v6157_v32  ;;  %v2444_v56 = vmul.f32 %v2236_v58, %v2236_v58  ;;  %v7978_v45 = vld [vmem:[#allocation37_spill] sm:$0xff] }
 0x1a2   : > { %3730 = vst [vmem:[%s6185_s12] sm:$0xff] %v3506_v3  ;;  %v2920_v57 = vmul.f32 %v2919_v39, %v6104_v47  ;;  %v2588_v51 = vmul.f32 %v5866_v20, %v2236_v58  ;;  %v3640_v28 = vsub.f32 2.0, %v3608_v54  ;;  %4261 = vrsqrt.f32 %v6194_v42  ;;  %1863 = vmatmul.f32.gmra.mxu1 %v7979_v4 }
 0x1a3   : > { %7977 = vst [vmem:[#allocation29_spill] sm:$0xff] %v6191_v37  ;;  %1747 = vmatmul.f32.gmra.mxu0 %v7978_v45  ;;  %v3670_v38 = vmul.f32 %v6125_v49, %v3638_v62  ;;  %v2940_v3 = vmul.f32 %v4254_v13, %v2939_v24  ;;  %v6210_v39 = vmul.f32 0.9999999, %v6179_v46  ;;  %v2185_v58 = vsub.f32 1.0, %v6196_v29 }
 0x1a4   : > { %v2922_v8 = vsel %vm2921_vm5, %v6104_v47, %v2920_v57  ;;  %v2620_v30 = vmul.f32 %v2588_v51, %v2151_v7  ;;  %v2380_v47 = vadd.f32 %v5963_v9, %v2183_v27  ;;  %v6214_v57 = vpop.permute.xlu2 %2722  ;;  %2012 = vmatmul.f32.gmra.mxu2 %v7902_v21  ;;  %v6217_v7 = vadd.f32 %v1618_v25, %v1421_v50 }
 0x1a5   : > { %v2925_v18 = vsel %vm2923_vm6, %v2924_v33, %v2922_v8  ;;  %2109 = vmatmul.f32.gmra.mxu3 %v7902_v21  ;;  %v4256_v63 = vpop.eup %4255  ;;  %v2941_v33 = vmul.f32 0.5, %v2940_v3  ;;  %v2476_v24 = vmul.f32 %v2444_v56, %v5772_v10  ;;  %v2238_v21 = vadd.f32 %v5915_v2, %v2185_v58  ;;  %v1429_v3 = vpop.f32.mrf.mxu2 }
 0x1a6   : > { %v3286_v54 = vmin.f32 %v2925_v18, %v6128_v48  ;;  %v4258_v49 = vpop.eup %4257  ;;  %v3383_v62 = vmul.f32 0.6931472, %v4256_v63  ;;  %v6220_v48 = vmul.f32 %v4252_v15, %v3640_v28  ;;  %v1300_v18 = vpop.f32.mrf.mxu1  ;;  %v6229_v50 = vmul.f32 %v6214_v57, %v5915_v2 }
 0x1a7   : > { %v3447_v51 = vmul.f32 0.6931472, %v4258_v49  ;;  %v6224_v27 = vpop.eup %4259  ;;  %v2942_v45 = vsub.f32 1.5, %v2941_v33  ;;  %v2652_v4 = vsub.f32 %v2476_v24, %v2620_v30  ;;  %v1204_v28 = vadd.f32 %v1203_v31, %v5799_v23  ;;  %v7981_v24 = vld [vmem:[#allocation41_spill] sm:$0xff] }
 0x1a8   : > { %v3318_v8 = vsub.f32 %v6075_v5, %v3286_v54  ;;  %v3350_v9 = vadd.f32 %v3286_v54, %v6075_v5  ;;  %v4262_v25 = vpop.eup %4261  ;;  %v1622_v5 = vpop.f32.mrf.mxu3  ;;  %v6232_v54 = vmax.f32 %v2380_v47, 1e-15  ;;  %v6240_v33 = vmul.f32 %v6224_v27, %v6179_v46 }
 0x1a9   : > { %v3508_v56 = vsub.f32 %v3383_v62, %v3447_v51  ;;  %v2943_v63 = vmul.f32 %v4254_v13, %v2942_v45  ;;  %v2963_v49 = vmul.f32 %v4262_v25, %v6194_v42  ;;  %v2812_v62 = vadd.f32 %v6173_v17, %v2652_v4  ;;  %v1207_v47 = vpop.f32.mrf.mxu0 }
 0x1aa   : > { %4263 = vlog2.f32 %v3350_v9  ;;  %v3542_v15 = vmul.f32 0.5, %v3318_v8  ;;  %vm2947_vm8 = vcmp.eq.f32.partialorder %v6157_v32, 0.0  ;;  %v2590_v31 = vmul.f32 %v5892_v43, %v2238_v21 }
 0x1ab   : > { %4265 = vlog2.f32 %v3318_v8  ;;  %3732 = vst [vmem:[%s6185_s12 + $0x10] sm:$0xff] %v3508_v56  ;;  %v2944_v23 = vmul.f32 %v2943_v63, %v6157_v32  ;;  %v2964_v13 = vmul.f32 %v4262_v25, %v2963_v49  ;;  %1752 = vmatmul.f32.gmra.mxu0 %v7981_v24  ;;  %v2948_v51 = vand.u32 2147483648, %v6157_v32 }
 0x1ac   : > { %v6236_v30 = vmul.f32 %v3670_v38, %v3542_v15  ;;  %v7982_v38 = vld [vmem:[#allocation39_spill] sm:$0xff]  ;;  %v2446_v8 = vmul.f32 %v2238_v21, %v2238_v21  ;;  %v6250_v9 = vmax.f32 %v2812_v62, 0.0  ;;  %v1301_v45 = vadd.f32 %v1300_v18, %v1204_v28  ;;  %2016 = vmatmul.f32.gmra.mxu2 %v7906_v12 }
 0x1ad   : > { %1869 = vmatmul.f32.gmra.mxu1 %v7982_v38  ;;  %2113 = vmatmul.f32.gmra.mxu3 %v7906_v12  ;;  %v2946_v17 = vsel %vm2945_vm7, %v6157_v32, %v2944_v23  ;;  %4267 = vrcp.f32 %v6232_v54  ;;  %v2965_v4 = vmul.f32 0.5, %v2964_v13  ;;  %v6256_v56 = vadd.f32 %v1622_v5, %v1429_v3 }
 0x1ae   : > { %7980 = vst [vmem:[#allocation27_spill] sm:$0xff] %v6236_v30  ;;  %v3642_v63 = vsub.f32 2.0, %v6240_v33  ;;  %v2949_v21 = vsel %vm2947_vm8, %v2948_v51, %v2946_v17  ;;  %v2382_v49 = vadd.f32 %v6017_v61, %v2185_v58  ;;  %4269 = vrsqrt.f32 %v6250_v9  ;;  %v1304_v24 = vpop.f32.mrf.mxu1  ;;  %v1437_v51 = vpop.f32.mrf.mxu2 }
 0x1af   : > { %v3288_v12 = vmin.f32 %v2949_v21, %v6169_v6  ;;  %v2966_v62 = vsub.f32 1.5, %v2965_v4  ;;  %v2622_v23 = vmul.f32 %v2590_v31, %v6196_v29  ;;  %vm2969_vm9 = vcmp.eq.f32.partialorder %v6194_v42, inf }
 0x1b0   : > { %v4264_v15 = vpop.eup %4263  ;;  %v2155_v3 = vmul.f32 2.0, %v1301_v45  ;;  %v2478_v5 = vmul.f32 %v2446_v8, %v5787_v34  ;;  %v2972_v58 = vand.u32 2147483648, %v6194_v42  ;;  %v6270_v6 = vmax.f32 %v2382_v49, 1e-15  ;;  %v1626_v17 = vpop.f32.mrf.mxu3 }
 0x1b1   : > { %v4266_v18 = vpop.eup %4265  ;;  %v3387_v28 = vmul.f32 0.6931472, %v4264_v15  ;;  %v3320_v32 = vsub.f32 %v6123_v14, %v3288_v12  ;;  %v3352_v33 = vadd.f32 %v3288_v12, %v6123_v14  ;;  %v2967_v61 = vmul.f32 %v4262_v25, %v2966_v62  ;;  %v7983_v25 = vld [vmem:[#allocation45_spill] sm:$0xff]  ;;  %v7984_v15 = vld [vmem:[#allocation44_spill] sm:$0xff]  ;;  %v1211_v62 = vpop.f32.mrf.mxu0 }
 0x1b2   : > { %v3451_v13 = vmul.f32 0.6931472, %v4266_v18  ;;  %v1208_v29 = vadd.f32 %v1207_v47, %v5813_v16  ;;  %v2187_v31 = vsub.f32 1.0, %v2155_v3  ;;  %v2654_v14 = vsub.f32 %v2478_v5, %v2622_v23 }
 0x1b3   : > { %v6273_v45 = vpop.eup %4267  ;;  %4271 = vlog2.f32 %v3352_v33  ;;  %v3544_v8 = vmul.f32 0.5, %v3320_v32  ;;  %v2968_v4 = vmul.f32 %v2967_v61, %v6194_v42  ;;  %1757 = vmatmul.f32.gmra.mxu0 %v7983_v25  ;;  %vm2971_vm10 = vcmp.eq.f32.partialorder %v6194_v42, 0.0 }
 0x1b4   : > { %v3510_v38 = vsub.f32 %v3387_v28, %v3451_v13  ;;  %v4270_v21 = vpop.eup %4269  ;;  %4273 = vlog2.f32 %v3320_v32  ;;  %v2240_v49 = vadd.f32 %v5915_v2, %v2187_v31  ;;  %v2384_v16 = vadd.f32 %v6044_v55, %v2187_v31  ;;  %2020 = vmatmul.f32.gmra.mxu2 %v7910_v40 }
 0x1b5   : > { %1875 = vmatmul.f32.gmra.mxu1 %v7984_v15  ;;  %v1305_v47 = vadd.f32 %v1304_v24, %v1208_v29  ;;  %v6283_v18 = vmul.f32 %v6220_v48, %v3544_v8  ;;  %v2970_v28 = vsel %vm2969_vm9, %v6194_v42, %v2968_v4  ;;  %v2987_v12 = vmul.f32 %v4270_v21, %v6250_v9  ;;  %v6312_v15 = vpop.permute.xlu0 %2727 }
 0x1b6   : > { %3734 = vst [vmem:[%s6185_s12 + $0x20] sm:$0xff] %v3510_v38  ;;  %2117 = vmatmul.f32.gmra.mxu3 %v7910_v40  ;;  %v3674_v23 = vmul.f32 %v6224_v27, %v3642_v63  ;;  %v2973_v55 = vsel %vm2971_vm10, %v2972_v58, %v2970_v28  ;;  %v2448_v13 = vmul.f32 %v2240_v49, %v2240_v49  ;;  %4275 = vrcp.f32 %v6270_v6  ;;  %v1445_v28 = vpop.f32.mrf.mxu2 }
 0x1b7   : > { %7985 = vst [vmem:[#allocation33_spill] sm:$0xff] %v6283_v18  ;;  %v2592_v5 = vmul.f32 %v5868_v1, %v2240_v49  ;;  %v6295_v48 = vmul.f32 %v6273_v45, %v6232_v54  ;;  %v3290_v32 = vmin.f32 %v2973_v55, %v6210_v39  ;;  %v2988_v33 = vmul.f32 %v4270_v21, %v2987_v12  ;;  %v1308_v49 = vpop.f32.mrf.mxu1  ;;  %v7999_v18 = vld [vmem:[#allocation71_spill] sm:$0xff] }
 0x1b8   : > { %v2814_v42 = vadd.f32 %v6229_v50, %v2654_v14  ;;  %v6300_v61 = vmax.f32 %v2384_v16, 1e-15  ;;  %v6302_v24 = vmul.f32 2.0, %v1305_v47  ;;  %v6309_v50 = vadd.f32 %v1626_v17, %v1437_v51  ;;  %v7986_v16 = vld [vmem:[#allocation48_spill] sm:$0xff]  ;;  %v1630_v12 = vpop.f32.mrf.mxu3 }
 0x1b9   : > { %v2624_v40 = vmul.f32 %v2592_v5, %v2155_v3  ;;  %v4272_v27 = vpop.eup %4271  ;;  %v3322_v63 = vsub.f32 %v6179_v46, %v3290_v32  ;;  %v3354_v58 = vadd.f32 %v3290_v32, %v6179_v46  ;;  %v2989_v38 = vmul.f32 0.5, %v2988_v33  ;;  %v7987_v46 = vld [vmem:[#allocation46_spill] sm:$0xff] }
 0x1ba   : > { %v6306_v29 = vmax.f32 %v2814_v42, 0.0  ;;  %v4274_v31 = vpop.eup %4273  ;;  %v3391_v39 = vmul.f32 0.6931472, %v4272_v27  ;;  %v2189_v8 = vsub.f32 1.0, %v6302_v24  ;;  %v2480_v4 = vmul.f32 %v2448_v13, %v5810_v36  ;;  %v8009_v36 = vld [vmem:[#allocation38_spill] sm:$0xff] }
 0x1bb   : > { %v3455_v14 = vmul.f32 0.6931472, %v4274_v31  ;;  %4277 = vlog2.f32 %v3354_v58  ;;  %v3546_v3 = vmul.f32 0.5, %v3322_v63  ;;  %v2990_v25 = vsub.f32 1.5, %v2989_v38  ;;  %1762 = vmatmul.f32.gmra.mxu0 %v7986_v16 }
 0x1bc   : > { %v6318_v47 = vmul.f32 %v5828_v0, %v5938_v53  ;;  %v3260_v51 = vmul.f32 0.9999999, %v6232_v54  ;;  %4279 = vlog2.f32 %v3322_v63  ;;  %v1212_v17 = vadd.f32 %v1211_v62, %v5825_v60  ;;  %2024 = vmatmul.f32.gmra.mxu2 %v5403_v26  ;;  %v6327_v32 = vpop.eup %4275 }
 0x1bd   : > { %1881 = vmatmul.f32.gmra.mxu1 %v7987_v46  ;;  %v3512_v55 = vsub.f32 %v3391_v39, %v3455_v14  ;;  %v6323_v13 = vmul.f32 %v3674_v23, %v3546_v3  ;;  %v2991_v5 = vmul.f32 %v4270_v21, %v2990_v25  ;;  %4281 = vrsqrt.f32 %v6306_v29  ;;  %v1215_v21 = vpop.f32.mrf.mxu0  ;;  %v7991_v46 = vld [vmem:[#allocation18_spill] sm:$0xff] }
 0x1be   : > { %7988 = vst [vmem:[#allocation32_spill] sm:$0xff] %v6318_v47  ;;  %2121 = vmatmul.f32.gmra.mxu3 %v5403_v26  ;;  %4283 = vrcp.f32 %v6300_v61  ;;  %v2242_v33 = vadd.f32 %v5915_v2, %v2189_v8  ;;  %v2656_v42 = vsub.f32 %v2480_v4, %v2624_v40  ;;  %v2784_v60 = vmul.f32 %v6312_v15, %v5915_v2 }
 0x1bf   : > { %7989 = vst [vmem:[#allocation37_spill] sm:$0xff] %v6323_v13  ;;  %v3644_v62 = vsub.f32 2.0, %v6295_v48  ;;  %v2992_v23 = vmul.f32 %v2991_v5, %v6250_v9  ;;  %vm2993_vm11 = vcmp.eq.f32.partialorder %v6250_v9, inf  ;;  %v1309_v27 = vadd.f32 %v1308_v49, %v1212_v17 }
 0x1c0   : > { %3736 = vst [vmem:[%s6185_s12 + $0x30] sm:$0xff] %v3512_v55  ;;  %vm2995_vm12 = vcmp.eq.f32.partialorder %v6250_v9, 0.0  ;;  %v2996_v26 = vand.u32 2147483648, %v6250_v9  ;;  %v2450_v63 = vmul.f32 %v2242_v33, %v2242_v33  ;;  %v2594_v58 = vmul.f32 %v5880_v19, %v2242_v33  ;;  %v6353_v33 = vpop.permute.xlu1 %2732 }
 0x1c1   : > { %v4278_v40 = vpop.eup %4277  ;;  %v2994_v38 = vsel %vm2993_vm11, %v6250_v9, %v2992_v23  ;;  %v2816_v31 = vadd.f32 %v2784_v60, %v2656_v42  ;;  %v6341_v39 = vmul.f32 2.0, %v1309_v27  ;;  %v6343_v48 = vadd.f32 %v1630_v12, %v1445_v28  ;;  %v7992_v28 = vld [vmem:[#allocation52_spill] sm:$0xff]  ;;  %v7993_v12 = vld [vmem:[#allocation50_spill] sm:$0xff]  ;;  %v7995_v27 = vld [vmem:[#allocation79_spill] sm:$0xff] }
 0x1c2   : > { %v4280_v4 = vpop.eup %4279  ;;  %v3395_v14 = vmul.f32 0.6931472, %v4278_v40  ;;  %v2997_v3 = vsel %vm2995_vm12, %v2996_v26, %v2994_v38  ;;  %v2482_v25 = vmul.f32 %v2450_v63, %v5789_v59  ;;  %v2626_v49 = vmul.f32 %v2594_v58, %v6302_v24  ;;  %v7994_v24 = vld [vmem:[#allocation30_spill] sm:$0xff]  ;;  %v7996_v58 = vld [vmem:[#allocation51_spill] sm:$0xff] }
 0x1c3   : > { %7990 = vst [vmem:[#allocation34_spill] sm:$0xff] %v6343_v48  ;;  %v4282_v16 = vpop.eup %4281  ;;  %v6349_v17 = vmul.f32 %v7991_v46, %v5915_v2  ;;  %v3459_v55 = vmul.f32 0.6931472, %v4280_v4  ;;  %v3614_v9 = vmul.f32 %v6327_v32, %v6270_v6  ;;  %v3292_v5 = vmin.f32 %v2997_v3, %v3260_v51  ;;  %1767 = vmatmul.f32.gmra.mxu0 %v7992_v28  ;;  %v1312_v3 = vpop.f32.mrf.mxu1 }
 0x1c4   : > { %v6357_v42 = vpop.eup %4283  ;;  %v6361_v60 = vmul.f32 %v7994_v24, %v5915_v2  ;;  %v3011_v23 = vmul.f32 %v4282_v16, %v6306_v29  ;;  %v2386_v26 = vadd.f32 %v7995_v27, %v2189_v8  ;;  %v2658_v63 = vsub.f32 %v2482_v25, %v2626_v49  ;;  %2028 = vmatmul.f32.gmra.mxu2 %v7996_v58  ;;  %v1453_v25 = vpop.f32.mrf.mxu2 }
 0x1c5   : > { %1887 = vmatmul.f32.gmra.mxu1 %v7993_v12  ;;  %v3514_v51 = vsub.f32 %v3395_v14, %v3459_v55  ;;  %v3324_v40 = vsub.f32 %v6232_v54, %v3292_v5  ;;  %v3356_v38 = vadd.f32 %v3292_v5, %v6232_v54  ;;  %v6368_v4 = vmax.f32 %v2816_v31, 0.0  ;;  %v1634_v49 = vpop.f32.mrf.mxu3  ;;  %v7997_v5 = vld [vmem:[#allocation28_spill] sm:$0xff] }
 0x1c6   : > { %2125 = vmatmul.f32.gmra.mxu3 %v7996_v58  ;;  %v3676_v28 = vmul.f32 %v6273_v45, %v3644_v62  ;;  %v3012_v12 = vmul.f32 %v4282_v16, %v3011_v23  ;;  %v2191_v13 = vsub.f32 1.0, %v6341_v39  ;;  %v2786_v8 = vmul.f32 %v6353_v33, %v5915_v2 }
 0x1c7   : > { %3738 = vst [vmem:[%s6185_s12 + $0x40] sm:$0xff] %v3514_v51  ;;  %v3646_v14 = vsub.f32 2.0, %v3614_v9  ;;  %4285 = vlog2.f32 %v3356_v38  ;;  %v3548_v55 = vmul.f32 0.5, %v3324_v40  ;;  %v3616_v54 = vmul.f32 %v6357_v42, %v6300_v61  ;;  %v1219_v51 = vpop.f32.mrf.mxu0 }
 0x1c8   : > { %4287 = vlog2.f32 %v3324_v40  ;;  %v3013_v31 = vmul.f32 0.5, %v3012_v12  ;;  %v1216_v27 = vadd.f32 %v1215_v21, %v7997_v5  ;;  %v2244_v45 = vadd.f32 %v5915_v2, %v2191_v13  ;;  %v8000_v40 = vld [vmem:[#allocation31_spill] sm:$0xff]  ;;  %v8001_v21 = vld [vmem:[#allocation9_spill] sm:$0xff] }
 0x1c9   : > { %v6380_v62 = vmul.f32 %v3676_v28, %v3548_v55  ;;  %v6382_v23 = vmax.f32 %v2386_v26, 1e-15  ;;  %4289 = vrsqrt.f32 %v6368_v4  ;;  %v2818_v58 = vadd.f32 %v2786_v8, %v2658_v63  ;;  %v8003_v55 = vld [vmem:[#allocation59_spill] sm:$0xff]  ;;  %v8004_v63 = vld [vmem:[#allocation56_spill] sm:$0xff] }
 0x1ca   : > { %v3014_v9 = vsub.f32 1.5, %v3013_v31  ;;  %v2452_v38 = vmul.f32 %v2244_v45, %v2244_v45  ;;  %v2596_v30 = vmul.f32 %v7999_v18, %v2244_v45  ;;  %v1313_v37 = vadd.f32 %v1312_v3, %v1216_v27  ;;  %v8005_v45 = vld [vmem:[#allocation57_spill] sm:$0xff]  ;;  %v8008_v18 = vld [vmem:[#allocation86_spill] sm:$0xff] }
 0x1cb   : > { %7998 = vst [vmem:[#allocation41_spill] sm:$0xff] %v6380_v62  ;;  %v6388_v12 = vmul.f32 %v8000_v40, %v5915_v2  ;;  %v6392_v5 = vmul.f32 %v8001_v21, %v5938_v53  ;;  %v6394_v28 = vmax.f32 %v2818_v58, 0.0  ;;  %v6396_v26 = vadd.f32 %v1634_v49, %v1453_v25  ;;  %1772 = vmatmul.f32.gmra.mxu0 %v8003_v55  ;;  %v8006_v25 = vld [vmem:[#allocation58_spill] sm:$0xff] }
 0x1cc   : > { %v3262_v8 = vmul.f32 0.9999999, %v6270_v6  ;;  %v6402_v3 = vmul.f32 %v6327_v32, %v3646_v14  ;;  %v3015_v31 = vmul.f32 %v4282_v16, %v3014_v9  ;;  %v2161_v27 = vmul.f32 2.0, %v1313_v37  ;;  %2032 = vmatmul.f32.gmra.mxu2 %v8005_v45  ;;  %v6414_v37 = vpop.permute.xlu2 %2737 }
 0x1cd   : > { %8002 = vst [vmem:[#allocation39_spill] sm:$0xff] %v6396_v26  ;;  %1893 = vmatmul.f32.gmra.mxu1 %v8004_v63  ;;  %v4286_v62 = vpop.eup %4285  ;;  %v6406_v21 = vmul.f32 0.9999999, %v6300_v61  ;;  %vm3017_vm13 = vcmp.eq.f32.partialorder %v6306_v29, inf  ;;  %v2484_v49 = vmul.f32 %v2452_v38, %v8006_v25  ;;  %v2628_v58 = vmul.f32 %v2596_v30, %v6341_v39  ;;  %v1316_v30 = vpop.f32.mrf.mxu1 }
 0x1ce   : > { %2129 = vmatmul.f32.gmra.mxu3 %v8005_v45  ;;  %v4288_v55 = vpop.eup %4287  ;;  %v3399_v63 = vmul.f32 0.6931472, %v4286_v62  ;;  %v3648_v32 = vsub.f32 2.0, %v3616_v54  ;;  %v3016_v16 = vmul.f32 %v3015_v31, %v6306_v29  ;;  %4291 = vrcp.f32 %v6382_v23  ;;  %8007 = vst [vmem:[#allocation45_spill] sm:$0xff] %v6414_v37  ;;  %v1461_v38 = vpop.f32.mrf.mxu2 }
 0x1cf   : > { %v4290_v14 = vpop.eup %4289  ;;  %v3463_v9 = vmul.f32 0.6931472, %v4288_v55  ;;  %v3020_v47 = vand.u32 2147483648, %v6306_v29  ;;  %v2388_v59 = vadd.f32 %v8008_v18, %v2191_v13  ;;  %4293 = vrsqrt.f32 %v6394_v28  ;;  %v1638_v31 = vpop.f32.mrf.mxu3 }
 0x1d0   : > { %v3018_v39 = vsel %vm3017_vm13, %v6306_v29, %v3016_v16  ;;  %vm3019_vm14 = vcmp.eq.f32.partialorder %v6306_v29, 0.0  ;;  %v3035_v54 = vmul.f32 %v4290_v14, %v6368_v4  ;;  %v2193_v62 = vsub.f32 1.0, %v2161_v27 }
 0x1d1   : > { %v3516_v45 = vsub.f32 %v3399_v63, %v3463_v9  ;;  %v3021_v55 = vsel %vm3019_vm14, %v3020_v47, %v3018_v39  ;;  %v2660_v25 = vsub.f32 %v2484_v49, %v2628_v58  ;;  %v2788_v18 = vmul.f32 %v6414_v37, %v5915_v2  ;;  %v1223_v47 = vpop.f32.mrf.mxu0  ;;  %v8011_v9 = vld [vmem:[#allocation89_spill] sm:$0xff] }
 0x1d2   : > { %v6427_v13 = vmul.f32 %v6357_v42, %v3648_v32  ;;  %v3294_v26 = vmin.f32 %v3021_v55, %v3262_v8  ;;  %v3036_v19 = vmul.f32 %v4290_v14, %v3035_v54  ;;  %v2246_v16 = vadd.f32 %v5915_v2, %v2193_v62  ;;  %v8012_v54 = vld [vmem:[#allocation62_spill] sm:$0xff]  ;;  %v8015_v55 = vld [vmem:[#allocation61_spill] sm:$0xff] }
 0x1d3   : > { %3740 = vst [vmem:[%s6185_s12 + $0x50] sm:$0xff] %v3516_v45  ;;  %v6432_v29 = vmul.f32 0.9999999, %v6382_v23  ;;  %v6434_v48 = vmax.f32 %v2388_v59, 1e-15  ;;  %v1220_v63 = vadd.f32 %v1219_v51, %v8009_v36  ;;  %v6437_v49 = vadd.f32 %v1638_v31, %v1461_v38  ;;  %1777 = vmatmul.f32.gmra.mxu0 %v8012_v54  ;;  %v8013_v45 = vld [vmem:[#allocation60_spill] sm:$0xff] }
 0x1d4   : > { %v6439_v58 = vpop.eup %4291  ;;  %v3326_v42 = vsub.f32 %v6270_v6, %v3294_v26  ;;  %v3358_v8 = vadd.f32 %v3294_v26, %v6270_v6  ;;  %v3037_v32 = vmul.f32 0.5, %v3036_v19  ;;  %v2390_v39 = vadd.f32 %v8011_v9, %v2193_v62  ;;  %v8014_v51 = vld [vmem:[#allocation67_spill] sm:$0xff]  ;;  %2036 = vmatmul.f32.gmra.mxu2 %v8015_v55 }
 0x1d5   : > { %8010 = vst [vmem:[#allocation44_spill] sm:$0xff] %v6437_v49  ;;  %1899 = vmatmul.f32.gmra.mxu1 %v8013_v45  ;;  %v4294_v59 = vpop.eup %4293  ;;  %vm3041_vm15 = vcmp.eq.f32.partialorder %v6368_v4, inf  ;;  %v2454_v36 = vmul.f32 %v2246_v16, %v2246_v16  ;;  %v2598_v38 = vmul.f32 %v8014_v51, %v2246_v16  ;;  %v2820_v31 = vadd.f32 %v2788_v18, %v2660_v25  ;;  %v6452_v45 = vpop.permute.xlu0 %2742 }
 0x1d6   : > { %2133 = vmatmul.f32.gmra.mxu3 %v8015_v55  ;;  %4295 = vlog2.f32 %v3358_v8  ;;  %v3550_v6 = vmul.f32 0.5, %v3326_v42  ;;  %v3038_v19 = vsub.f32 1.5, %v3037_v32  ;;  %v1317_v26 = vadd.f32 %v1316_v30, %v1220_v63  ;;  %8016 = vst [vmem:[#allocation48_spill] sm:$0xff] %v6452_v45  ;;  %v8018_v63 = vld [vmem:[#allocation40_spill] sm:$0xff] }
 0x1d7   : > { %4297 = vlog2.f32 %v3326_v42  ;;  %v3059_v62 = vmul.f32 %v4294_v59, %v6394_v28  ;;  %v2486_v9 = vmul.f32 %v2454_v36, %v5828_v0  ;;  %v2630_v54 = vmul.f32 %v2598_v38, %v2161_v27  ;;  %v1320_v27 = vpop.f32.mrf.mxu1  ;;  %v8021_v0 = vld [vmem:[#allocation64_spill] sm:$0xff] }
 0x1d8   : > { %v6455_v37 = vmul.f32 %v6402_v3, %v3550_v6  ;;  %v6459_v25 = vmul.f32 %v6439_v58, %v6382_v23  ;;  %v3039_v18 = vmul.f32 %v4290_v14, %v3038_v19  ;;  %4299 = vrcp.f32 %v6434_v48 }
 0x1d9   : > { %vm3043_vm0 = vcmp.eq.f32.partialorder %v6368_v4, 0.0  ;;  %v3060_v30 = vmul.f32 %v4294_v59, %v3059_v62  ;;  %v6463_v16 = vmax.f32 %v2820_v31, 0.0  ;;  %v1224_v42 = vadd.f32 %v1223_v47, %v8018_v63 }
 0x1da   : > { %8017 = vst [vmem:[#allocation46_spill] sm:$0xff] %v6455_v37  ;;  %v3040_v8 = vmul.f32 %v3039_v18, %v6368_v4  ;;  %v2662_v32 = vsub.f32 %v2486_v9, %v2630_v54  ;;  %v2163_v3 = vmul.f32 2.0, %v1317_v26  ;;  %v2790_v36 = vmul.f32 %v6452_v45, %v5915_v2  ;;  %v1469_v26 = vpop.f32.mrf.mxu2  ;;  %v1642_v9 = vpop.f32.mrf.mxu3  ;;  %v8019_v54 = vld [vmem:[#allocation65_spill] sm:$0xff]  ;;  %v8020_v18 = vld [vmem:[#allocation63_spill] sm:$0xff] }
 0x1db   : > { %v3044_v38 = vand.u32 2147483648, %v6368_v4  ;;  %v3061_v14 = vmul.f32 0.5, %v3060_v30  ;;  %v6470_v55 = vmax.f32 %v2390_v39, 1e-15  ;;  %4301 = vrsqrt.f32 %v6463_v16  ;;  %1782 = vmatmul.f32.gmra.mxu0 %v8019_v54  ;;  %v8031_v45 = vld [vmem:[#allocation73_spill] sm:$0xff] }
 0x1dc   : > { %v4296_v6 = vpop.eup %4295  ;;  %v3650_v31 = vsub.f32 2.0, %v6459_v25  ;;  %v3042_v47 = vsel %vm3041_vm15, %v6368_v4, %v3040_v8  ;;  %v2195_v19 = vsub.f32 1.0, %v2163_v3  ;;  %v1321_v62 = vadd.f32 %v1320_v27, %v1224_v42  ;;  %v1227_v25 = vpop.f32.mrf.mxu0  ;;  %2040 = vmatmul.f32.gmra.mxu2 %v8021_v0 }
 0x1dd   : > { %1905 = vmatmul.f32.gmra.mxu1 %v8020_v18  ;;  %v4298_v30 = vpop.eup %4297  ;;  %v3403_v39 = vmul.f32 0.6931472, %v4296_v6  ;;  %v3045_v63 = vsel %vm3043_vm0, %v3044_v38, %v3042_v47  ;;  %v3062_v37 = vsub.f32 1.5, %v3061_v14  ;;  %vm3065_vm1 = vcmp.eq.f32.partialorder %v6394_v28, inf }
 0x1de   : > { %2137 = vmatmul.f32.gmra.mxu3 %v8021_v0  ;;  %v6484_v42 = vpop.eup %4299  ;;  %v3467_v27 = vmul.f32 0.6931472, %v4298_v30  ;;  %v3296_v8 = vmin.f32 %v3045_v63, %v6406_v21  ;;  %v2248_v54 = vadd.f32 %v5915_v2, %v2195_v19  ;;  %v2822_v6 = vadd.f32 %v2790_v36, %v2662_v32  ;;  %v8023_v32 = vld [vmem:[#allocation8_spill] sm:$0xff] }
 0x1df   : > { %v3063_v18 = vmul.f32 %v4294_v59, %v3062_v37  ;;  %v3068_v4 = vand.u32 2147483648, %v6394_v28  ;;  %4303 = vrcp.f32 %v6470_v55  ;;  %v6490_v38 = vadd.f32 %v1642_v9, %v1469_v26 }
 0x1e0   : > { %v3518_v14 = vsub.f32 %v3403_v39, %v3467_v27  ;;  %v3328_v47 = vsub.f32 %v6300_v61, %v3296_v8  ;;  %v3360_v0 = vadd.f32 %v3296_v8, %v6300_v61  ;;  %v6494_v51 = vmul.f32 2.0, %v1321_v62  ;;  %v8024_v62 = vld [vmem:[#allocation84_spill] sm:$0xff] }
 0x1e1   : > { %8022 = vst [vmem:[#allocation18_spill] sm:$0xff] %v6490_v38  ;;  %v4302_v30 = vpop.eup %4301  ;;  %v6498_v21 = vmul.f32 %v6484_v42, %v6434_v48  ;;  %v3064_v37 = vmul.f32 %v3063_v18, %v6394_v28  ;;  %v2456_v59 = vmul.f32 %v2248_v54, %v2248_v54  ;;  %v2600_v36 = vmul.f32 %v8023_v32, %v2248_v54  ;;  %v8027_v32 = vld [vmem:[#allocation16_spill] sm:$0xff] }
 0x1e2   : > { %3742 = vst [vmem:[%s6185_s12 + $0x60] sm:$0xff] %v3518_v14  ;;  %4305 = vlog2.f32 %v3360_v0  ;;  %v3552_v26 = vmul.f32 0.5, %v3328_v47  ;;  %v3083_v9 = vmul.f32 %v4302_v30, %v6463_v16  ;;  %v6504_v39 = vmax.f32 %v2822_v6, 0.0  ;;  %v1324_v14 = vpop.f32.mrf.mxu1  ;;  %v8026_v0 = vld [vmem:[#allocation66_spill] sm:$0xff] }
 0x1e3   : > { %4307 = vlog2.f32 %v3328_v47  ;;  %v3066_v61 = vsel %vm3065_vm1, %v6394_v28, %v3064_v37  ;;  %vm3067_vm2 = vcmp.eq.f32.partialorder %v6394_v28, 0.0  ;;  %v2392_v63 = vadd.f32 %v8024_v62, %v2195_v19  ;;  %v8029_v62 = vld [vmem:[#allocation49_spill] sm:$0xff] }
 0x1e4   : > { %v6512_v27 = vmul.f32 %v6427_v13, %v3552_v26  ;;  %v3069_v8 = vsel %vm3067_vm2, %v3068_v4, %v3066_v61  ;;  %v3084_v54 = vmul.f32 %v4302_v30, %v3083_v9  ;;  %v2197_v18 = vsub.f32 1.0, %v6494_v51  ;;  %v6524_v26 = vpop.permute.xlu1 %2747 }
 0x1e5   : > { %1911 = vmatmul.f32.gmra.mxu1 %v8026_v0  ;;  %v6516_v6 = vpop.eup %4303  ;;  %v3268_v47 = vmul.f32 0.9999999, %v6434_v48  ;;  %v3298_v37 = vmin.f32 %v3069_v8, %v6432_v29  ;;  %v2488_v28 = vmul.f32 %v2456_v59, %v8027_v32  ;;  %v2632_v38 = vmul.f32 %v2600_v36, %v2163_v3  ;;  %8028 = vst [vmem:[#allocation50_spill] sm:$0xff] %v6524_v26  ;;  %v6530_v8 = vpop.f32.mrf.mxu0 }
 0x1e6   : > { %8025 = vst [vmem:[#allocation52_spill] sm:$0xff] %v6512_v27  ;;  %v3682_v19 = vmul.f32 %v6439_v58, %v3650_v31  ;;  %v3085_v4 = vmul.f32 0.5, %v3084_v54  ;;  %4309 = vrsqrt.f32 %v6504_v39  ;;  %vm3089_vm3 = vcmp.eq.f32.partialorder %v6463_v16, inf  ;;  %v1477_v3 = vpop.f32.mrf.mxu2 }
 0x1e7   : > { %v3330_v9 = vsub.f32 %v6382_v23, %v3298_v37  ;;  %v3362_v61 = vadd.f32 %v3298_v37, %v6382_v23  ;;  %v1228_v29 = vadd.f32 %v1227_v25, %v8029_v62  ;;  %v6534_v58 = vmul.f32 %v6516_v6, %v6470_v55 }
 0x1e8   : > { %v4306_v59 = vpop.eup %4305  ;;  %v3086_v31 = vsub.f32 1.5, %v3085_v4  ;;  %v6536_v36 = vmax.f32 %v2392_v63, 1e-15  ;;  %v2250_v54 = vadd.f32 %v5915_v2, %v2197_v18  ;;  %v2664_v37 = vsub.f32 %v2488_v28, %v2632_v38 }
 0x1e9   : > { %v4308_v0 = vpop.eup %4307  ;;  %v3407_v13 = vmul.f32 0.6931472, %v4306_v59  ;;  %4311 = vlog2.f32 %v3362_v61  ;;  %v3554_v23 = vmul.f32 0.5, %v3330_v9  ;;  %v2792_v62 = vmul.f32 %v6524_v26, %v5915_v2  ;;  %v6557_v59 = vpop.permute.xlu2 %2752 }
 0x1ea   : > { %v3471_v27 = vmul.f32 0.6931472, %v4308_v0  ;;  %4313 = vlog2.f32 %v3330_v9  ;;  %v3087_v25 = vmul.f32 %v4302_v30, %v3086_v31  ;;  %v2394_v4 = vadd.f32 %v6349_v17, %v2197_v18  ;;  %v1646_v30 = vpop.f32.mrf.mxu3  ;;  %8032 = vst [vmem:[#allocation79_spill] sm:$0xff] %v6557_v59  ;;  %v1328_v31 = vpop.f32.mrf.mxu1 }
 0x1eb   : > { %v6541_v32 = vmul.f32 %v3682_v19, %v3554_v23  ;;  %v2458_v63 = vmul.f32 %v2250_v54, %v2250_v54  ;;  %v2602_v49 = vmul.f32 %v8031_v45, %v2250_v54  ;;  %vm3091_vm4 = vcmp.eq.f32.partialorder %v6463_v16, 0.0 }
 0x1ec   : > { %v4310_v1 = vpop.eup %4309  ;;  %v3520_v34 = vsub.f32 %v3407_v13, %v3471_v27  ;;  %v3088_v61 = vmul.f32 %v3087_v25, %v6463_v16  ;;  %v3092_v38 = vand.u32 2147483648, %v6463_v16  ;;  %4315 = vrcp.f32 %v6536_v36 }
 0x1ed   : > { %8030 = vst [vmem:[#allocation30_spill] sm:$0xff] %v6541_v32  ;;  %v3107_v28 = vmul.f32 %v4310_v1, %v6504_v39  ;;  %v2490_v19 = vmul.f32 %v2458_v63, %v7991_v46  ;;  %v2634_v17 = vmul.f32 %v2602_v49, %v6494_v51  ;;  %v3654_v18 = vsub.f32 2.0, %v6534_v58 }
 0x1ee   : > { %3744 = vst [vmem:[%s6185_s12 + $0x70] sm:$0xff] %v3520_v34  ;;  %v3090_v27 = vsel %vm3089_vm3, %v6463_v16, %v3088_v61  ;;  %v2824_v13 = vadd.f32 %v2792_v62, %v2664_v37  ;;  %v1325_v9 = vadd.f32 %v1324_v14, %v1228_v29  ;;  %v6559_v25 = vmax.f32 %v2394_v4, 1e-15  ;;  %v6567_v29 = vpop.f32.mrf.mxu0  ;;  %v1485_v62 = vpop.f32.mrf.mxu2  ;;  %v8033_v4 = vld [vmem:[#allocation13_spill] sm:$0xff] }
 0x1ef   : > { %v4312_v54 = vpop.eup %4311  ;;  %v3093_v0 = vsel %vm3091_vm4, %v3092_v38, %v3090_v27  ;;  %v3108_v23 = vmul.f32 %v4310_v1, %v3107_v28  ;;  %v6561_v63 = vadd.f32 %v1646_v30, %v1477_v3  ;;  %v2666_v58 = vsub.f32 %v2490_v19, %v2634_v17 }
 0x1f0   : > { %v4314_v49 = vpop.eup %4313  ;;  %v3411_v34 = vmul.f32 0.6931472, %v4312_v54  ;;  %v3300_v51 = vmin.f32 %v3093_v0, %v3268_v47  ;;  %v6563_v32 = vmax.f32 %v2824_v13, 0.0  ;;  %v2167_v37 = vmul.f32 2.0, %v1325_v9 }
 0x1f1   : > { %v3475_v45 = vmul.f32 0.6931472, %v4314_v49  ;;  %v3109_v16 = vmul.f32 0.5, %v3108_v23  ;;  %v2794_v14 = vmul.f32 %v6557_v59, %v5915_v2  ;;  %v6571_v3 = vmul.f32 %v8033_v4, %v5938_v53 }
 0x1f2   : > { %v3332_v61 = vsub.f32 %v6434_v48, %v3300_v51  ;;  %v3364_v47 = vadd.f32 %v3300_v51, %v6434_v48  ;;  %4317 = vrsqrt.f32 %v6563_v32  ;;  %v6576_v38 = vpop.eup %4315  ;;  %v8034_v30 = vsub.f32 2.0, %v6498_v21  ;;  %v1332_v4 = vpop.f32.mrf.mxu1 }
 0x1f3   : > { %v3522_v19 = vsub.f32 %v3411_v34, %v3475_v45  ;;  %v3110_v17 = vsub.f32 1.5, %v3109_v16  ;;  %4319 = vrcp.f32 %v6559_v25  ;;  %v3270_v27 = vmul.f32 0.9999999, %v6470_v55  ;;  %v8036_v45 = vld [vmem:[#allocation68_spill] sm:$0xff]  ;;  %v8037_v16 = vld [vmem:[#allocation70_spill] sm:$0xff] }
 0x1f4   : > { %v3684_v28 = vmul.f32 %v6484_v42, %v8034_v30  ;;  %4321 = vlog2.f32 %v3364_v47  ;;  %v3556_v13 = vmul.f32 0.5, %v3332_v61  ;;  %v2199_v9 = vsub.f32 1.0, %v2167_v37 }
 0x1f5   : > { %3746 = vst [vmem:[%s6185_s12 + $0x80] sm:$0xff] %v3522_v19  ;;  %v3686_v48 = vmul.f32 %v6516_v6, %v3654_v18  ;;  %4323 = vlog2.f32 %v3332_v61  ;;  %v3111_v54 = vmul.f32 %v4310_v1, %v3110_v17  ;;  %v2826_v0 = vadd.f32 %v2794_v14, %v2666_v58  ;;  %v1650_v1 = vpop.f32.mrf.mxu3 }
 0x1f6   : > { %v6585_v23 = vmul.f32 %v3684_v28, %v3556_v13  ;;  %v3624_v42 = vmul.f32 %v6576_v38, %v6536_v36  ;;  %v1232_v21 = vadd.f32 %v6530_v8, %v8036_v45  ;;  %v2252_v49 = vadd.f32 %v5915_v2, %v2199_v9  ;;  %v6611_v45 = vpop.permute.xlu0 %2757 }
 0x1f7   : > { %v6593_v34 = vmul.f32 0.9999999, %v6536_v36  ;;  %v3112_v51 = vmul.f32 %v3111_v54, %v6504_v39  ;;  %vm3113_vm5 = vcmp.eq.f32.partialorder %v6504_v39, inf  ;;  %v6597_v6 = vmax.f32 %v2826_v0, 0.0  ;;  %8038 = vst [vmem:[#allocation28_spill] sm:$0xff] %v6611_v45 }
 0x1f8   : > { %8035 = vst [vmem:[#allocation51_spill] sm:$0xff] %v6585_v23  ;;  %v4318_v18 = vpop.eup %4317  ;;  %vm3115_vm6 = vcmp.eq.f32.partialorder %v6504_v39, 0.0  ;;  %v3116_v58 = vand.u32 2147483648, %v6504_v39  ;;  %v2604_v14 = vmul.f32 %v8037_v16, %v2252_v49  ;;  %v1329_v8 = vadd.f32 %v1328_v31, %v1232_v21 }
 0x1f9   : > { %v6602_v61 = vpop.eup %4319  ;;  %v3114_v47 = vsel %vm3113_vm5, %v6504_v39, %v3112_v51  ;;  %v3131_v30 = vmul.f32 %v4318_v18, %v6563_v32  ;;  %v2460_v28 = vmul.f32 %v2252_v49, %v2252_v49  ;;  %4325 = vrsqrt.f32 %v6597_v6  ;;  %v6613_v51 = vpop.f32.mrf.mxu0 }
 0x1fa   : > { %v4322_v19 = vpop.eup %4321  ;;  %v3656_v17 = vsub.f32 2.0, %v3624_v42  ;;  %v3117_v13 = vsel %vm3115_vm6, %v3116_v58, %v3114_v47  ;;  %v6608_v54 = vmul.f32 0.9999999, %v6559_v25  ;;  %v2396_v0 = vadd.f32 %v6361_v60, %v2199_v9  ;;  %v1493_v49 = vpop.f32.mrf.mxu2 }
 0x1fb   : > { %v4324_v31 = vpop.eup %4323  ;;  %v3415_v21 = vmul.f32 0.6931472, %v4322_v19  ;;  %v3302_v23 = vmin.f32 %v3117_v13, %v3270_v27  ;;  %v3132_v16 = vmul.f32 %v4318_v18, %v3131_v30  ;;  %v2636_v39 = vmul.f32 %v2604_v14, %v2167_v37 }
 0x1fc   : > { %v3479_v59 = vmul.f32 0.6931472, %v4324_v31  ;;  %v6617_v42 = vmul.f32 %v6602_v61, %v6559_v25  ;;  %v2169_v58 = vmul.f32 2.0, %v1329_v8  ;;  %v6619_v47 = vadd.f32 %v1650_v1, %v1485_v62 }
 0x1fd   : > { %v3334_v60 = vsub.f32 %v6470_v55, %v3302_v23  ;;  %v3366_v9 = vadd.f32 %v3302_v23, %v6470_v55  ;;  %v3133_v19 = vmul.f32 0.5, %v3132_v16  ;;  %v2492_v27 = vmul.f32 %v2460_v28, %v7994_v24  ;;  %v8040_v55 = vld [vmem:[#allocation69_spill] sm:$0xff] }
 0x1fe   : > { %8039 = vst [vmem:[#allocation31_spill] sm:$0xff] %v6619_v47  ;;  %v3524_v37 = vsub.f32 %v3415_v21, %v3479_v59  ;;  %v6624_v14 = vmax.f32 %v2396_v0, 1e-15  ;;  %v2201_v30 = vsub.f32 1.0, %v2169_v58  ;;  %v2796_v13 = vmul.f32 %v6611_v45, %v5915_v2  ;;  %v8042_v0 = vld [vmem:[#allocation88_spill] sm:$0xff]  ;;  %v1654_v47 = vpop.f32.mrf.mxu3 }
 0x1ff   : > { %v4326_v31 = vpop.eup %4325  ;;  %4327 = vlog2.f32 %v3366_v9  ;;  %v3558_v26 = vmul.f32 0.5, %v3334_v60  ;;  %v3134_v8 = vsub.f32 1.5, %v3133_v19  ;;  %v2668_v62 = vsub.f32 %v2492_v27, %v2636_v39  ;;  %v1822_v27 = vpop.f32.mrf.mxu1 }
 0x200   : > { %3748 = vst [vmem:[%s6185_s12 + $0x90] sm:$0xff] %v3524_v37  ;;  %4329 = vlog2.f32 %v3334_v60  ;;  %v3155_v1 = vmul.f32 %v4326_v31, %v6597_v6  ;;  %v1236_v23 = vadd.f32 %v6567_v29, %v8040_v55  ;;  %v2254_v59 = vadd.f32 %v5915_v2, %v2201_v30  ;;  %v8043_v60 = vld [vmem:[#allocation10_spill] sm:$0xff] }
 0x201   : > { %v6633_v16 = vmul.f32 %v3686_v48, %v3558_v26  ;;  %v3135_v28 = vmul.f32 %v4318_v18, %v3134_v8  ;;  %v2398_v21 = vadd.f32 %v8042_v0, %v2201_v30  ;;  %v2828_v45 = vadd.f32 %v2796_v13, %v2668_v62  ;;  %v6650_v62 = vpop.f32.mrf.mxu0 }
 0x202   : > { %v3688_v9 = vmul.f32 %v6576_v38, %v3656_v17  ;;  %vm3137_vm7 = vcmp.eq.f32.partialorder %v6563_v32, inf  ;;  %v3156_v39 = vmul.f32 %v4326_v31, %v3155_v1  ;;  %v2606_v19 = vmul.f32 %v8043_v60, %v2254_v59  ;;  %v6703_v60 = vpop.permute.xlu2 %2767 }
 0x203   : > { %8041 = vst [vmem:[#allocation9_spill] sm:$0xff] %v6633_v16  ;;  %v3136_v37 = vmul.f32 %v3135_v28, %v6563_v32  ;;  %4331 = vrcp.f32 %v6624_v14  ;;  %v6641_v29 = vmax.f32 %v2828_v45, 0.0  ;;  %v1333_v26 = vadd.f32 %v1332_v4, %v1236_v23  ;;  %v1981_v45 = vpop.f32.mrf.mxu2 }
 0x204   : > { %vm3139_vm8 = vcmp.eq.f32.partialorder %v6563_v32, 0.0  ;;  %v3140_v48 = vand.u32 2147483648, %v6563_v32  ;;  %v3157_v18 = vmul.f32 0.5, %v3156_v39  ;;  %v2462_v30 = vmul.f32 %v2254_v59, %v2254_v59 }
 0x205   : > { %v4328_v38 = vpop.eup %4327  ;;  %v3658_v17 = vsub.f32 2.0, %v6617_v42  ;;  %v3138_v13 = vsel %vm3137_vm7, %v6563_v32, %v3136_v37  ;;  %v6647_v8 = vmax.f32 %v2398_v21, 1e-15  ;;  %4333 = vrsqrt.f32 %v6641_v29  ;;  %v6657_v21 = vpop.permute.xlu1 %2762  ;;  %v8045_v37 = vld [vmem:[#allocation26_spill] sm:$0xff] }
 0x206   : > { %v4330_v1 = vpop.eup %4329  ;;  %v3419_v4 = vmul.f32 0.6931472, %v4328_v38  ;;  %v3141_v55 = vsel %vm3139_vm8, %v3140_v48, %v3138_v13  ;;  %v3158_v23 = vsub.f32 1.5, %v3157_v18  ;;  %v2638_v28 = vmul.f32 %v2606_v19, %v2169_v58  ;;  %8044 = vst [vmem:[#allocation59_spill] sm:$0xff] %v6657_v21  ;;  %v2078_v18 = vpop.f32.mrf.mxu3 }
 0x207   : > { %v3483_v0 = vmul.f32 0.6931472, %v4330_v1  ;;  %v3304_v59 = vmin.f32 %v3141_v55, %v6593_v34  ;;  %vm3161_vm9 = vcmp.eq.f32.partialorder %v6597_v6, inf  ;;  %v2171_v42 = vmul.f32 2.0, %v1333_v26  ;;  %v1828_v55 = vpop.f32.mrf.mxu1 }
 0x208   : > { %v3159_v39 = vmul.f32 %v4326_v31, %v3158_v23  ;;  %vm3163_vm10 = vcmp.eq.f32.partialorder %v6597_v6, 0.0  ;;  %v6655_v32 = vadd.f32 %v1654_v47, %v1493_v49  ;;  %v2494_v16 = vmul.f32 %v2462_v30, %v8045_v37 }
 0x209   : > { %v6660_v38 = vpop.eup %4331  ;;  %v3526_v48 = vsub.f32 %v3419_v4, %v3483_v0  ;;  %v3336_v58 = vsub.f32 %v6536_v36, %v3304_v59  ;;  %v3368_v34 = vadd.f32 %v3304_v59, %v6536_v36  ;;  %v2203_v19 = vsub.f32 1.0, %v2171_v42  ;;  %v8047_v59 = vld [vmem:[#allocation72_spill] sm:$0xff] }
 0x20a   : > { %v3160_v31 = vmul.f32 %v3159_v39, %v6597_v6  ;;  %v3164_v26 = vand.u32 2147483648, %v6597_v6  ;;  %4335 = vrcp.f32 %v6647_v8  ;;  %v2670_v49 = vsub.f32 %v2494_v16, %v2638_v28 }
 0x20b   : > { %v4334_v47 = vpop.eup %4333  ;;  %3750 = vst [vmem:[%s6185_s12 + $0xa0] sm:$0xff] %v3526_v48  ;;  %4337 = vlog2.f32 %v3368_v34  ;;  %v3560_v30 = vmul.f32 0.5, %v3336_v58  ;;  %v2256_v13 = vadd.f32 %v5915_v2, %v2203_v19  ;;  %v2798_v1 = vmul.f32 %v6657_v21, %v5915_v2  ;;  %v8048_v48 = vld [vmem:[#allocation20_spill] sm:$0xff] }
 0x20c   : > { %4339 = vlog2.f32 %v3336_v58  ;;  %v6673_v36 = vmul.f32 %v6660_v38, %v6624_v14  ;;  %v3162_v4 = vsel %vm3161_vm9, %v6597_v6, %v3160_v31  ;;  %v3179_v16 = vmul.f32 %v4334_v47, %v6641_v29 }
 0x20d   : > { %v6679_v23 = vmul.f32 %v3688_v9, %v3560_v30  ;;  %v3165_v28 = vsel %vm3163_vm10, %v3164_v26, %v3162_v4  ;;  %v2400_v0 = vadd.f32 %v6388_v12, %v2203_v19  ;;  %v1709_v39 = vadd.f32 %v6613_v51, %v8047_v59  ;;  %v8049_v30 = vld [vmem:[#allocation17_spill] sm:$0xff]  ;;  %v1718_v4 = vpop.f32.mrf.mxu0  ;;  %v1985_v12 = vpop.f32.mrf.mxu2 }
 0x20e   : > { %v6688_v58 = vmul.f32 %v8048_v48, %v5938_v53  ;;  %v3690_v34 = vmul.f32 %v6602_v61, %v3658_v17  ;;  %v3306_v31 = vmin.f32 %v3165_v28, %v6608_v54  ;;  %v3180_v21 = vmul.f32 %v4334_v47, %v3179_v16 }
 0x20f   : > { %8046 = vst [vmem:[#allocation56_spill] sm:$0xff] %v6679_v23  ;;  %v3276_v9 = vmul.f32 0.9999999, %v6624_v14  ;;  %v2608_v23 = vmul.f32 %v8049_v30, %v2256_v13  ;;  %v2830_v6 = vadd.f32 %v2798_v1, %v2670_v49  ;;  %v1823_v26 = vadd.f32 %v1822_v27, %v1709_v39 }
 0x210   : > { %v6694_v19 = vpop.eup %4335  ;;  %v3338_v59 = vsub.f32 %v6559_v25, %v3306_v31  ;;  %v3370_v48 = vadd.f32 %v3306_v31, %v6559_v25  ;;  %v3181_v61 = vmul.f32 0.5, %v3180_v21  ;;  %v6699_v54 = vmax.f32 %v2400_v0, 1e-15  ;;  %v2082_v0 = vpop.f32.mrf.mxu3 }
 0x211   : > { %v4338_v17 = vpop.eup %4337  ;;  %v2464_v16 = vmul.f32 %v2256_v13, %v2256_v13  ;;  %v6701_v28 = vmax.f32 %v2830_v6, 0.0  ;;  %v1982_v30 = vadd.f32 %v1981_v45, %v1823_v26  ;;  %v3630_v25 = vmul.f32 %v6694_v19, %v6647_v8  ;;  %v8050_v45 = vld [vmem:[#allocation74_spill] sm:$0xff] }
 0x212   : > { %v4340_v49 = vpop.eup %4339  ;;  %v3423_v27 = vmul.f32 0.6931472, %v4338_v17  ;;  %4341 = vlog2.f32 %v3370_v48  ;;  %v3562_v1 = vmul.f32 0.5, %v3338_v59  ;;  %v3182_v39 = vsub.f32 1.5, %v3181_v61 }
 0x213   : > { %v3487_v51 = vmul.f32 0.6931472, %v4340_v49  ;;  %4343 = vlog2.f32 %v3338_v59  ;;  %v2640_v21 = vmul.f32 %v2608_v23, %v2171_v42  ;;  %v1714_v6 = vadd.f32 %v6650_v62, %v8050_v45 }
 0x214   : > { %v6707_v31 = vmul.f32 %v3690_v34, %v3562_v1  ;;  %v3183_v13 = vmul.f32 %v4334_v47, %v3182_v39  ;;  %4345 = vrsqrt.f32 %v6701_v28  ;;  %v2496_v48 = vmul.f32 %v2464_v16, %v8000_v40  ;;  %v1834_v47 = vpop.f32.mrf.mxu1 }
 0x215   : > { %v3528_v26 = vsub.f32 %v3423_v27, %v3487_v51  ;;  %4347 = vrcp.f32 %v6699_v54  ;;  %v2800_v59 = vmul.f32 %v6703_v60, %v5915_v2  ;;  %vm3185_vm11 = vcmp.eq.f32.partialorder %v6641_v29, inf  ;;  %v8051_v51 = vld [vmem:[#allocation15_spill] sm:$0xff] }
 0x216   : > { %v3184_v61 = vmul.f32 %v3183_v13, %v6641_v29  ;;  %v2079_v42 = vadd.f32 %v2078_v18, %v1982_v30  ;;  %v1829_v23 = vadd.f32 %v1828_v55, %v1714_v6  ;;  %vm3187_vm12 = vcmp.eq.f32.partialorder %v6641_v29, 0.0  ;;  %v6723_v55 = vpop.f32.mrf.mxu0  ;;  %v1989_v6 = vpop.f32.mrf.mxu2 }
 0x217   : > { %3752 = vst [vmem:[%s6185_s12 + $0xb0] sm:$0xff] %v3528_v26  ;;  %v3188_v62 = vand.u32 2147483648, %v6641_v29  ;;  %v2672_v34 = vsub.f32 %v2496_v48, %v2640_v21  ;;  %v1719_v17 = vadd.f32 %v1718_v4, %v8051_v51  ;;  %v3662_v16 = vsub.f32 2.0, %v3630_v25 }
 0x218   : > { %v4342_v49 = vpop.eup %4341  ;;  %v3186_v27 = vsel %vm3185_vm11, %v6641_v29, %v3184_v61  ;;  %v2142_v2 = vmul.f32 2.0, %v2079_v42  ;;  %v1986_v1 = vadd.f32 %v1985_v12, %v1829_v23  ;;  %v6727_v21 = vmul.f32 %v6097_v41, %v5938_v53 }
 0x219   : > { %v4344_v39 = vpop.eup %4343  ;;  %v3427_v13 = vmul.f32 0.6931472, %v4342_v49  ;;  %v3189_v45 = vsel %vm3187_vm12, %v3188_v62, %v3186_v27  ;;  %v2832_v18 = vadd.f32 %v2800_v59, %v2672_v34  ;;  %v1835_v30 = vadd.f32 %v1834_v47, %v1719_v17  ;;  %v2086_v49 = vpop.f32.mrf.mxu3 }
 0x21a   : > { %v4346_v26 = vpop.eup %4345  ;;  %v3491_v4 = vmul.f32 0.6931472, %v4344_v39  ;;  %v3308_v48 = vmin.f32 %v3189_v45, %v3276_v9  ;;  %v2174_v25 = vsub.f32 1.0, %v2142_v2  ;;  %v6732_v12 = vmul.f32 0.9999999, %v6647_v8 }
 0x21b   : > { %v6729_v29 = vpop.eup %4347  ;;  %v3203_v59 = vmul.f32 %v4346_v26, %v6701_v28  ;;  %v6735_v61 = vmax.f32 %v2832_v18, 0.0  ;;  %v2083_v42 = vadd.f32 %v2082_v0, %v1986_v1  ;;  %v1990_v62 = vadd.f32 %v1989_v6, %v1835_v30 }
 0x21c   : > { %v3530_v23 = vsub.f32 %v3427_v13, %v3491_v4  ;;  %v3340_v47 = vsub.f32 %v6624_v14, %v3308_v48  ;;  %v3372_v41 = vadd.f32 %v3308_v48, %v6624_v14  ;;  %v8052_v9 = vsub.f32 2.0, %v6673_v36  ;;  %v8055_v13 = vld [vmem:[#allocation43_spill] sm:$0xff] }
 0x21d   : > { %v6743_v51 = vmul.f32 %v6694_v19, %v3662_v16  ;;  %v3204_v17 = vmul.f32 %v4346_v26, %v3203_v59  ;;  %4349 = vrsqrt.f32 %v6735_v61  ;;  %v3632_v27 = vmul.f32 %v6729_v29, %v6699_v54  ;;  %v8056_v59 = vld [vmem:[#allocation14_spill] sm:$0xff] }
 0x21e   : > { %v3692_v34 = vmul.f32 %v6660_v38, %v8052_v9  ;;  %3754 = vst [vmem:[%s6185_s12 + $0xc0] sm:$0xff] %v3530_v23  ;;  %4351 = vlog2.f32 %v3372_v41  ;;  %v3564_v0 = vmul.f32 0.5, %v3340_v47  ;;  %vm3209_vm13 = vcmp.eq.f32.partialorder %v6701_v28, inf  ;;  %v8053_v38 = vld [vmem:[#allocation75_spill] sm:$0xff] }
 0x21f   : > { %v2227_v14 = vadd.f32 %v5938_v53, %v2174_v25  ;;  %4353 = vlog2.f32 %v3340_v47  ;;  %v3205_v36 = vmul.f32 0.5, %v3204_v17  ;;  %v2371_v1 = vadd.f32 %v8053_v38, %v2174_v25 }
 0x220   : > { %v2144_v19 = vmul.f32 2.0, %v2083_v42  ;;  %v6752_v16 = vmul.f32 %v3692_v34, %v3564_v0  ;;  %v2087_v18 = vadd.f32 %v2086_v49, %v1990_v62  ;;  %vm3211_vm14 = vcmp.eq.f32.partialorder %v6701_v28, 0.0  ;;  %v1728_v34 = vpop.f32.mrf.mxu0 }
 0x221   : > { %v2435_v39 = vmul.f32 %v2227_v14, %v2227_v14  ;;  %v2579_v45 = vmul.f32 %v8055_v13, %v2227_v14  ;;  %v3206_v30 = vsub.f32 1.5, %v3205_v36  ;;  %v6756_v6 = vmax.f32 %v2371_v1, 1e-15  ;;  %v8057_v14 = vld [vmem:[#allocation78_spill] sm:$0xff]  ;;  %v1840_v1 = vpop.f32.mrf.mxu1 }
 0x222   : > { %8054 = vst [vmem:[#allocation57_spill] sm:$0xff] %v6752_v16  ;;  %v2176_v4 = vsub.f32 1.0, %v2144_v19  ;;  %v3212_v48 = vand.u32 2147483648, %v6701_v28  ;;  %v6760_v41 = vmul.f32 2.0, %v2087_v18  ;;  %v3664_v42 = vsub.f32 2.0, %v3632_v27 }
 0x223   : > { %v2467_v23 = vmul.f32 %v2435_v39, %v8056_v59  ;;  %v2611_v47 = vmul.f32 %v2579_v45, %v2142_v2  ;;  %v4350_v25 = vpop.eup %4349  ;;  %v3207_v9 = vmul.f32 %v4346_v26, %v3206_v30  ;;  %4355 = vrcp.f32 %v6756_v6  ;;  %v8058_v26 = vld [vmem:[#allocation35_spill] sm:$0xff] }
 0x224   : > { %v2229_v62 = vadd.f32 %v5938_v53, %v2176_v4  ;;  %v4352_v17 = vpop.eup %4351  ;;  %v3227_v49 = vmul.f32 %v4350_v25, %v6735_v61  ;;  %v2373_v36 = vadd.f32 %v8057_v14, %v2176_v4  ;;  %v2178_v38 = vsub.f32 1.0, %v6760_v41 }
 0x225   : > { %v2643_v0 = vsub.f32 %v2467_v23, %v2611_v47  ;;  %v4354_v2 = vpop.eup %4353  ;;  %v3431_v39 = vmul.f32 0.6931472, %v4352_v17  ;;  %v3208_v13 = vmul.f32 %v3207_v9, %v6701_v28  ;;  %v8059_v23 = vld [vmem:[#allocation53_spill] sm:$0xff]  ;;  %vm3233_vm15 = vcmp.eq.f32.partialorder %v6735_v61, inf }
 0x226   : > { %v2437_v27 = vmul.f32 %v2229_v62, %v2229_v62  ;;  %v2581_v45 = vmul.f32 %v8058_v26, %v2229_v62  ;;  %v3495_v18 = vmul.f32 0.6931472, %v4354_v2  ;;  %v3228_v30 = vmul.f32 %v4350_v25, %v3227_v49 }
 0x227   : > { %v2803_v59 = vadd.f32 %v6392_v5, %v2643_v0  ;;  %v6770_v16 = vmax.f32 %v2373_v36, 1e-15  ;;  %v3210_v4 = vsel %vm3209_vm13, %v6701_v28, %v3208_v13  ;;  %v2231_v17 = vadd.f32 %v5938_v53, %v2178_v38  ;;  %v1993_v13 = vpop.f32.mrf.mxu2 }
 0x228   : > { %v2469_v47 = vmul.f32 %v2437_v27, %v8059_v23  ;;  %v2613_v14 = vmul.f32 %v2581_v45, %v2144_v19  ;;  %v3532_v9 = vsub.f32 %v3431_v39, %v3495_v18  ;;  %v3213_v62 = vsel %vm3211_vm14, %v3212_v48, %v3210_v4  ;;  %v8060_v39 = vld [vmem:[#allocation83_spill] sm:$0xff]  ;;  %v8061_v48 = vld [vmem:[#allocation90_spill] sm:$0xff] }
 0x229   : > { %v3229_v2 = vmul.f32 0.5, %v3228_v30  ;;  %v6779_v49 = vmax.f32 %v2803_v59, 0.0  ;;  %v6781_v5 = vpop.eup %4355  ;;  %v3280_v0 = vmul.f32 0.9999999, %v6699_v54  ;;  %v3310_v36 = vmin.f32 %v3213_v62, %v6732_v12 }
 0x22a   : > { %v2645_v26 = vsub.f32 %v2469_v47, %v2613_v14  ;;  %4357 = vrcp.f32 %v6770_v16  ;;  %3756 = vst [vmem:[%s6185_s12 + $0xd0] sm:$0xff] %v3532_v9  ;;  %v1724_v28 = vadd.f32 %v6723_v55, %v8060_v39  ;;  %v1729_v27 = vadd.f32 %v1728_v34, %v8061_v48  ;;  %v2090_v47 = vpop.f32.mrf.mxu3  ;;  %v8062_v55 = vld [vmem:[#allocation77_spill] sm:$0xff]  ;;  %v8063_v34 = vld [vmem:[#allocation36_spill] sm:$0xff] }
 0x22b   : > { %v3230_v19 = vsub.f32 1.5, %v3229_v2  ;;  %4359 = vrsqrt.f32 %v6779_v49  ;;  %v3696_v45 = vmul.f32 %v6729_v29, %v3664_v42  ;;  %v3342_v18 = vsub.f32 %v6647_v8, %v3310_v36  ;;  %v1733_v29 = vpop.f32.mrf.mxu0  ;;  %v1846_v2 = vpop.f32.mrf.mxu1 }
 0x22c   : > { %v3374_v30 = vadd.f32 %v3310_v36, %v6647_v8  ;;  %v3236_v59 = vand.u32 2147483648, %v6735_v61  ;;  %v2805_v4 = vadd.f32 %v6571_v3, %v2645_v26  ;;  %v2439_v23 = vmul.f32 %v2231_v17, %v2231_v17  ;;  %v8064_v26 = vld [vmem:[#allocation54_spill] sm:$0xff] }
 0x22d   : > { %v3231_v12 = vmul.f32 %v4350_v25, %v3230_v19  ;;  %v3566_v14 = vmul.f32 0.5, %v3342_v18  ;;  %v2375_v9 = vadd.f32 %v8062_v55, %v2178_v38  ;;  %v2583_v62 = vmul.f32 %v8063_v34, %v2231_v17 }
 0x22e   : > { %4361 = vlog2.f32 %v3374_v30  ;;  %v3603_v8 = vmul.f32 %v6781_v5, %v6756_v6  ;;  %v6802_v25 = vmax.f32 %v2805_v4, 0.0  ;;  %v2471_v19 = vmul.f32 %v2439_v23, %v8064_v26 }
 0x22f   : > { %4363 = vlog2.f32 %v3342_v18  ;;  %v3232_v42 = vmul.f32 %v3231_v12, %v6735_v61  ;;  %v6807_v3 = vmul.f32 %v6743_v51, %v3566_v14  ;;  %v2615_v38 = vmul.f32 %v2583_v62, %v6760_v41  ;;  %v1997_v34 = vpop.f32.mrf.mxu2 }
 0x230   : > { %v6804_v36 = vpop.eup %4357  ;;  %v1841_v17 = vadd.f32 %v1840_v1, %v1724_v28  ;;  %vm3235_vm0 = vcmp.eq.f32.partialorder %v6735_v61, 0.0  ;;  %4365 = vrsqrt.f32 %v6802_v25  ;;  %v6817_v18 = vadd.f32 %v1733_v29, %v6150_v22 }
 0x231   : > { %v4360_v39 = vpop.eup %4359  ;;  %v3234_v48 = vsel %vm3233_vm15, %v6735_v61, %v3232_v42  ;;  %v6821_v12 = vmul.f32 0.9999999, %v6756_v6  ;;  %v6823_v41 = vmax.f32 %v2375_v9, 1e-15  ;;  %v3635_v28 = vsub.f32 2.0, %v3603_v8 }
 0x232   : > { %v3237_v30 = vsel %vm3235_vm0, %v3236_v59, %v3234_v48  ;;  %v2879_v51 = vmul.f32 %v4360_v39, %v6779_v49  ;;  %v6826_v4 = vmul.f32 0.9999999, %v6770_v16  ;;  %v2647_v23 = vsub.f32 %v2471_v19, %v2615_v38 }
 0x233   : > { %v3312_v1 = vmin.f32 %v3237_v30, %v3280_v0  ;;  %v3605_v22 = vmul.f32 %v6804_v36, %v6770_v16  ;;  %v1994_v55 = vadd.f32 %v1993_v13, %v1841_v17  ;;  %v1847_v59 = vadd.f32 %v1846_v2, %v1729_v27  ;;  %v2094_v2 = vpop.f32.mrf.mxu3 }
 0x234   : > { %v4362_v61 = vpop.eup %4361  ;;  %v2880_v14 = vmul.f32 %v4360_v39, %v2879_v51  ;;  %v2807_v0 = vadd.f32 %v6688_v58, %v2647_v23  ;;  %4367 = vrcp.f32 %v6823_v41  ;;  %vm2885_vm1 = vcmp.eq.f32.partialorder %v6779_v49, inf }
 0x235   : > { %v4364_v62 = vpop.eup %4363  ;;  %v3435_v29 = vmul.f32 0.6931472, %v4362_v61  ;;  %v3344_v42 = vsub.f32 %v6699_v54, %v3312_v1  ;;  %v3376_v9 = vadd.f32 %v3312_v1, %v6699_v54  ;;  %v2091_v19 = vadd.f32 %v2090_v47, %v1994_v55  ;;  %v1852_v47 = vpop.f32.mrf.mxu1 }
 0x236   : > { %v3499_v8 = vmul.f32 0.6931472, %v4364_v62  ;;  %v2881_v26 = vmul.f32 0.5, %v2880_v14  ;;  %v4366_v38 = vpop.eup %4365  ;;  %v6834_v13 = vmax.f32 %v2807_v0, 0.0  ;;  %v1998_v27 = vadd.f32 %v1997_v34, %v1847_v59 }
 0x237   : > { %4369 = vlog2.f32 %v3376_v9  ;;  %v3568_v48 = vmul.f32 0.5, %v3344_v42  ;;  %v2903_v54 = vmul.f32 %v4366_v38, %v6802_v25  ;;  %v3637_v58 = vsub.f32 2.0, %v3605_v22 }
 0x238   : > { %v3534_v17 = vsub.f32 %v3435_v29, %v3499_v8  ;;  %4371 = vlog2.f32 %v3344_v42  ;;  %v2882_v30 = vsub.f32 1.5, %v2881_v26  ;;  %vm2887_vm2 = vcmp.eq.f32.partialorder %v6779_v49, 0.0 }
 0x239   : > { %v6837_v51 = vmul.f32 %v3696_v45, %v3568_v48  ;;  %4373 = vrsqrt.f32 %v6834_v13  ;;  %v2888_v23 = vand.u32 2147483648, %v6779_v49  ;;  %v2904_v61 = vmul.f32 %v4366_v38, %v2903_v54 }
 0x23a   : > { %3758 = vst [vmem:[%s6185_s12 + $0xe0] sm:$0xff] %v3534_v17  ;;  %v2883_v1 = vmul.f32 %v4360_v39, %v2882_v30  ;;  %v3667_v14 = vmul.f32 %v6781_v5, %v3635_v28  ;;  %vm2909_vm3 = vcmp.eq.f32.partialorder %v6802_v25, inf  ;;  %v2148_v55 = vmul.f32 2.0, %v2091_v19  ;;  %v6846_v59 = vpop.eup %4367  ;;  %v2001_v30 = vpop.f32.mrf.mxu2 }
 0x23b   : > { %v2095_v45 = vadd.f32 %v2094_v2, %v1998_v27  ;;  %v2905_v34 = vmul.f32 0.5, %v2904_v61  ;;  %vm2911_vm4 = vcmp.eq.f32.partialorder %v6802_v25, 0.0  ;;  %v2912_v39 = vand.u32 2147483648, %v6802_v25 }
 0x23c   : > { %v2884_v22 = vmul.f32 %v2883_v1, %v6779_v49  ;;  %v6852_v29 = vmul.f32 %v6804_v36, %v3637_v58  ;;  %v6855_v42 = vmul.f32 0.9999999, %v6823_v41  ;;  %v2180_v5 = vsub.f32 1.0, %v2148_v55 }
 0x23d   : > { %v4370_v62 = vpop.eup %4369  ;;  %v6857_v28 = vmul.f32 2.0, %v2095_v45  ;;  %v2906_v26 = vsub.f32 1.5, %v2905_v34  ;;  %v2936_v19 = vand.u32 2147483648, %v6834_v13  ;;  %v1853_v17 = vadd.f32 %v1852_v47, %v6817_v18  ;;  %v1738_v45 = vpop.f32.mrf.mxu0 }
 0x23e   : > { %v4372_v9 = vpop.eup %4371  ;;  %v3439_v0 = vmul.f32 0.6931472, %v4370_v62  ;;  %v2886_v8 = vsel %vm2885_vm1, %v6779_v49, %v2884_v22  ;;  %v2233_v2 = vadd.f32 %v5938_v53, %v2180_v5  ;;  %v6871_v61 = vmul.f32 %v6846_v59, %v6823_v41  ;;  %v8065_v49 = vld [vmem:[#allocation42_spill] sm:$0xff] }
 0x23f   : > { %v4374_v48 = vpop.eup %4373  ;;  %v3503_v27 = vmul.f32 0.6931472, %v4372_v9  ;;  %v2889_v36 = vsel %vm2887_vm2, %v2888_v23, %v2886_v8  ;;  %v2907_v58 = vmul.f32 %v4366_v38, %v2906_v26  ;;  %v2182_v62 = vsub.f32 1.0, %v6857_v28  ;;  %v2098_v9 = vpop.f32.mrf.mxu3 }
 0x240   : > { %v3283_v54 = vmin.f32 %v2889_v36, %v6821_v12  ;;  %v2927_v1 = vmul.f32 %v4374_v48, %v6834_v13  ;;  %v2441_v34 = vmul.f32 %v2233_v2, %v2233_v2  ;;  %v2585_v23 = vmul.f32 %v8065_v49, %v2233_v2  ;;  %v1858_v36 = vpop.f32.mrf.mxu1 }
 0x241   : > { %v3536_v22 = vsub.f32 %v3439_v0, %v3503_v27  ;;  %v2908_v12 = vmul.f32 %v2907_v58, %v6802_v25  ;;  %vm2933_vm5 = vcmp.eq.f32.partialorder %v6834_v13, inf  ;;  %v1739_v0 = vadd.f32 %v1738_v45, %v6217_v7 }
 0x242   : > { %v3315_v18 = vsub.f32 %v6756_v6, %v3283_v54  ;;  %v3347_v47 = vadd.f32 %v3283_v54, %v6756_v6  ;;  %v2928_v38 = vmul.f32 %v4374_v48, %v2927_v1  ;;  %v2473_v8 = vmul.f32 %v2441_v34, %v5794_v44 }
 0x243   : > { %3760 = vst [vmem:[%s6185_s12 + $0xf0] sm:$0xff] %v3536_v22  ;;  %v2617_v26 = vmul.f32 %v2585_v23, %v2148_v55  ;;  %v2002_v27 = vadd.f32 %v2001_v30, %v1853_v17  ;;  %v2910_v49 = vsel %vm2909_vm3, %v6802_v25, %v2908_v12  ;;  %vm2935_vm6 = vcmp.eq.f32.partialorder %v6834_v13, 0.0  ;;  %v8066_v30 = vld [vmem:[#allocation81_spill] sm:$0xff] }
 0x244   : > { %4375 = vlog2.f32 %v3347_v47  ;;  %v3539_v2 = vmul.f32 0.5, %v3315_v18  ;;  %v2929_v6 = vmul.f32 0.5, %v2928_v38  ;;  %v2913_v54 = vsel %vm2911_vm4, %v2912_v39, %v2910_v49  ;;  %v2005_v38 = vpop.f32.mrf.mxu2 }
 0x245   : > { %4377 = vlog2.f32 %v3315_v18  ;;  %v2649_v58 = vsub.f32 %v2473_v8, %v2617_v26  ;;  %v2235_v44 = vadd.f32 %v5938_v53, %v2182_v62  ;;  %v3285_v7 = vmin.f32 %v2913_v54, %v6826_v4 }
 0x246   : > { %v6889_v55 = vmul.f32 %v3667_v14, %v3539_v2  ;;  %v2930_v17 = vsub.f32 1.5, %v2929_v6  ;;  %v2377_v1 = vadd.f32 %v8066_v30, %v2180_v5  ;;  %v2099_v23 = vadd.f32 %v2098_v9, %v2002_v27  ;;  %v1743_v2 = vpop.f32.mrf.mxu0 }
 0x247   : > { %v2809_v45 = vadd.f32 %v6727_v21, %v2649_v58  ;;  %v2443_v22 = vmul.f32 %v2235_v44, %v2235_v44  ;;  %v2587_v34 = vmul.f32 %v5854_v52, %v2235_v44  ;;  %v3317_v18 = vsub.f32 %v6770_v16, %v3285_v7 }
 0x248   : > { %v3349_v25 = vadd.f32 %v3285_v7, %v6770_v16  ;;  %v2931_v39 = vmul.f32 %v4374_v48, %v2930_v17  ;;  %v3639_v47 = vsub.f32 2.0, %v6871_v61  ;;  %v1859_v5 = vadd.f32 %v1858_v36, %v1739_v0  ;;  %v8067_v48 = vld [vmem:[#allocation11_spill] sm:$0xff]  ;;  %v8068_v36 = vld [vmem:[#allocation25_spill] sm:$0xff]  ;;  %v1864_v58 = vpop.f32.mrf.mxu1 }
 0x249   : > { %v6898_v14 = vmax.f32 %v2809_v45, 0.0  ;;  %v2475_v4 = vmul.f32 %v2443_v22, %v5756_v11  ;;  %v2619_v12 = vmul.f32 %v2587_v34, %v6857_v28  ;;  %v3541_v8 = vmul.f32 0.5, %v3317_v18  ;;  %v2102_v11 = vpop.f32.mrf.mxu3 }
 0x24a   : > { %v4376_v21 = vpop.eup %4375  ;;  %4379 = vlog2.f32 %v3349_v25  ;;  %v2932_v52 = vmul.f32 %v2931_v39, %v6834_v13  ;;  %v6903_v9 = vmax.f32 %v2377_v1, 1e-15  ;;  %v2379_v61 = vadd.f32 %v8067_v48, %v2182_v62 }
 0x24b   : > { %v4378_v26 = vpop.eup %4377  ;;  %v3381_v16 = vmul.f32 0.6931472, %v4376_v21  ;;  %4381 = vlog2.f32 %v3317_v18  ;;  %v6906_v27 = vmul.f32 2.0, %v2099_v23  ;;  %v6909_v28 = vmul.f32 %v6852_v29, %v3541_v8 }
 0x24c   : > { %v3445_v49 = vmul.f32 0.6931472, %v4378_v26  ;;  %v2934_v0 = vsel %vm2933_vm5, %v6834_v13, %v2932_v52  ;;  %4383 = vrsqrt.f32 %v6898_v14  ;;  %v2779_v6 = vmul.f32 %v8068_v36, %v5938_v53  ;;  %v2009_v8 = vpop.f32.mrf.mxu2 }
 0x24d   : > { %v6919_v62 = vmul.f32 %v6159_v35, %v5938_v53  ;;  %v2937_v29 = vsel %vm2935_vm6, %v2936_v19, %v2934_v0  ;;  %v2651_v54 = vsub.f32 %v2475_v4, %v2619_v12  ;;  %4385 = vrcp.f32 %v6903_v9 }
 0x24e   : > { %v3507_v44 = vsub.f32 %v3381_v16, %v3445_v49  ;;  %v3287_v7 = vmin.f32 %v2937_v29, %v6855_v42  ;;  %v1744_v17 = vadd.f32 %v1743_v2, %v6256_v56  ;;  %v3671_v30 = vmul.f32 %v6846_v59, %v3639_v47  ;;  %v8069_v59 = vld [vmem:[#allocation76_spill] sm:$0xff] }
 0x24f   : > { %v2811_v1 = vadd.f32 %v2779_v6, %v2651_v54  ;;  %v2184_v35 = vsub.f32 1.0, %v6906_v27  ;;  %v2006_v45 = vadd.f32 %v2005_v38, %v1859_v5  ;;  %v6933_v34 = vmax.f32 %v2379_v61, 1e-15 }
 0x250   : > { %v4380_v22 = vpop.eup %4379  ;;  %3731 = vst [vmem:[%s6185_s12 + $0x8] sm:$0xff] %v3507_v44  ;;  %v3319_v13 = vsub.f32 %v6823_v41, %v3287_v7  ;;  %v3351_v19 = vadd.f32 %v3287_v7, %v6823_v41  ;;  %v1865_v23 = vadd.f32 %v1864_v58, %v1744_v17  ;;  %v6941_v41 = vmul.f32 %v6214_v57, %v5938_v53 }
 0x251   : > { %v4382_v42 = vpop.eup %4381  ;;  %v3385_v18 = vmul.f32 0.6931472, %v4380_v22  ;;  %v6935_v25 = vmax.f32 %v2811_v1, 0.0  ;;  %v2237_v56 = vadd.f32 %v5938_v53, %v2184_v35  ;;  %v2381_v39 = vadd.f32 %v8069_v59, %v2184_v35  ;;  %v2106_v2 = vpop.f32.mrf.mxu3 }
 0x252   : > { %v4384_v47 = vpop.eup %4383  ;;  %v3449_v4 = vmul.f32 0.6931472, %v4382_v42  ;;  %4387 = vlog2.f32 %v3351_v19  ;;  %v3543_v12 = vmul.f32 0.5, %v3319_v13  ;;  %v2103_v5 = vadd.f32 %v2102_v11, %v2006_v45 }
 0x253   : > { %v6945_v38 = vmul.f32 %v6312_v15, %v5938_v53  ;;  %4389 = vlog2.f32 %v3319_v13  ;;  %v2951_v21 = vmul.f32 %v4384_v47, %v6898_v14  ;;  %v4386_v52 = vpop.eup %4385  ;;  %v6950_v26 = vmul.f32 %v6353_v33, %v5938_v53  ;;  %v1748_v33 = vpop.f32.mrf.mxu0 }
 0x254   : > { %v3509_v16 = vsub.f32 %v3385_v18, %v3449_v4  ;;  %v6952_v48 = vmul.f32 %v3671_v30, %v3543_v12  ;;  %4391 = vrsqrt.f32 %v6935_v25  ;;  %v3257_v61 = vmul.f32 0.9999999, %v6903_v9 }
 0x255   : > { %v2952_v57 = vmul.f32 %v4384_v47, %v2951_v21  ;;  %4393 = vrcp.f32 %v6933_v34  ;;  %v2445_v15 = vmul.f32 %v2237_v56, %v2237_v56  ;;  %v6958_v11 = vmax.f32 %v2381_v39, 1e-15 }
 0x256   : > { %3733 = vst [vmem:[%s6185_s12 + $0x18] sm:$0xff] %v3509_v16  ;;  %v2589_v49 = vmul.f32 %v5866_v20, %v2237_v56  ;;  %v2154_v0 = vmul.f32 2.0, %v2103_v5  ;;  %v2010_v36 = vadd.f32 %v2009_v8, %v1865_v23  ;;  %vm2957_vm7 = vcmp.eq.f32.partialorder %v6898_v14, inf  ;;  %v1870_v23 = vpop.f32.mrf.mxu1  ;;  %v8070_v56 = vld [vmem:[#allocation82_spill] sm:$0xff] }
 0x257   : > { %v2953_v6 = vmul.f32 0.5, %v2952_v57  ;;  %v3609_v29 = vmul.f32 %v4386_v52, %v6903_v9  ;;  %v2477_v54 = vmul.f32 %v2445_v15, %v5772_v10  ;;  %vm2959_vm8 = vcmp.eq.f32.partialorder %v6898_v14, 0.0 }
 0x258   : > { %v4388_v58 = vpop.eup %4387  ;;  %v2621_v44 = vmul.f32 %v2589_v49, %v6906_v27  ;;  %v2186_v7 = vsub.f32 1.0, %v2154_v0  ;;  %v2107_v17 = vadd.f32 %v2106_v2, %v2010_v36  ;;  %v2960_v35 = vand.u32 2147483648, %v6898_v14  ;;  %v8071_v2 = vld [vmem:[#allocation12_spill] sm:$0xff]  ;;  %v2013_v36 = vpop.f32.mrf.mxu2 }
 0x259   : > { %v4390_v30 = vpop.eup %4389  ;;  %v3389_v1 = vmul.f32 0.6931472, %v4388_v58  ;;  %v2954_v20 = vsub.f32 1.5, %v2953_v6  ;;  %v1749_v45 = vadd.f32 %v1748_v33, %v6309_v50  ;;  %4395 = vrcp.f32 %v6958_v11 }
 0x25a   : > { %v4392_v22 = vpop.eup %4391  ;;  %v3453_v13 = vmul.f32 0.6931472, %v4390_v30  ;;  %v2653_v19 = vsub.f32 %v2477_v54, %v2621_v44  ;;  %v2239_v10 = vadd.f32 %v5938_v53, %v2186_v7  ;;  %v2383_v59 = vadd.f32 %v8070_v56, %v2186_v7 }
 0x25b   : > { %v6970_v42 = vpop.eup %4393  ;;  %v2955_v27 = vmul.f32 %v4384_v47, %v2954_v20  ;;  %v2975_v18 = vmul.f32 %v4392_v22, %v6935_v25  ;;  %v6974_v39 = vmul.f32 2.0, %v2107_v17  ;;  %v3641_v50 = vsub.f32 2.0, %v3609_v29 }
 0x25c   : > { %v3511_v4 = vsub.f32 %v3389_v1, %v3453_v13  ;;  %v2813_v12 = vadd.f32 %v6919_v62, %v2653_v19  ;;  %v2447_v5 = vmul.f32 %v2239_v10, %v2239_v10  ;;  %v2591_v16 = vmul.f32 %v5892_v43, %v2239_v10  ;;  %v1753_v19 = vpop.f32.mrf.mxu0  ;;  %v2110_v10 = vpop.f32.mrf.mxu3 }
 0x25d   : > { %v2956_v21 = vmul.f32 %v2955_v27, %v6898_v14  ;;  %v2976_v8 = vmul.f32 %v4392_v22, %v2975_v18  ;;  %v1871_v57 = vadd.f32 %v1870_v23, %v1749_v45  ;;  %v3611_v47 = vmul.f32 %v6970_v42, %v6933_v34  ;;  %v8072_v18 = vld [vmem:[#allocation47_spill] sm:$0xff] }
 0x25e   : > { %3735 = vst [vmem:[%s6185_s12 + $0x28] sm:$0xff] %v3511_v4  ;;  %v6982_v15 = vmax.f32 %v2813_v12, 0.0  ;;  %v2479_v49 = vmul.f32 %v2447_v5, %v8071_v2  ;;  %v2188_v33 = vsub.f32 1.0, %v6974_v39  ;;  %v6989_v29 = vmax.f32 %v2383_v59, 1e-15  ;;  %v1876_v59 = vpop.f32.mrf.mxu1 }
 0x25f   : > { %v2958_v62 = vsel %vm2957_vm7, %v6898_v14, %v2956_v21  ;;  %v2977_v6 = vmul.f32 0.5, %v2976_v8  ;;  %v2623_v43 = vmul.f32 %v2591_v16, %v2154_v0  ;;  %v6991_v54 = vpop.eup %4395  ;;  %v3673_v44 = vmul.f32 %v4386_v52, %v3641_v50 }
 0x260   : > { %v2961_v58 = vsel %vm2959_vm8, %v2960_v35, %v2958_v62  ;;  %v3259_v7 = vmul.f32 0.9999999, %v6933_v34  ;;  %4397 = vrsqrt.f32 %v6982_v15  ;;  %vm2981_vm9 = vcmp.eq.f32.partialorder %v6935_v25, inf  ;;  %v2017_v62 = vpop.f32.mrf.mxu2 }
 0x261   : > { %v3289_v17 = vmin.f32 %v2961_v58, %v3257_v61  ;;  %v2978_v30 = vsub.f32 1.5, %v2977_v6  ;;  %v2014_v1 = vadd.f32 %v2013_v36, %v1871_v57  ;;  %v2984_v20 = vand.u32 2147483648, %v6935_v25 }
 0x262   : > { %v3643_v45 = vsub.f32 2.0, %v3611_v47  ;;  %v2655_v13 = vsub.f32 %v2479_v49, %v2623_v43  ;;  %v2241_v0 = vadd.f32 %v5938_v53, %v2188_v33  ;;  %4399 = vrcp.f32 %v6989_v29  ;;  %v8074_v49 = vld [vmem:[#allocation34_spill] sm:$0xff] }
 0x263   : > { %v3321_v14 = vsub.f32 %v6903_v9, %v3289_v17  ;;  %v3353_v52 = vadd.f32 %v3289_v17, %v6903_v9  ;;  %v2979_v35 = vmul.f32 %v4392_v22, %v2978_v30  ;;  %v7005_v61 = vmul.f32 %v6991_v54, %v6958_v11  ;;  %v8073_v22 = vld [vmem:[#allocation23_spill] sm:$0xff] }
 0x264   : > { %v2815_v23 = vadd.f32 %v6941_v41, %v2655_v13  ;;  %v2449_v27 = vmul.f32 %v2241_v0, %v2241_v0  ;;  %v2593_v56 = vmul.f32 %v8072_v18, %v2241_v0  ;;  %v2111_v12 = vadd.f32 %v2110_v10, %v2014_v1  ;;  %v8075_v0 = vld [vmem:[#allocation85_spill] sm:$0xff] }
 0x265   : > { %4401 = vlog2.f32 %v3353_v52  ;;  %v3545_v4 = vmul.f32 0.5, %v3321_v14  ;;  %v2980_v50 = vmul.f32 %v2979_v35, %v6935_v25  ;;  %vm2983_vm10 = vcmp.eq.f32.partialorder %v6935_v25, 0.0  ;;  %v1758_v35 = vpop.f32.mrf.mxu0 }
 0x266   : > { %v4398_v5 = vpop.eup %4397  ;;  %4403 = vlog2.f32 %v3321_v14  ;;  %v7010_v9 = vmax.f32 %v2815_v23, 0.0  ;;  %v2481_v21 = vmul.f32 %v2449_v27, %v8073_v22  ;;  %v2625_v8 = vmul.f32 %v2593_v56, %v6974_v39 }
 0x267   : > { %v7014_v16 = vmul.f32 %v3673_v44, %v3545_v4  ;;  %v2982_v41 = vsel %vm2981_vm9, %v6935_v25, %v2980_v50  ;;  %v2999_v57 = vmul.f32 %v4398_v5, %v6982_v15  ;;  %v7022_v2 = vmul.f32 0.9999999, %v6958_v11  ;;  %v1882_v4 = vpop.f32.mrf.mxu1 }
 0x268   : > { %v2985_v47 = vsel %vm2983_vm10, %v2984_v20, %v2982_v41  ;;  %4405 = vrsqrt.f32 %v7010_v9  ;;  %v1754_v36 = vadd.f32 %v1753_v19, %v8074_v49  ;;  %v7026_v39 = vpop.eup %4399  ;;  %v3675_v43 = vmul.f32 %v6970_v42, %v3643_v45 }
 0x269   : > { %v3291_v6 = vmin.f32 %v2985_v47, %v3259_v7  ;;  %v3000_v58 = vmul.f32 %v4398_v5, %v2999_v57  ;;  %v7030_v44 = vmul.f32 0.9999999, %v6989_v29  ;;  %vm3005_vm11 = vcmp.eq.f32.partialorder %v6982_v15, inf }
 0x26a   : > { %v3645_v25 = vsub.f32 2.0, %v7005_v61  ;;  %v2657_v17 = vsub.f32 %v2481_v21, %v2625_v8  ;;  %v7034_v30 = vmul.f32 2.0, %v2111_v12  ;;  %v2385_v42 = vadd.f32 %v8075_v0, %v2188_v33  ;;  %v2114_v61 = vpop.f32.mrf.mxu3 }
 0x26b   : > { %v4402_v1 = vpop.eup %4401  ;;  %v3323_v20 = vsub.f32 %v6933_v34, %v3291_v6  ;;  %v3355_v13 = vadd.f32 %v3291_v6, %v6933_v34  ;;  %v3001_v7 = vmul.f32 0.5, %v3000_v58  ;;  %v7041_v10 = vmul.f32 %v7026_v39, %v6989_v29 }
 0x26c   : > { %v4404_v45 = vpop.eup %4403  ;;  %v3393_v19 = vmul.f32 0.6931472, %v4402_v1  ;;  %v2817_v14 = vadd.f32 %v6945_v38, %v2657_v17  ;;  %v2190_v52 = vsub.f32 1.0, %v7034_v30  ;;  %v1877_v56 = vadd.f32 %v1876_v59, %v1754_v36  ;;  %v8077_v36 = vld [vmem:[#allocation55_spill] sm:$0xff] }
 0x26d   : > { %v3457_v23 = vmul.f32 0.6931472, %v4404_v45  ;;  %4407 = vlog2.f32 %v3355_v13  ;;  %v3547_v27 = vmul.f32 0.5, %v3323_v20  ;;  %v3002_v18 = vsub.f32 1.5, %v3001_v7  ;;  %v8078_v1 = vld [vmem:[#allocation39_spill] sm:$0xff] }
 0x26e   : > { %v4406_v34 = vpop.eup %4405  ;;  %4409 = vlog2.f32 %v3323_v20  ;;  %v7048_v33 = vmax.f32 %v2817_v14, 0.0  ;;  %v2243_v38 = vadd.f32 %v5938_v53, %v2190_v52  ;;  %vm3007_vm12 = vcmp.eq.f32.partialorder %v6982_v15, 0.0 }
 0x26f   : > { %v3513_v50 = vsub.f32 %v3393_v19, %v3457_v23  ;;  %v7054_v12 = vmul.f32 %v3675_v43, %v3547_v27  ;;  %v3003_v22 = vmul.f32 %v4398_v5, %v3002_v18  ;;  %v3023_v21 = vmul.f32 %v4406_v34, %v7010_v9  ;;  %v2021_v43 = vpop.f32.mrf.mxu2 }
 0x270   : > { %v3008_v8 = vand.u32 2147483648, %v6982_v15  ;;  %v3677_v41 = vmul.f32 %v6991_v54, %v3645_v25  ;;  %4411 = vrsqrt.f32 %v7048_v33  ;;  %v3647_v47 = vsub.f32 2.0, %v7041_v10 }
 0x271   : > { %3737 = vst [vmem:[%s6185_s12 + $0x38] sm:$0xff] %v3513_v50  ;;  %v3004_v59 = vmul.f32 %v3003_v22, %v6982_v15  ;;  %v3024_v57 = vmul.f32 %v4406_v34, %v3023_v21  ;;  %v7065_v49 = vmax.f32 %v2385_v42, 1e-15  ;;  %vm3029_vm13 = vcmp.eq.f32.partialorder %v7010_v9, inf  ;;  %v8079_v42 = vld [vmem:[#allocation19_spill] sm:$0xff] }
 0x272   : > { %v2451_v5 = vmul.f32 %v2243_v38, %v2243_v38  ;;  %v2595_v6 = vmul.f32 %v8077_v36, %v2243_v38  ;;  %v2018_v54 = vadd.f32 %v2017_v62, %v1877_v56  ;;  %vm3031_vm14 = vcmp.eq.f32.partialorder %v7010_v9, 0.0  ;;  %v1763_v38 = vpop.f32.mrf.mxu0  ;;  %v1888_v36 = vpop.f32.mrf.mxu1 }
 0x273   : > { %v4408_v58 = vpop.eup %4407  ;;  %v3006_v25 = vsel %vm3005_vm11, %v6982_v15, %v3004_v59  ;;  %v3025_v17 = vmul.f32 0.5, %v3024_v57  ;;  %v1759_v20 = vadd.f32 %v1758_v35, %v8078_v1  ;;  %v3032_v23 = vand.u32 2147483648, %v7010_v9  ;;  %v2118_v15 = vpop.f32.mrf.mxu3 }
 0x274   : > { %v4410_v13 = vpop.eup %4409  ;;  %v3397_v7 = vmul.f32 0.6931472, %v4408_v58  ;;  %v3009_v0 = vsel %vm3007_vm12, %v3008_v8, %v3006_v25  ;;  %v2483_v45 = vmul.f32 %v2451_v5, %v8079_v42  ;;  %v2627_v62 = vmul.f32 %v2595_v6, %v7034_v30 }
 0x275   : > { %v3461_v19 = vmul.f32 0.6931472, %v4410_v13  ;;  %v3293_v10 = vmin.f32 %v3009_v0, %v7022_v2  ;;  %v3026_v14 = vsub.f32 1.5, %v3025_v17  ;;  %4413 = vrcp.f32 %v7065_v49  ;;  %v8081_v17 = vld [vmem:[#allocation44_spill] sm:$0xff] }
 0x276   : > { %v4412_v27 = vpop.eup %4411  ;;  %v2659_v35 = vsub.f32 %v2483_v45, %v2627_v62  ;;  %v2115_v18 = vadd.f32 %v2114_v61, %v2018_v54  ;;  %v1883_v56 = vadd.f32 %v1882_v4, %v1759_v20  ;;  %v3679_v6 = vmul.f32 %v7026_v39, %v3647_v47 }
 0x277   : > { %v3515_v50 = vsub.f32 %v3397_v7, %v3461_v19  ;;  %v3325_v22 = vsub.f32 %v6958_v11, %v3293_v10  ;;  %v3357_v21 = vadd.f32 %v3293_v10, %v6958_v11  ;;  %v3027_v8 = vmul.f32 %v4406_v34, %v3026_v14 }
 0x278   : > { %v3047_v2 = vmul.f32 %v4412_v27, %v7048_v33  ;;  %v2819_v59 = vadd.f32 %v6950_v26, %v2659_v35  ;;  %v7089_v57 = vmul.f32 2.0, %v2115_v18  ;;  %v2022_v5 = vadd.f32 %v2021_v43, %v1883_v56  ;;  %v8080_v43 = vld [vmem:[#allocation80_spill] sm:$0xff] }
 0x279   : > { %3739 = vst [vmem:[%s6185_s12 + $0x48] sm:$0xff] %v3515_v50  ;;  %4415 = vlog2.f32 %v3357_v21  ;;  %v3549_v61 = vmul.f32 0.5, %v3325_v22  ;;  %v3028_v4 = vmul.f32 %v3027_v8, %v7010_v9  ;;  %v2387_v25 = vadd.f32 %v8080_v43, %v2190_v52 }
 0x27a   : > { %4417 = vlog2.f32 %v3325_v22  ;;  %v3048_v54 = vmul.f32 %v4412_v27, %v3047_v2  ;;  %v7094_v58 = vmax.f32 %v2819_v59, 0.0  ;;  %v2192_v11 = vsub.f32 1.0, %v7089_v57  ;;  %v1768_v56 = vpop.f32.mrf.mxu0  ;;  %v8082_v2 = vld [vmem:[#allocation58_spill] sm:$0xff] }
 0x27b   : > { %v7097_v34 = vmul.f32 %v3677_v41, %v3549_v61  ;;  %v3030_v26 = vsel %vm3029_vm13, %v7010_v9, %v3028_v4  ;;  %v1764_v1 = vadd.f32 %v1763_v38, %v8081_v17  ;;  %v4414_v20 = vpop.eup %4413  ;;  %v2119_v13 = vadd.f32 %v2118_v15, %v2022_v5  ;;  %v2025_v41 = vpop.f32.mrf.mxu2  ;;  %v8083_v5 = vld [vmem:[#allocation71_spill] sm:$0xff] }
 0x27c   : > { %v3033_v39 = vsel %vm3031_vm14, %v3032_v23, %v3030_v26  ;;  %v3049_v47 = vmul.f32 0.5, %v3048_v54  ;;  %4419 = vrsqrt.f32 %v7094_v58  ;;  %vm3053_vm15 = vcmp.eq.f32.partialorder %v7048_v33, inf  ;;  %v2122_v15 = vpop.f32.mrf.mxu3  ;;  %v1894_v61 = vpop.f32.mrf.mxu1 }
 0x27d   : > { %v3295_v7 = vmin.f32 %v3033_v39, %v7030_v44  ;;  %v3265_v0 = vmul.f32 0.9999999, %v7065_v49  ;;  %v1889_v30 = vadd.f32 %v1888_v36, %v1764_v1  ;;  %vm3055_vm0 = vcmp.eq.f32.partialorder %v7048_v33, 0.0  ;;  %v8084_v1 = vld [vmem:[#allocation45_spill] sm:$0xff] }
 0x27e   : > { %v3050_v42 = vsub.f32 1.5, %v3049_v47  ;;  %v3056_v52 = vand.u32 2147483648, %v7048_v33  ;;  %v2245_v9 = vadd.f32 %v5938_v53, %v2192_v11  ;;  %v3617_v10 = vmul.f32 %v4414_v20, %v7065_v49 }
 0x27f   : > { %v4416_v45 = vpop.eup %4415  ;;  %v3327_v62 = vsub.f32 %v6989_v29, %v3295_v7  ;;  %v3359_v19 = vadd.f32 %v3295_v7, %v6989_v29  ;;  %v7118_v44 = vmax.f32 %v2387_v25, 1e-15  ;;  %v7120_v38 = vmul.f32 2.0, %v2119_v13 }
 0x280   : > { %v4418_v14 = vpop.eup %4417  ;;  %v3401_v23 = vmul.f32 0.6931472, %v4416_v45  ;;  %v3051_v35 = vmul.f32 %v4412_v27, %v3050_v42  ;;  %v2453_v18 = vmul.f32 %v2245_v9, %v2245_v9  ;;  %v2026_v21 = vadd.f32 %v2025_v41, %v1889_v30  ;;  %v8085_v41 = vld [vmem:[#allocation48_spill] sm:$0xff] }
 0x281   : > { %v3465_v50 = vmul.f32 0.6931472, %v4418_v14  ;;  %4421 = vlog2.f32 %v3359_v19  ;;  %v3551_v22 = vmul.f32 0.5, %v3327_v62  ;;  %v2597_v36 = vmul.f32 %v8083_v5, %v2245_v9 }
 0x282   : > { %v4420_v8 = vpop.eup %4419  ;;  %4423 = vlog2.f32 %v3327_v62  ;;  %v3052_v29 = vmul.f32 %v3051_v35, %v7048_v33  ;;  %v2485_v59 = vmul.f32 %v2453_v18, %v8082_v2  ;;  %v3649_v54 = vsub.f32 2.0, %v3617_v10  ;;  %v8086_v10 = vld [vmem:[#allocation87_spill] sm:$0xff]  ;;  %v1773_v5 = vpop.f32.mrf.mxu0 }
 0x283   : > { %v3517_v27 = vsub.f32 %v3401_v23, %v3465_v50  ;;  %v7125_v4 = vmul.f32 %v3679_v6, %v3551_v22  ;;  %v3071_v26 = vmul.f32 %v4420_v8, %v7094_v58  ;;  %4425 = vrcp.f32 %v7118_v44  ;;  %v2029_v45 = vpop.f32.mrf.mxu2  ;;  %v8087_v23 = vld [vmem:[#allocation18_spill] sm:$0xff] }
 0x284   : > { %v3054_v43 = vsel %vm3053_vm15, %v7048_v33, %v3052_v29  ;;  %v2629_v25 = vmul.f32 %v2597_v36, %v7089_v57  ;;  %v2194_v17 = vsub.f32 1.0, %v7120_v38  ;;  %v2789_v39 = vmul.f32 %v8084_v1, %v5938_v53  ;;  %v2126_v36 = vpop.f32.mrf.mxu3 }
 0x285   : > { %3741 = vst [vmem:[%s6185_s12 + $0x58] sm:$0xff] %v3517_v27  ;;  %v3057_v6 = vsel %vm3055_vm0, %v3056_v52, %v3054_v43  ;;  %v3072_v47 = vmul.f32 %v4420_v8, %v3071_v26  ;;  %v2123_v13 = vadd.f32 %v2122_v15, %v2026_v21  ;;  %v2791_v7 = vmul.f32 %v8085_v41, %v5938_v53 }
 0x286   : > { %v3297_v30 = vmin.f32 %v3057_v6, %v3265_v0  ;;  %v2661_v42 = vsub.f32 %v2485_v59, %v2629_v25  ;;  %v2247_v9 = vadd.f32 %v5938_v53, %v2194_v17  ;;  %v3681_v62 = vmul.f32 %v4414_v20, %v3649_v54  ;;  %v1900_v25 = vpop.f32.mrf.mxu1 }
 0x287   : > { %v4422_v57 = vpop.eup %4421  ;;  %v3073_v19 = vmul.f32 0.5, %v3072_v47  ;;  %v2389_v14 = vadd.f32 %v8086_v10, %v2192_v11  ;;  %v1769_v35 = vadd.f32 %v1768_v56, %v8087_v23  ;;  %v7146_v29 = vmul.f32 2.0, %v2123_v13  ;;  %v8088_v11 = vld [vmem:[#allocation67_spill] sm:$0xff]  ;;  %v8089_v47 = vld [vmem:[#allocation24_spill] sm:$0xff] }
 0x288   : > { %v4424_v18 = vpop.eup %4423  ;;  %v3405_v33 = vmul.f32 0.6931472, %v4422_v57  ;;  %v3329_v52 = vsub.f32 %v7065_v49, %v3297_v30  ;;  %v3361_v15 = vadd.f32 %v3297_v30, %v7065_v49  ;;  %v2821_v50 = vadd.f32 %v2789_v39, %v2661_v42 }
 0x289   : > { %v3469_v22 = vmul.f32 0.6931472, %v4424_v18  ;;  %v3074_v0 = vsub.f32 1.5, %v3073_v19  ;;  %v2455_v21 = vmul.f32 %v2247_v9, %v2247_v9  ;;  %v4426_v2 = vpop.eup %4425  ;;  %v2599_v56 = vmul.f32 %v8088_v11, %v2247_v9 }
 0x28a   : > { %4427 = vlog2.f32 %v3361_v15  ;;  %v3553_v20 = vmul.f32 0.5, %v3329_v52  ;;  %v7148_v59 = vmax.f32 %v2821_v50, 0.0  ;;  %v1895_v49 = vadd.f32 %v1894_v61, %v1769_v35 }
 0x28b   : > { %v3519_v27 = vsub.f32 %v3405_v33, %v3469_v22  ;;  %4429 = vlog2.f32 %v3329_v52  ;;  %v3075_v54 = vmul.f32 %v4420_v8, %v3074_v0  ;;  %vm3077_vm1 = vcmp.eq.f32.partialorder %v7094_v58, inf  ;;  %v8090_v8 = vld [vmem:[#allocation32_spill] sm:$0xff] }
 0x28c   : > { %v7151_v26 = vmul.f32 %v3681_v62, %v3553_v20  ;;  %v3080_v43 = vand.u32 2147483648, %v7094_v58  ;;  %4431 = vrsqrt.f32 %v7148_v59  ;;  %v3619_v39 = vmul.f32 %v4426_v2, %v7118_v44 }
 0x28d   : > { %3743 = vst [vmem:[%s6185_s12 + $0x68] sm:$0xff] %v3519_v27  ;;  %v3076_v1 = vmul.f32 %v3075_v54, %v7094_v58  ;;  %v7159_v6 = vmax.f32 %v2389_v14, 1e-15  ;;  %v2487_v13 = vmul.f32 %v2455_v21, %v8089_v47  ;;  %v2391_v61 = vadd.f32 %v8090_v8, %v2194_v17  ;;  %v1778_v54 = vpop.f32.mrf.mxu0 }
 0x28e   : > { %v2631_v41 = vmul.f32 %v2599_v56, %v7120_v38  ;;  %v2196_v30 = vsub.f32 1.0, %v7146_v29  ;;  %v1774_v42 = vadd.f32 %v1773_v5, %v6561_v63  ;;  %vm3079_vm2 = vcmp.eq.f32.partialorder %v7094_v58, 0.0  ;;  %v2033_v38 = vpop.f32.mrf.mxu2  ;;  %v8091_v5 = vld [vmem:[#allocation8_spill] sm:$0xff] }
 0x28f   : > { %v3078_v9 = vsel %vm3077_vm1, %v7094_v58, %v3076_v1  ;;  %v3267_v57 = vmul.f32 0.9999999, %v7118_v44  ;;  %v2030_v62 = vadd.f32 %v2029_v45, %v1895_v49  ;;  %v3651_v63 = vsub.f32 2.0, %v3619_v39 }
 0x290   : > { %v4428_v19 = vpop.eup %4427  ;;  %v3081_v10 = vsel %vm3079_vm2, %v3080_v43, %v3078_v9  ;;  %v2663_v14 = vsub.f32 %v2487_v13, %v2631_v41  ;;  %v2249_v17 = vadd.f32 %v5938_v53, %v2196_v30  ;;  %v1901_v23 = vadd.f32 %v1900_v25, %v1774_v42  ;;  %v2130_v43 = vpop.f32.mrf.mxu3 }
 0x291   : > { %v4430_v35 = vpop.eup %4429  ;;  %v3409_v18 = vmul.f32 0.6931472, %v4428_v19  ;;  %v3299_v33 = vmin.f32 %v3081_v10, %v3267_v57  ;;  %4433 = vrcp.f32 %v7159_v6  ;;  %v7173_v15 = vmax.f32 %v2391_v61, 1e-15  ;;  %v1906_v13 = vpop.f32.mrf.mxu1  ;;  %v8094_v19 = vld [vmem:[#allocation50_spill] sm:$0xff] }
 0x292   : > { %v4432_v52 = vpop.eup %4431  ;;  %v3473_v58 = vmul.f32 0.6931472, %v4430_v35  ;;  %v2823_v45 = vadd.f32 %v2791_v7, %v2663_v14  ;;  %v2457_v50 = vmul.f32 %v2249_v17, %v2249_v17  ;;  %v2127_v20 = vadd.f32 %v2126_v36, %v2030_v62  ;;  %v8092_v36 = vld [vmem:[#allocation16_spill] sm:$0xff]  ;;  %v8095_v14 = vld [vmem:[#allocation79_spill] sm:$0xff] }
 0x293   : > { %v3331_v22 = vsub.f32 %v7118_v44, %v3299_v33  ;;  %v3363_v0 = vadd.f32 %v3299_v33, %v7118_v44  ;;  %v3095_v21 = vmul.f32 %v4432_v52, %v7148_v59  ;;  %v2601_v27 = vmul.f32 %v8091_v5, %v2249_v17 }
 0x294   : > { %v3521_v11 = vsub.f32 %v3409_v18, %v3473_v58  ;;  %v7178_v56 = vmax.f32 %v2823_v45, 0.0  ;;  %v2034_v49 = vadd.f32 %v2033_v38, %v1901_v23  ;;  %v3683_v7 = vmul.f32 %v4426_v2, %v3651_v63  ;;  %v8093_v2 = vld [vmem:[#allocation31_spill] sm:$0xff] }
 0x295   : > { %4435 = vlog2.f32 %v3363_v0  ;;  %v3555_v25 = vmul.f32 0.5, %v3331_v22  ;;  %v3096_v1 = vmul.f32 %v4432_v52, %v3095_v21  ;;  %v7183_v39 = vmul.f32 %v7991_v46, %v5938_v53 }
 0x296   : > { %v7187_v44 = vmul.f32 %v7994_v24, %v5938_v53  ;;  %3745 = vst [vmem:[%s6185_s12 + $0x78] sm:$0xff] %v3521_v11  ;;  %4437 = vlog2.f32 %v3331_v22  ;;  %v2489_v47 = vmul.f32 %v2457_v50, %v8092_v36  ;;  %v1779_v42 = vadd.f32 %v1778_v54, %v8093_v2  ;;  %v2037_v58 = vpop.f32.mrf.mxu2  ;;  %v8096_v22 = vld [vmem:[#allocation21_spill] sm:$0xff] }
 0x297   : > { %v4434_v8 = vpop.eup %4433  ;;  %v7191_v61 = vmul.f32 %v3683_v7, %v3555_v25  ;;  %v3097_v41 = vmul.f32 0.5, %v3096_v1  ;;  %4439 = vrsqrt.f32 %v7178_v56  ;;  %v2633_v9 = vmul.f32 %v2601_v27, %v7146_v29 }
 0x298   : > { %4441 = vrcp.f32 %v7173_v15  ;;  %v7197_v57 = vmul.f32 2.0, %v2127_v20  ;;  %v2131_v62 = vadd.f32 %v2130_v43, %v2034_v49  ;;  %v2793_v10 = vmul.f32 %v8094_v19, %v5938_v53 }
 0x299   : > { %v7203_v17 = vmul.f32 %v8095_v14, %v5938_v53  ;;  %v3098_v23 = vsub.f32 1.5, %v3097_v41  ;;  %v1907_v38 = vadd.f32 %v1906_v13, %v1779_v42  ;;  %v3269_v35 = vmul.f32 0.9999999, %v7159_v6  ;;  %v8097_v42 = vld [vmem:[#allocation73_spill] sm:$0xff]  ;;  %v8098_v14 = vld [vmem:[#allocation28_spill] sm:$0xff] }
 0x29a   : > { %v3621_v18 = vmul.f32 %v4434_v8, %v7159_v6  ;;  %v2665_v33 = vsub.f32 %v2489_v47, %v2633_v9  ;;  %v2198_v63 = vsub.f32 1.0, %v7197_v57  ;;  %vm3101_vm3 = vcmp.eq.f32.partialorder %v7148_v59, inf  ;;  %v2134_v47 = vpop.f32.mrf.mxu3 }
 0x29b   : > { %v4436_v45 = vpop.eup %4435  ;;  %v3099_v50 = vmul.f32 %v4432_v52, %v3098_v23  ;;  %vm3103_vm4 = vcmp.eq.f32.partialorder %v7148_v59, 0.0  ;;  %v2393_v0 = vadd.f32 %v8096_v22, %v2196_v30  ;;  %v7214_v27 = vmul.f32 2.0, %v2131_v62 }
 0x29c   : > { %v4438_v21 = vpop.eup %4437  ;;  %v3413_v20 = vmul.f32 0.6931472, %v4436_v45  ;;  %v2825_v11 = vadd.f32 %v2793_v10, %v2665_v33  ;;  %v2251_v5 = vadd.f32 %v5938_v53, %v2198_v63  ;;  %v3104_v52 = vand.u32 2147483648, %v7148_v59 }
 0x29d   : > { %v4440_v54 = vpop.eup %4439  ;;  %v3477_v49 = vmul.f32 0.6931472, %v4438_v21  ;;  %v3100_v43 = vmul.f32 %v3099_v50, %v7148_v59  ;;  %v2038_v25 = vadd.f32 %v2037_v58, %v1907_v38  ;;  %v3653_v1 = vsub.f32 2.0, %v3621_v18 }
 0x29e   : > { %v4442_v7 = vpop.eup %4441  ;;  %v3119_v29 = vmul.f32 %v4440_v54, %v7178_v56  ;;  %v7219_v30 = vmax.f32 %v2825_v11, 0.0  ;;  %v2459_v36 = vmul.f32 %v2251_v5, %v2251_v5  ;;  %v7224_v2 = vmax.f32 %v2393_v0, 1e-15 }
 0x29f   : > { %v3523_v13 = vsub.f32 %v3413_v20, %v3477_v49  ;;  %v3102_v41 = vsel %vm3101_vm3, %v7148_v59, %v3100_v43  ;;  %v2603_v9 = vmul.f32 %v8097_v42, %v2251_v5  ;;  %v2200_v10 = vsub.f32 1.0, %v7214_v27  ;;  %v1783_v43 = vpop.f32.mrf.mxu0 }
 0x2a0   : > { %v3105_v62 = vsel %vm3103_vm4, %v3104_v52, %v3102_v41  ;;  %v3120_v19 = vmul.f32 %v4440_v54, %v3119_v29  ;;  %4443 = vrsqrt.f32 %v7219_v30  ;;  %v2797_v23 = vmul.f32 %v8098_v14, %v5938_v53 }
 0x2a1   : > { %3747 = vst [vmem:[%s6185_s12 + $0x88] sm:$0xff] %v3523_v13  ;;  %v3301_v38 = vmin.f32 %v3105_v62, %v3269_v35  ;;  %v3623_v18 = vmul.f32 %v4442_v7, %v7173_v15  ;;  %v2135_v33 = vadd.f32 %v2134_v47, %v2038_v25  ;;  %v3271_v45 = vmul.f32 0.9999999, %v7173_v15 }
 0x2a2   : > { %v3121_v58 = vmul.f32 0.5, %v3120_v19  ;;  %v2491_v50 = vmul.f32 %v2459_v36, %v7991_v46  ;;  %v2635_v59 = vmul.f32 %v2603_v9, %v7197_v57  ;;  %v3685_v21 = vmul.f32 %v4434_v8, %v3653_v1  ;;  %v8099_v36 = vld [vmem:[#allocation70_spill] sm:$0xff] }
 0x2a3   : > { %v3333_v22 = vsub.f32 %v7159_v6, %v3301_v38  ;;  %v3365_v0 = vadd.f32 %v3301_v38, %v7159_v6  ;;  %vm3125_vm5 = vcmp.eq.f32.partialorder %v7178_v56, inf  ;;  %4445 = vrcp.f32 %v7224_v2 }
 0x2a4   : > { %v3122_v20 = vsub.f32 1.5, %v3121_v58  ;;  %v2667_v35 = vsub.f32 %v2491_v50, %v2635_v59  ;;  %v2253_v11 = vadd.f32 %v5938_v53, %v2200_v10  ;;  %v3655_v49 = vsub.f32 2.0, %v3623_v18 }
 0x2a5   : > { %4447 = vlog2.f32 %v3365_v0  ;;  %v3557_v5 = vmul.f32 0.5, %v3333_v22  ;;  %v7243_v46 = vmul.f32 2.0, %v2135_v33  ;;  %v2395_v6 = vadd.f32 %v7183_v39, %v2198_v63 }
 0x2a6   : > { %v4444_v57 = vpop.eup %4443  ;;  %4449 = vlog2.f32 %v3333_v22  ;;  %v3123_v52 = vmul.f32 %v4440_v54, %v3122_v20  ;;  %v2827_v8 = vadd.f32 %v7203_v17, %v2667_v35  ;;  %v2461_v29 = vmul.f32 %v2253_v11, %v2253_v11  ;;  %v1912_v54 = vpop.f32.mrf.mxu1 }
 0x2a7   : > { %v7247_v25 = vmul.f32 %v3685_v21, %v3557_v5  ;;  %v3143_v1 = vmul.f32 %v4444_v57, %v7219_v30  ;;  %v2605_v47 = vmul.f32 %v8099_v36, %v2253_v11  ;;  %v3128_v41 = vand.u32 2147483648, %v7178_v56 }
 0x2a8   : > { %v3124_v13 = vmul.f32 %v3123_v52, %v7178_v56  ;;  %v7253_v42 = vmax.f32 %v2827_v8, 0.0  ;;  %v1784_v9 = vadd.f32 %v1783_v43, %v6655_v32  ;;  %v2493_v39 = vmul.f32 %v2461_v29, %v7994_v24 }
 0x2a9   : > { %v3144_v62 = vmul.f32 %v4444_v57, %v3143_v1  ;;  %v2637_v17 = vmul.f32 %v2605_v47, %v7214_v27  ;;  %v2202_v63 = vsub.f32 1.0, %v7243_v46  ;;  %v4446_v19 = vpop.eup %4445  ;;  %vm3127_vm6 = vcmp.eq.f32.partialorder %v7178_v56, 0.0  ;;  %v2138_v47 = vpop.f32.mrf.mxu3 }
 0x2aa   : > { %v3126_v14 = vsel %vm3125_vm5, %v7178_v56, %v3124_v13  ;;  %v3687_v38 = vmul.f32 %v4442_v7, %v3655_v49  ;;  %4451 = vrsqrt.f32 %v7253_v42  ;;  %v7264_v58 = vmax.f32 %v2395_v6, 1e-15 }
 0x2ab   : > { %v4448_v18 = vpop.eup %4447  ;;  %v3129_v32 = vsel %vm3127_vm6, %v3128_v41, %v3126_v14  ;;  %v3145_v33 = vmul.f32 0.5, %v3144_v62  ;;  %v1913_v24 = vadd.f32 %v1912_v54, %v1784_v9  ;;  %v2669_v22 = vsub.f32 %v2493_v39, %v2637_v17  ;;  %v8100_v39 = vld [vmem:[#allocation10_spill] sm:$0xff] }
 0x2ac   : > { %v4450_v50 = vpop.eup %4449  ;;  %v3417_v27 = vmul.f32 0.6931472, %v4448_v18  ;;  %v3303_v59 = vmin.f32 %v3129_v32, %v3271_v45  ;;  %v2255_v0 = vadd.f32 %v5938_v53, %v2202_v63  ;;  %vm3149_vm7 = vcmp.eq.f32.partialorder %v7219_v30, inf  ;;  %v2041_v45 = vpop.f32.mrf.mxu2 }
 0x2ad   : > { %v3481_v21 = vmul.f32 0.6931472, %v4450_v50  ;;  %v3146_v20 = vsub.f32 1.5, %v3145_v33  ;;  %v3625_v56 = vmul.f32 %v4446_v19, %v7224_v2  ;;  %v2397_v11 = vadd.f32 %v7187_v44, %v2200_v10  ;;  %v8101_v50 = vld [vmem:[#allocation59_spill] sm:$0xff] }
 0x2ae   : > { %v3335_v7 = vsub.f32 %v7173_v15, %v3303_v59  ;;  %v3367_v35 = vadd.f32 %v3303_v59, %v7173_v15  ;;  %v2829_v5 = vadd.f32 %v2797_v23, %v2669_v22  ;;  %v3152_v52 = vand.u32 2147483648, %v7219_v30 }
 0x2af   : > { %v3525_v49 = vsub.f32 %v3417_v27, %v3481_v21  ;;  %v3147_v43 = vmul.f32 %v4444_v57, %v3146_v20  ;;  %4453 = vrcp.f32 %v7264_v58  ;;  %v2463_v29 = vmul.f32 %v2255_v0, %v2255_v0 }
 0x2b0   : > { %v4452_v6 = vpop.eup %4451  ;;  %4455 = vlog2.f32 %v3367_v35  ;;  %v3559_v8 = vmul.f32 0.5, %v3335_v7  ;;  %v7276_v1 = vmax.f32 %v2829_v5, 0.0  ;;  %v2042_v10 = vadd.f32 %v2041_v45, %v1913_v24 }
 0x2b1   : > { %3749 = vst [vmem:[%s6185_s12 + $0x98] sm:$0xff] %v3525_v49  ;;  %4457 = vlog2.f32 %v3335_v7  ;;  %v3148_v15 = vmul.f32 %v3147_v43, %v7219_v30  ;;  %v3167_v44 = vmul.f32 %v4452_v6, %v7253_v42  ;;  %v3657_v57 = vsub.f32 2.0, %v3625_v56 }
 0x2b2   : > { %v7281_v23 = vmul.f32 %v3687_v38, %v3559_v8  ;;  %v7283_v36 = vmax.f32 %v2397_v11, 1e-15  ;;  %4459 = vrsqrt.f32 %v7276_v1  ;;  %vm3151_vm8 = vcmp.eq.f32.partialorder %v7219_v30, 0.0 }
 0x2b3   : > { %v3150_v13 = vsel %vm3149_vm7, %v7219_v30, %v3148_v15  ;;  %v3273_v41 = vmul.f32 0.9999999, %v7224_v2  ;;  %v3168_v9 = vmul.f32 %v4452_v6, %v3167_v44  ;;  %v2495_v62 = vmul.f32 %v2463_v29, %v8045_v37 }
 0x2b4   : > { %v3153_v54 = vsel %vm3151_vm8, %v3152_v52, %v3150_v13  ;;  %v2607_v17 = vmul.f32 %v8100_v39, %v2255_v0  ;;  %v2367_v38 = vmul.f32 %v8045_v37, %v5938_v53  ;;  %v2139_v33 = vadd.f32 %v2138_v47, %v2042_v10 }
 0x2b5   : > { %v4454_v14 = vpop.eup %4453  ;;  %v3305_v18 = vmin.f32 %v3153_v54, %v3273_v41  ;;  %v3169_v32 = vmul.f32 0.5, %v3168_v9  ;;  %v2799_v27 = vmul.f32 %v8101_v50, %v5938_v53  ;;  %v3689_v30 = vmul.f32 %v4446_v19, %v3657_v57 }
 0x2b6   : > { %v4456_v24 = vpop.eup %4455  ;;  %4461 = vrcp.f32 %v7283_v36  ;;  %v2639_v59 = vmul.f32 %v2607_v17, %v7243_v46  ;;  %v3627_v35 = vmul.f32 %v4454_v14, %v7264_v58  ;;  %v7302_v5 = vmul.f32 2.0, %v2139_v33 }
 0x2b7   : > { %v4458_v22 = vpop.eup %4457  ;;  %v3421_v21 = vmul.f32 0.6931472, %v4456_v24  ;;  %v3337_v0 = vsub.f32 %v7224_v2, %v3305_v18  ;;  %v3369_v20 = vadd.f32 %v3305_v18, %v7224_v2  ;;  %v3170_v56 = vsub.f32 1.5, %v3169_v32 }
 0x2b8   : > { %v4460_v37 = vpop.eup %4459  ;;  %v3485_v7 = vmul.f32 0.6931472, %v4458_v22  ;;  %v2671_v11 = vsub.f32 %v2495_v62, %v2639_v59  ;;  %v2204_v8 = vsub.f32 1.0, %v7302_v5  ;;  %vm3173_vm9 = vcmp.eq.f32.partialorder %v7253_v42, inf }
 0x2b9   : > { %4463 = vlog2.f32 %v3369_v20  ;;  %v3561_v19 = vmul.f32 0.5, %v3337_v0  ;;  %v3171_v45 = vmul.f32 %v4452_v6, %v3170_v56  ;;  %v3191_v49 = vmul.f32 %v4460_v37, %v7276_v1 }
 0x2ba   : > { %v3527_v43 = vsub.f32 %v3421_v21, %v3485_v7  ;;  %4465 = vlog2.f32 %v3337_v0  ;;  %v2831_v52 = vadd.f32 %v2799_v27, %v2671_v11  ;;  %v3176_v10 = vand.u32 2147483648, %v7253_v42 }
 0x2bb   : > { %v7306_v2 = vmul.f32 %v3689_v30, %v3561_v19  ;;  %v3172_v29 = vmul.f32 %v3171_v45, %v7253_v42  ;;  %v3192_v15 = vmul.f32 %v4460_v37, %v3191_v49  ;;  %v3659_v57 = vsub.f32 2.0, %v3627_v35  ;;  %v8102_v30 = vld [vmem:[#allocation17_spill] sm:$0xff] }
 0x2bc   : > { %v4462_v44 = vpop.eup %4461  ;;  %3751 = vst [vmem:[%s6185_s12 + $0xa8] sm:$0xff] %v3527_v43  ;;  %v7312_v6 = vmax.f32 %v2831_v52, 0.0  ;;  %v2257_v47 = vadd.f32 %v5938_v53, %v2204_v8  ;;  %vm3175_vm10 = vcmp.eq.f32.partialorder %v7253_v42, 0.0  ;;  %v3275_v41 = vmul.f32 0.9999999, %v7264_v58 }
 0x2bd   : > { %v3174_v13 = vsel %vm3173_vm9, %v7253_v42, %v3172_v29  ;;  %v3193_v9 = vmul.f32 0.5, %v3192_v15  ;;  %v2399_v62 = vadd.f32 %v2367_v38, %v2202_v63  ;;  %v2801_v17 = vmul.f32 %v6703_v60, %v5938_v53 }
 0x2be   : > { %v3177_v54 = vsel %vm3175_vm10, %v3176_v10, %v3174_v13  ;;  %4467 = vrsqrt.f32 %v7312_v6  ;;  %v3277_v33 = vmul.f32 0.9999999, %v7283_v36  ;;  %v3691_v42 = vmul.f32 %v4454_v14, %v3659_v57 }
 0x2bf   : > { %v4464_v39 = vpop.eup %4463  ;;  %v3307_v18 = vmin.f32 %v3177_v54, %v3275_v41  ;;  %v3194_v32 = vsub.f32 1.5, %v3193_v9  ;;  %v2465_v27 = vmul.f32 %v2257_v47, %v2257_v47  ;;  %v2609_v59 = vmul.f32 %v8102_v30, %v2257_v47 }
 0x2c0   : > { %v4466_v24 = vpop.eup %4465  ;;  %v3425_v50 = vmul.f32 0.6931472, %v4464_v39  ;;  %v3629_v21 = vmul.f32 %v4462_v44, %v7283_v36  ;;  %v7330_v60 = vmax.f32 %v2399_v62, 1e-15  ;;  %vm3197_vm11 = vcmp.eq.f32.partialorder %v7276_v1, inf }
 0x2c1   : > { %v3489_v22 = vmul.f32 0.6931472, %v4466_v24  ;;  %v3339_v46 = vsub.f32 %v7264_v58, %v3307_v18  ;;  %v3371_v63 = vadd.f32 %v3307_v18, %v7264_v58  ;;  %v3195_v38 = vmul.f32 %v4460_v37, %v3194_v32 }
 0x2c2   : > { %v2497_v0 = vmul.f32 %v2465_v27, %v8000_v40  ;;  %v2641_v20 = vmul.f32 %v2609_v59, %v7302_v5  ;;  %v3200_v58 = vand.u32 2147483648, %v7276_v1  ;;  %vm3199_vm12 = vcmp.eq.f32.partialorder %v7276_v1, 0.0 }
 0x2c3   : > { %v3529_v56 = vsub.f32 %v3425_v50, %v3489_v22  ;;  %4469 = vlog2.f32 %v3371_v63  ;;  %v3563_v14 = vmul.f32 0.5, %v3339_v46  ;;  %v3196_v7 = vmul.f32 %v3195_v38, %v7276_v1 }
 0x2c4   : > { %v4468_v35 = vpop.eup %4467  ;;  %4471 = vlog2.f32 %v3339_v46  ;;  %v2673_v37 = vsub.f32 %v2497_v0, %v2641_v20  ;;  %v3661_v43 = vsub.f32 2.0, %v3629_v21  ;;  %v2369_v10 = vmul.f32 %v8000_v40, %v5938_v53 }
 0x2c5   : > { %3753 = vst [vmem:[%s6185_s12 + $0xb8] sm:$0xff] %v3529_v56  ;;  %v7338_v11 = vmul.f32 %v3691_v42, %v3563_v14  ;;  %v3198_v19 = vsel %vm3197_vm11, %v7276_v1, %v3196_v7  ;;  %v3215_v45 = vmul.f32 %v4468_v35, %v7312_v6  ;;  %4473 = vrcp.f32 %v7330_v60 }
 0x2c6   : > { %v3201_v49 = vsel %vm3199_vm12, %v3200_v58, %v3198_v19  ;;  %v2833_v52 = vadd.f32 %v2801_v17, %v2673_v37  ;;  %v3693_v62 = vmul.f32 %v4462_v44, %v3661_v43  ;;  %v2401_v39 = vadd.f32 %v2369_v10, %v2204_v8 }
 0x2c7   : > { %v3309_v29 = vmin.f32 %v3201_v49, %v3277_v33  ;;  %v3216_v15 = vmul.f32 %v4468_v35, %v3215_v45  ;;  %vm3221_vm13 = vcmp.eq.f32.partialorder %v7312_v6, inf  ;;  %v3224_v8 = vand.u32 2147483648, %v7312_v6 }
 0x2c8   : > { %v7346_v57 = vmax.f32 %v2833_v52, 0.0  ;;  %v2433_v24 = vmax.f32 %v2401_v39, 1e-15  ;;  %vm3223_vm14 = vcmp.eq.f32.partialorder %v7312_v6, 0.0  ;;  %v3279_v30 = vmul.f32 0.9999999, %v7330_v60 }
 0x2c9   : > { %v4470_v47 = vpop.eup %4469  ;;  %v3341_v13 = vsub.f32 %v7283_v36, %v3309_v29  ;;  %v3373_v41 = vadd.f32 %v3309_v29, %v7283_v36  ;;  %v3217_v1 = vmul.f32 0.5, %v3216_v15 }
 0x2ca   : > { %v4472_v9 = vpop.eup %4471  ;;  %v3429_v54 = vmul.f32 0.6931472, %v4470_v47  ;;  %4475 = vrsqrt.f32 %v7346_v57  ;;  %vm3245_vm15 = vcmp.eq.f32.partialorder %v7346_v57, inf  ;;  %v3248_v29 = vand.u32 2147483648, %v7346_v57 }
 0x2cb   : > { %v3493_v17 = vmul.f32 0.6931472, %v4472_v9  ;;  %4477 = vlog2.f32 %v3373_v41  ;;  %v3565_v53 = vmul.f32 0.5, %v3341_v13  ;;  %v3218_v40 = vsub.f32 1.5, %v3217_v1  ;;  %v4474_v18 = vpop.eup %4473 }
 0x2cc   : > { %4479 = vlog2.f32 %v3341_v13  ;;  %v3631_v44 = vmul.f32 %v4474_v18, %v7330_v60  ;;  %vm3247_vm0 = vcmp.eq.f32.partialorder %v7346_v57, 0.0  ;;  %v3281_v10 = vmul.f32 0.9999999, %v2433_v24 }
 0x2cd   : > { %v3531_v32 = vsub.f32 %v3429_v54, %v3493_v17  ;;  %v7353_v33 = vmul.f32 %v3693_v62, %v3565_v53  ;;  %v3219_v36 = vmul.f32 %v4468_v35, %v3218_v40  ;;  %4481 = vrcp.f32 %v2433_v24 }
 0x2ce   : > { %v3663_v0 = vsub.f32 2.0, %v3631_v44 }
 0x2cf   : > { %3755 = vst [vmem:[%s6185_s12 + $0xc8] sm:$0xff] %v3531_v32  ;;  %v3220_v50 = vmul.f32 %v3219_v36, %v7312_v6 }
 0x2d0   : > { %v4476_v5 = vpop.eup %4475  ;;  %v3695_v58 = vmul.f32 %v4474_v18, %v3663_v0 }
 0x2d1   : > { %v4478_v42 = vpop.eup %4477  ;;  %v3222_v27 = vsel %vm3221_vm13, %v7312_v6, %v3220_v50  ;;  %v3239_v59 = vmul.f32 %v4476_v5, %v7346_v57 }
 0x2d2   : > { %v4480_v22 = vpop.eup %4479  ;;  %v3433_v46 = vmul.f32 0.6931472, %v4478_v42  ;;  %v3225_v63 = vsel %vm3223_vm14, %v3224_v8, %v3222_v27 }
 0x2d3   : > { %v3497_v38 = vmul.f32 0.6931472, %v4480_v22  ;;  %v3311_v21 = vmin.f32 %v3225_v63, %v3279_v30  ;;  %v3240_v20 = vmul.f32 %v4476_v5, %v3239_v59  ;;  %v4482_v19 = vpop.eup %4481 }
 0x2d4   : > { %v3633_v52 = vmul.f32 %v4482_v19, %v2433_v24 }
 0x2d5   : > { %v3533_v56 = vsub.f32 %v3433_v46, %v3497_v38  ;;  %v3343_v14 = vsub.f32 %v7330_v60, %v3311_v21  ;;  %v3375_v7 = vadd.f32 %v3311_v21, %v7330_v60  ;;  %v3241_v35 = vmul.f32 0.5, %v3240_v20 }
 0x2d6   : > { %v3665_v54 = vsub.f32 2.0, %v3633_v52 }
 0x2d7   : > { %3757 = vst [vmem:[%s6185_s12 + $0xd8] sm:$0xff] %v3533_v56  ;;  %4483 = vlog2.f32 %v3375_v7  ;;  %v3567_v6 = vmul.f32 0.5, %v3343_v14  ;;  %v3242_v37 = vsub.f32 1.5, %v3241_v35 }
 0x2d8   : > { %4485 = vlog2.f32 %v3343_v14  ;;  %v3697_v40 = vmul.f32 %v4482_v19, %v3665_v54 }
 0x2d9   : > { %v7367_v45 = vmul.f32 %v3695_v58, %v3567_v6  ;;  %v3243_v49 = vmul.f32 %v4476_v5, %v3242_v37 }
 0x2db   : > { %v3244_v43 = vmul.f32 %v3243_v49, %v7346_v57 }
 0x2dd   : > { %v4484_v60 = vpop.eup %4483  ;;  %v3246_v15 = vsel %vm3245_vm15, %v7346_v57, %v3244_v43 }
 0x2de   : > { %v4486_v47 = vpop.eup %4485  ;;  %v3437_v13 = vmul.f32 0.6931472, %v4484_v60  ;;  %v3249_v41 = vsel %vm3247_vm0, %v3248_v29, %v3246_v15 }
 0x2df   : > { %v3501_v1 = vmul.f32 0.6931472, %v4486_v47  ;;  %v3313_v9 = vmin.f32 %v3249_v41, %v3281_v10 }
 0x2e1   : > { %v3535_v62 = vsub.f32 %v3437_v13, %v3501_v1  ;;  %v3345_v39 = vsub.f32 %v2433_v24, %v3313_v9  ;;  %v3377_v17 = vadd.f32 %v3313_v9, %v2433_v24 }
 0x2e3   : > { %3759 = vst [vmem:[%s6185_s12 + $0xe8] sm:$0xff] %v3535_v62  ;;  %4487 = vlog2.f32 %v3377_v17  ;;  %v3569_v53 = vmul.f32 0.5, %v3345_v39 }
 0x2e4   : > { %4489 = vlog2.f32 %v3345_v39 }
 0x2e5   : > { %v7375_v18 = vmul.f32 %v3697_v40, %v3569_v53 }
 0x2e9   : > { %v4488_v57 = vpop.eup %4487 }
 0x2ea   : > { %v4490_v32 = vpop.eup %4489  ;;  %v3441_v36 = vmul.f32 0.6931472, %v4488_v57 }
 0x2eb   : > { %v3505_v50 = vmul.f32 0.6931472, %v4490_v32  ;;  %3773 = sbr.rel (%p7067_p0) target bundleno = 792 (0x318), region = 40 }
 0x2ed   : > { %v3537_v44 = vsub.f32 %v3441_v36, %v3505_v50 }
 0x2ef   : > { %3761 = vst [vmem:[%s6185_s12 + $0xf8] sm:$0xff] %v3537_v44 }
 0x2f0   : > { %v3774_v24 = vlaneseq  ;;  %v7385_v5 = vstv %s7046_s13  ;;  %v8103_v56 = vld [vmem:[#allocation22_spill] sm:$0xff]  ;;  %v8104_v58 = vld [vmem:[#allocation29_spill] sm:$0xff]  ;;  %v8105_v49 = vld [vmem:[#allocation27_spill] sm:$0xff] }
 0x2f1   : > { %v8106_v29 = vld [vmem:[#allocation33_spill] sm:$0xff]  ;;  %v8109_v44 = vld [vmem:[#allocation46_spill] sm:$0xff] }
 0x2f2   : > { %v7387_v8 = vshrl.u32 %v3774_v24, 7  ;;  %v7389_v42 = vand.u32 127, %v3774_v24  ;;  %v8107_v1 = vld [vmem:[#allocation37_spill] sm:$0xff] }
 0x2f3   : > { %v8108_v17 = vld [vmem:[#allocation41_spill] sm:$0xff] }
 0x2f4   : > { %v3792_v27 = vadd.s32 %v7385_v5, %v7387_v8  ;;  %v7394_v30 = vadd.s32 128, %v7389_v42  ;;  %v3776_v59 = vadd.s32 8, %v7387_v8  ;;  %v3777_v22 = vadd.s32 16, %v7387_v8 }
 0x2f5   : > { %v3778_v46 = vadd.s32 24, %v7387_v8  ;;  %v3779_v63 = vadd.s32 32, %v7387_v8  ;;  %v3780_v38 = vadd.s32 40, %v7387_v8  ;;  %v3781_v21 = vadd.s32 48, %v7387_v8 }
 0x2f6   : > { %vm3814_vm1 = vcmp.eq.s32.totalorder %v3792_v27, %v7389_v42  ;;  %vm3815_vm2 = vcmp.eq.s32.totalorder %v3792_v27, %v7394_v30  ;;  %v3793_v0 = vadd.s32 %v7385_v5, %v3776_v59  ;;  %v3794_v20 = vadd.s32 %v7385_v5, %v3777_v22 }
 0x2f7   : > { %v3846_v14 = vsel %vm3814_vm1, 0.0, %v8103_v56  ;;  %v3847_v7 = vsel %vm3815_vm2, 0.0, %v6889_v55  ;;  %v3795_v35 = vadd.s32 %v7385_v5, %v3778_v46  ;;  %v3796_v6 = vadd.s32 %v7385_v5, %v3779_v63  ;;  %v8110_v46 = vld [vmem:[#allocation52_spill] sm:$0xff] }
 0x2f8   : > { %3878 = vst [vmem:[%s7380_s17] sm:$0xff] %v3846_v14  ;;  %vm3816_vm3 = vcmp.eq.s32.totalorder %v3793_v0, %v7389_v42  ;;  %vm3817_vm4 = vcmp.eq.s32.totalorder %v3793_v0, %v7394_v30  ;;  %vm3818_vm5 = vcmp.eq.s32.totalorder %v3794_v20, %v7389_v42  ;;  %vm3819_vm6 = vcmp.eq.s32.totalorder %v3794_v20, %v7394_v30  ;;  %v8111_v20 = vld [vmem:[#allocation30_spill] sm:$0xff] }
 0x2f9   : > { %3879 = vst [vmem:[%s7380_s17 + $0x8] sm:$0xff] %v3847_v7  ;;  %v3848_v37 = vsel %vm3816_vm3, 0.0, %v8104_v58  ;;  %v3849_v19 = vsel %vm3817_vm4, 0.0, %v6909_v28  ;;  %v3850_v43 = vsel %vm3818_vm5, 0.0, %v8105_v49  ;;  %v3851_v52 = vsel %vm3819_vm6, 0.0, %v6952_v48 }
 0x2fa   : > { %3880 = vst [vmem:[%s7380_s17 + $0x10] sm:$0xff] %v3848_v37  ;;  %vm3820_vm7 = vcmp.eq.s32.totalorder %v3795_v35, %v7389_v42  ;;  %vm3821_vm8 = vcmp.eq.s32.totalorder %v3795_v35, %v7394_v30  ;;  %vm3822_vm9 = vcmp.eq.s32.totalorder %v3796_v6, %v7389_v42  ;;  %vm3823_vm10 = vcmp.eq.s32.totalorder %v3796_v6, %v7394_v30  ;;  %v8112_v6 = vld [vmem:[#allocation51_spill] sm:$0xff] }
 0x2fb   : > { %3881 = vst [vmem:[%s7380_s17 + $0x18] sm:$0xff] %v3849_v19  ;;  %v3852_v60 = vsel %vm3820_vm7, 0.0, %v8106_v29  ;;  %v3853_v15 = vsel %vm3821_vm8, 0.0, %v7014_v16  ;;  %v3797_v10 = vadd.s32 %v7385_v5, %v3780_v38  ;;  %v3798_v47 = vadd.s32 %v7385_v5, %v3781_v21 }
 0x2fc   : > { %3882 = vst [vmem:[%s7380_s17 + $0x20] sm:$0xff] %v3850_v43  ;;  %v3782_v13 = vadd.s32 56, %v7387_v8  ;;  %v3783_v41 = vadd.s32 64, %v7387_v8  ;;  %v3854_v9 = vsel %vm3822_vm9, 0.0, %v8107_v1  ;;  %v3855_v54 = vsel %vm3823_vm10, 0.0, %v7054_v12  ;;  %v8113_v43 = vld [vmem:[#allocation9_spill] sm:$0xff] }
 0x2fd   : > { %3883 = vst [vmem:[%s7380_s17 + $0x28] sm:$0xff] %v3851_v52  ;;  %v3784_v62 = vadd.s32 72, %v7387_v8  ;;  %v3785_v39 = vadd.s32 80, %v7387_v8  ;;  %vm3824_vm11 = vcmp.eq.s32.totalorder %v3797_v10, %v7389_v42  ;;  %vm3825_vm12 = vcmp.eq.s32.totalorder %v3797_v10, %v7394_v30  ;;  %v8115_v1 = vld [vmem:[#allocation57_spill] sm:$0xff] }
 0x2fe   : > { %3884 = vst [vmem:[%s7380_s17 + $0x30] sm:$0xff] %v3852_v60  ;;  %vm3826_vm13 = vcmp.eq.s32.totalorder %v3798_v47, %v7389_v42  ;;  %vm3827_vm14 = vcmp.eq.s32.totalorder %v3798_v47, %v7394_v30  ;;  %v3856_v53 = vsel %vm3824_vm11, 0.0, %v8108_v17  ;;  %v3786_v40 = vadd.s32 88, %v7387_v8 }
 0x2ff   : > { %3885 = vst [vmem:[%s7380_s17 + $0x38] sm:$0xff] %v3853_v15  ;;  %v3857_v57 = vsel %vm3825_vm12, 0.0, %v7097_v34  ;;  %v3799_v32 = vadd.s32 %v7385_v5, %v3782_v13  ;;  %v3800_v36 = vadd.s32 %v7385_v5, %v3783_v41  ;;  %v3801_v50 = vadd.s32 %v7385_v5, %v3784_v62  ;;  %v8114_v15 = vld [vmem:[#allocation56_spill] sm:$0xff] }
 0x300   : > { %3886 = vst [vmem:[%s7380_s17 + $0x40] sm:$0xff] %v3854_v9  ;;  %v3858_v24 = vsel %vm3826_vm13, 0.0, %v8109_v44  ;;  %v3859_v27 = vsel %vm3827_vm14, 0.0, %v7125_v4  ;;  %v3787_v59 = vadd.s32 96, %v7387_v8  ;;  %v3802_v22 = vadd.s32 %v7385_v5, %v3785_v39 }
 0x301   : > { %3887 = vst [vmem:[%s7380_s17 + $0x48] sm:$0xff] %v3855_v54  ;;  %vm3828_vm15 = vcmp.eq.s32.totalorder %v3799_v32, %v7389_v42  ;;  %vm3829_vm0 = vcmp.eq.s32.totalorder %v3799_v32, %v7394_v30  ;;  %vm3830_vm1 = vcmp.eq.s32.totalorder %v3800_v36, %v7389_v42  ;;  %vm3831_vm2 = vcmp.eq.s32.totalorder %v3800_v36, %v7394_v30 }
 0x302   : > { %3888 = vst [vmem:[%s7380_s17 + $0x50] sm:$0xff] %v3856_v53  ;;  %v3860_v63 = vsel %vm3828_vm15, 0.0, %v8110_v46  ;;  %v3861_v38 = vsel %vm3829_vm0, 0.0, %v7151_v26  ;;  %vm3832_vm3 = vcmp.eq.s32.totalorder %v3801_v50, %v7389_v42  ;;  %v3803_v21 = vadd.s32 %v7385_v5, %v3786_v40 }
 0x303   : > { %3889 = vst [vmem:[%s7380_s17 + $0x58] sm:$0xff] %v3857_v57  ;;  %v3788_v0 = vadd.s32 104, %v7387_v8  ;;  %v3862_v56 = vsel %vm3830_vm1, 0.0, %v8111_v20  ;;  %vm3833_vm4 = vcmp.eq.s32.totalorder %v3801_v50, %v7394_v30  ;;  %v3863_v14 = vsel %vm3831_vm2, 0.0, %v7191_v61 }
 0x304   : > { %3890 = vst [vmem:[%s7380_s17 + $0x60] sm:$0xff] %v3858_v24  ;;  %vm3834_vm5 = vcmp.eq.s32.totalorder %v3802_v22, %v7389_v42  ;;  %v3804_v7 = vadd.s32 %v7385_v5, %v3787_v59  ;;  %v3789_v35 = vadd.s32 112, %v7387_v8  ;;  %v3864_v58 = vsel %vm3832_vm3, 0.0, %v8112_v6 }
 0x305   : > { %3891 = vst [vmem:[%s7380_s17 + $0x68] sm:$0xff] %v3859_v27  ;;  %vm3835_vm6 = vcmp.eq.s32.totalorder %v3802_v22, %v7394_v30  ;;  %v3865_v37 = vsel %vm3833_vm4, 0.0, %v7247_v25  ;;  %vm3836_vm7 = vcmp.eq.s32.totalorder %v3803_v21, %v7389_v42  ;;  %v3805_v19 = vadd.s32 %v7385_v5, %v3788_v0 }
 0x306   : > { %3892 = vst [vmem:[%s7380_s17 + $0x70] sm:$0xff] %v3860_v63  ;;  %v3790_v49 = vadd.s32 120, %v7387_v8  ;;  %v3866_v52 = vsel %vm3834_vm5, 0.0, %v8113_v43  ;;  %vm3837_vm8 = vcmp.eq.s32.totalorder %v3803_v21, %v7394_v30  ;;  %v3867_v29 = vsel %vm3835_vm6, 0.0, %v7281_v23 }
 0x307   : > { %3893 = vst [vmem:[%s7380_s17 + $0x78] sm:$0xff] %v3861_v38  ;;  %vm3838_vm9 = vcmp.eq.s32.totalorder %v3804_v7, %v7389_v42  ;;  %v3806_v60 = vadd.s32 %v7385_v5, %v3789_v35  ;;  %v3868_v10 = vsel %vm3836_vm7, 0.0, %v8114_v15  ;;  %vm3839_vm10 = vcmp.eq.s32.totalorder %v3804_v7, %v7394_v30 }
 0x308   : > { %3894 = vst [vmem:[%s7380_s17 + $0x80] sm:$0xff] %v3862_v56  ;;  %v3869_v8 = vsel %vm3837_vm8, 0.0, %v7306_v2  ;;  %vm3840_vm11 = vcmp.eq.s32.totalorder %v3805_v19, %v7389_v42  ;;  %v3807_v47 = vadd.s32 %v7385_v5, %v3790_v49  ;;  %v3870_v13 = vsel %vm3838_vm9, 0.0, %v6707_v31 }
 0x309   : > { %3895 = vst [vmem:[%s7380_s17 + $0x88] sm:$0xff] %v3863_v14  ;;  %vm3841_vm12 = vcmp.eq.s32.totalorder %v3805_v19, %v7394_v30  ;;  %v3871_v41 = vsel %vm3839_vm10, 0.0, %v7338_v11  ;;  %vm3842_vm13 = vcmp.eq.s32.totalorder %v3806_v60, %v7389_v42  ;;  %v3872_v9 = vsel %vm3840_vm11, 0.0, %v8115_v1 }
 0x30a   : > { %3896 = vst [vmem:[%s7380_s17 + $0x90] sm:$0xff] %v3864_v58  ;;  %vm3843_vm14 = vcmp.eq.s32.totalorder %v3806_v60, %v7394_v30  ;;  %v3873_v5 = vsel %vm3841_vm12, 0.0, %v7353_v33  ;;  %vm3844_vm15 = vcmp.eq.s32.totalorder %v3807_v47, %v7389_v42  ;;  %v3874_v54 = vsel %vm3842_vm13, 0.0, %v6807_v3 }
 0x30b   : > { %3897 = vst [vmem:[%s7380_s17 + $0x98] sm:$0xff] %v3865_v37  ;;  %vm3845_vm0 = vcmp.eq.s32.totalorder %v3807_v47, %v7394_v30  ;;  %v3875_v62 = vsel %vm3843_vm14, 0.0, %v7367_v45  ;;  %v3876_v39 = vsel %vm3844_vm15, 0.0, %v6837_v51 }
 0x30c   : > { %3898 = vst [vmem:[%s7380_s17 + $0xa0] sm:$0xff] %v3866_v52  ;;  %v3877_v17 = vsel %vm3845_vm0, 0.0, %v7375_v18 }
 0x30d   : > { %3899 = vst [vmem:[%s7380_s17 + $0xa8] sm:$0xff] %v3867_v29 }
 0x30e   : > { %3900 = vst [vmem:[%s7380_s17 + $0xb0] sm:$0xff] %v3868_v10 }
 0x30f   : > { %3901 = vst [vmem:[%s7380_s17 + $0xb8] sm:$0xff] %v3869_v8 }
 0x310   : > { %3902 = vst [vmem:[%s7380_s17 + $0xc0] sm:$0xff] %v3870_v13 }
 0x311   : > { %3903 = vst [vmem:[%s7380_s17 + $0xc8] sm:$0xff] %v3871_v41 }
 0x312   : > { %3904 = vst [vmem:[%s7380_s17 + $0xd0] sm:$0xff] %v3872_v9 }
 0x313   : > { %3905 = vst [vmem:[%s7380_s17 + $0xd8] sm:$0xff] %v3873_v5 }
 0x314   : > { %3906 = vst [vmem:[%s7380_s17 + $0xe0] sm:$0xff] %v3874_v54 }
 0x315   : > { %3907 = vst [vmem:[%s7380_s17 + $0xe8] sm:$0xff] %v3875_v62 }
 0x316   : > { %3908 = vst [vmem:[%s7380_s17 + $0xf0] sm:$0xff] %v3876_v39 }
 0x317   : > { %3909 = vst [vmem:[%s7380_s17 + $0xf8] sm:$0xff] %v3877_v17 }
 0x318 PF: > { %3912 = sbr.rel (!%p7067_p0) target bundleno = 824 (0x338), region = 44  ;;  %v8116_v42 = vld [vmem:[#allocation22_spill] sm:$0xff] (%p7067_p0)  ;;  %3914 = vst [vmem:[%s7380_s17 + $0x8] sm:$0xff] (%p7067_p0), %v6889_v55  ;;  %v8117_v30 = vld [vmem:[#allocation29_spill] sm:$0xff] (%p7067_p0)  ;;  %v8118_v53 = vld [vmem:[#allocation27_spill] sm:$0xff] (%p7067_p0) }
 0x319   : > { %3913 = vst [vmem:[%s7380_s17] sm:$0xff] (%p7067_p0), %v8116_v42  ;;  %v8119_v40 = vld [vmem:[#allocation33_spill] sm:$0xff] (%p7067_p0) }
 0x31a   : > { %3915 = vst [vmem:[%s7380_s17 + $0x10] sm:$0xff] (%p7067_p0), %v8117_v30  ;;  %v8120_v57 = vld [vmem:[#allocation37_spill] sm:$0xff] (%p7067_p0) }
 0x31b   : > { %3916 = vst [vmem:[%s7380_s17 + $0x18] sm:$0xff] (%p7067_p0), %v6909_v28  ;;  %v8121_v55 = vld [vmem:[#allocation41_spill] sm:$0xff] (%p7067_p0)  ;;  %v8122_v28 = vld [vmem:[#allocation46_spill] sm:$0xff] (%p7067_p0) }
 0x31c   : > { %3917 = vst [vmem:[%s7380_s17 + $0x20] sm:$0xff] (%p7067_p0), %v8118_v53 }
 0x31d   : > { %3918 = vst [vmem:[%s7380_s17 + $0x28] sm:$0xff] %v6952_v48  ;;  %v8123_v48 = vld [vmem:[#allocation52_spill] sm:$0xff] }
 0x31e   : > { %3919 = vst [vmem:[%s7380_s17 + $0x30] sm:$0xff] %v8119_v40 }
 0x31f   : > { %3920 = vst [vmem:[%s7380_s17 + $0x38] sm:$0xff] %v7014_v16  ;;  %v8124_v16 = vld [vmem:[#allocation30_spill] sm:$0xff] }
 0x320   : > { %3921 = vst [vmem:[%s7380_s17 + $0x40] sm:$0xff] %v8120_v57 }
 0x321   : > { %3922 = vst [vmem:[%s7380_s17 + $0x48] sm:$0xff] %v7054_v12  ;;  %v8125_v12 = vld [vmem:[#allocation51_spill] sm:$0xff] }
 0x322   : > { %3923 = vst [vmem:[%s7380_s17 + $0x50] sm:$0xff] %v8121_v55 }
 0x323   : > { %3924 = vst [vmem:[%s7380_s17 + $0x58] sm:$0xff] %v7097_v34  ;;  %v8126_v34 = vld [vmem:[#allocation9_spill] sm:$0xff] }
 0x324   : > { %3925 = vst [vmem:[%s7380_s17 + $0x60] sm:$0xff] %v8122_v28 }
 0x325   : > { %3926 = vst [vmem:[%s7380_s17 + $0x68] sm:$0xff] %v7125_v4  ;;  %v8127_v4 = vld [vmem:[#allocation56_spill] sm:$0xff] }
 0x326   : > { %3927 = vst [vmem:[%s7380_s17 + $0x70] sm:$0xff] %v8123_v48 }
 0x327   : > { %3928 = vst [vmem:[%s7380_s17 + $0x78] sm:$0xff] %v7151_v26  ;;  %v8128_v26 = vld [vmem:[#allocation57_spill] sm:$0xff] }
 0x328   : > { %3929 = vst [vmem:[%s7380_s17 + $0x80] sm:$0xff] %v8124_v16 }
 0x329   : > { %3930 = vst [vmem:[%s7380_s17 + $0x88] sm:$0xff] %v7191_v61 }
 0x32a   : > { %3931 = vst [vmem:[%s7380_s17 + $0x90] sm:$0xff] %v8125_v12 }
 0x32b   : > { %3932 = vst [vmem:[%s7380_s17 + $0x98] sm:$0xff] %v7247_v25 }
 0x32c   : > { %3933 = vst [vmem:[%s7380_s17 + $0xa0] sm:$0xff] %v8126_v34 }
 0x32d   : > { %3934 = vst [vmem:[%s7380_s17 + $0xa8] sm:$0xff] %v7281_v23 }
 0x32e   : > { %3935 = vst [vmem:[%s7380_s17 + $0xb0] sm:$0xff] %v8127_v4 }
 0x32f   : > { %3936 = vst [vmem:[%s7380_s17 + $0xb8] sm:$0xff] %v7306_v2 }
 0x330   : > { %3937 = vst [vmem:[%s7380_s17 + $0xc0] sm:$0xff] %v6707_v31 }
 0x331   : > { %3938 = vst [vmem:[%s7380_s17 + $0xc8] sm:$0xff] %v7338_v11 }
 0x332   : > { %3939 = vst [vmem:[%s7380_s17 + $0xd0] sm:$0xff] %v8128_v26 }
 0x333   : > { %3940 = vst [vmem:[%s7380_s17 + $0xd8] sm:$0xff] %v7353_v33 }
 0x334   : > { %3941 = vst [vmem:[%s7380_s17 + $0xe0] sm:$0xff] %v6807_v3 }
 0x335   : > { %3942 = vst [vmem:[%s7380_s17 + $0xe8] sm:$0xff] %v7367_v45 }
 0x336   : > { %3943 = vst [vmem:[%s7380_s17 + $0xf0] sm:$0xff] %v6837_v51 }
 0x337   : > { %3944 = vst [vmem:[%s7380_s17 + $0xf8] sm:$0xff] %v7375_v18 }
 0x338 PF: > { %s4166_s24 = sshll.u32 %s4593_s21, 8  ;;  %s3966_s8 = sshll.u32 %s7380_s17, 4  ;;  %s3967_s8 = int_to_ptr.vmem [resolvable:$true] %s3966_s8 }
 0x339   : > { %s3965_s7 = scalar_lea.hbm %s7645_s4, %s4166_s24  ;;  %s3946_s10 = scalar_lea.sflag [#allocation3], %s5782_s9 }
 0x33a   : > { %s3968_s14 = sshll.u32 %s3965_s7, 4  ;;  %s4511_s21 = scalar_lea.hbm %s7645_s4, 512  ;;  %s3969_s14 = int_to_ptr.hbm [resolvable:$true] %s3968_s14 }
 0x33b   : > { %s4505_s25 = sshra.s32 %s3969_s14, 4  ;;  %s4506_s25 = int_to_ptr.hbm [resolvable:$true] %s4505_s25 }
 0x33c   : > { %s4507_s11 = scalar_lea.hbm %s4506_s25, 256  ;;  %p4512_p5 = scmp.lt.s32.totalorder %s4506_s25, %s7645_s4 }
 0x33d   : > { %p4508_p1 = scmp.ne.s32.totalorder %s4506_s25, %s4507_s11  ;;  %p4513_p6 = scmp.lt.s32.totalorder %s4511_s21, %s4507_s11 }
 0x33f   : > { %p4509_p2 = pnand %p4508_p1, %p4676_p4  ;;  %p4514_p7 = por %p4513_p6, %p4512_p5 }
 0x341   : > { %p4510_p3 = pneg %p4509_p2 }
 0x343   : > { %p4515_p9 = pnand %p4514_p7, %p4510_p3 }
 0x345   : > { %4518 = shalt.err (!%p4515_p9)
}
 0x346   : > { %s4604_s17 = smov 256   ;;  %s4605_s27 = smov 16  }
 0x347   : > { %4169 = dma.vmem_to_hbm [thread:$0]  (%p4676_p4), %s3967_s8, 4096, %s3969_s14, %s3946_s10, %s4604_s17, %s4604_s17, %s4605_s27  }
 0x348   : > { %s3985_s13 = scalar_lea.hbm %s7646_s5, %s4166_s24  ;;  %s3986_s15 = sshll.u32 %s6185_s12, 4  ;;  %s3987_s15 = int_to_ptr.vmem [resolvable:$true] %s3986_s15 }
 0x349   : > { %s3988_s0 = sshll.u32 %s3985_s13, 4  ;;  %s3951_s25 = scalar_lea.sflag [#allocation5], %s5782_s9  ;;  %s3989_s0 = int_to_ptr.hbm [resolvable:$true] %s3988_s0 }
 0x34a   : > { %s4533_s11 = sshra.s32 %s3989_s0, 4  ;;  %s4539_s8 = scalar_lea.hbm %s7646_s5, 512  ;;  %s4534_s11 = int_to_ptr.hbm [resolvable:$true] %s4533_s11 }
 0x34b   : > { %s4535_s21 = scalar_lea.hbm %s4534_s11, 256  ;;  %p4540_p13 = scmp.lt.s32.totalorder %s4534_s11, %s7646_s5 }
 0x34c   : > { %p4536_p10 = scmp.ne.s32.totalorder %s4534_s11, %s4535_s21  ;;  %p4541_p0 = scmp.lt.s32.totalorder %s4539_s8, %s4535_s21 }
 0x34e   : > { %p4537_p11 = pnand %p4536_p10, %p4676_p4  ;;  %p4542_p1 = por %p4541_p0, %p4540_p13 }
 0x350   : > { %p4538_p12 = pneg %p4537_p11 }
 0x352   : > { %p4543_p2 = pnand %p4542_p1, %p4538_p12 }
 0x354   : > { %4546 = shalt.err (!%p4543_p2)
}
 0x355   : > { %4170 = dma.vmem_to_hbm [thread:$0]  (%p4676_p4), %s3987_s15, 4096, %s3989_s0, %s3951_s25, %s4604_s17, %s4604_s17, %s4605_s27  }
 0x356 PF: > { %p4180_p3 = scmp.ge.s32.totalorder %s4601_s23, 2  ;;  %s4003_s9 = sand.u32 1, %s4581_s18  }
 0x357   : > { %s4004_s1 = scalar_lea.sflag [#allocation3], %s4003_s9 }
 0x358   : > { %p4174_p5 = pnand %p4180_p3, %p4683_p8 }
 0x35a   : > { %p4175_p6 = pneg %p4174_p5 }
 0x35c   : > { %4572 = dma.done.wait (%p4175_p6), %s4004_s1, 4096  }
 0x35d   : > { %4574 = vsyncadd (%p4175_p6), %s4004_s1, 4294963200  ;;  %s4014_s12 = scalar_lea.sflag [#allocation5], %s4003_s9 }
 0x35e   : > { %4576 = dma.done.wait (%p4175_p6), %s4014_s12, 4096  }
 0x35f   : > { %4578 = vsyncadd (%p4175_p6), %s4014_s12, 4294963200  ;;  %s22_s23 = sadd.s32 1, %s4601_s23   ;;  %s8129_s18 = smov %s4585_s19 }
 0x360   : > { %p19_p7 = scmp.ge.s32.totalorder %s22_s23, 4   ;;  %s8130_s19 = smov %s4589_s20 }
 0x361   : > { %s8131_s20 = smov %s4689_s6  ;;  %s8132_s21 = smov %s4597_s22 }
 0x362   : > { %s8133_s22 = smov %s8135_s26  ;;  %21 = sbr.rel (!%p19_p7) target bundleno = 9 (0x9), region = 105 }
 0x367   :  { %4020 = vsyncpa [#allocation3], 1 }
 0x368   :  { %4022 = vsyncpa [#allocation3 + $0x1], 1 }
 0x369   :  { %4023 = vsyncpa [#allocation5], 1 }
 0x36a   :  { %4025 = vsyncpa [#allocation5 + $0x1], 1 }

</bundles_post_ra>
